<compile_context>
chip_gen: v7x
topology: tpu7x:2x2x1
jax: 0.10.0
libtpu: 0.0.40
codegen_flags: <defaults>
</compile_context>

<pallas_src>
import math

import jax
import jax.numpy as jnp
from jax import lax
from jax.experimental import pallas as pl
from jax.experimental.pallas import tpu as pltpu


# ------------------------------ Pallas kernel -------------------------------

def _fused_forward_kernel(xpad_ref, w0_ref, b0_ref, dmat_ref, w3_ref, b3_ref,
                          w67_ref, bmap_ref, out_ref,
                          p0_ref, p1_ref, a3_ref, s5_ref):
    """Entire features[0..7] pipeline, all intermediates VMEM-resident.

    Activation layout everywhere: (W, H, C) with C = 128 on the lane dim.
      xpad_ref : (22, 22,   8)  input, spatially padded by 1, channels 3->8
      p0_ref   : (26, 22, 128)  conv0 output, padded for avgpool (pad_w=3, pad_h=1)
      p1_ref   : (18, 16, 128)  avgpool+relu output, padded for conv3 (pad=3)
      a3_ref   : (14, 12, 128)  conv3 output
      s5_ref   : ( 9,  9, 128)  adaptive-maxpool+sigmoid output, padded for conv67
      out_ref  : ( 7,  7, 128)  folded conv6+conv7 output (W, H, C)
    """
    f32 = jnp.float32

    # Zero-init padded scratch; the untouched borders are the conv/pool padding.
    p0_ref[...] = jnp.zeros(p0_ref.shape, f32)
    p1_ref[...] = jnp.zeros(p1_ref.shape, f32)
    s5_ref[...] = jnp.zeros(s5_ref.shape, f32)

    # ---------------- features[0]: Conv2d(3, 32, 3, 1, 1) -------------------
    def conv0_col(w, c):
        acc = jnp.zeros((20, 128), f32)
        for dw in range(3):
            plane = xpad_ref[w + dw]                       # (22, 8)
            for dh in range(3):
                t = dw * 3 + dh
                lhs = plane[dh:dh + 20, :]                 # (20, 8)
                acc = acc + jnp.dot(lhs, w0_ref[t * 8:(t + 1) * 8, :],
                                    preferred_element_type=f32)
        col = acc + b0_ref[...]                            # (20, 128)
        full = jnp.concatenate(
            [jnp.zeros((1, 128), f32), col, jnp.zeros((1, 128), f32)], axis=0)
        p0_ref[3 + w] = full                               # (22, 128) plane
        return c

    lax.fori_loop(0, 20, conv0_col, 0)

    # -------- features[1]+[2]: AvgPool2d(3, 2, (1, 3)) + ReLU ---------------
    # dmat is a (10, 22) matrix with 1/9 on each 3-row pooling window, so the
    # H-direction window-sum + averaging is a single MXU dot.
    def pool1_col(j, c):
        wsum = p0_ref[2 * j] + p0_ref[2 * j + 1] + p0_ref[2 * j + 2]   # (22,128)
        col = jnp.dot(dmat_ref[...], wsum, preferred_element_type=f32)  # (10,128)
        col = jnp.maximum(col, 0.0)
        full = jnp.concatenate(
            [jnp.zeros((3, 128), f32), col, jnp.zeros((3, 128), f32)], axis=0)
        p1_ref[3 + j] = full                               # (16, 128) plane
        return c

    lax.fori_loop(0, 12, pool1_col, 0)

    # ---------------- features[3]: Conv2d(32, 64, 5, 1, 3) ------------------
    def conv3_col(w, c):
        acc = jnp.zeros((12, 128), f32)
        for dw in range(5):
            plane = p1_ref[w + dw]                         # (16, 128)
            for dh in range(5):
                t = dw * 5 + dh
                lhs = plane[dh:dh + 12, :]                 # (12, 128)
                acc = acc + jnp.dot(lhs, w3_ref[t * 128:(t + 1) * 128, :],
                                    preferred_element_type=f32)
        a3_ref[w] = acc + b3_ref[...]                      # (12, 128) plane
        return c

    lax.fori_loop(0, 14, conv3_col, 0)

    # ------- features[4]+[5]: AdaptiveMaxPool2d((7,7)) + Sigmoid ------------
    # W windows (14 -> 7) are all size 2; H windows (12 -> 7) are ragged.
    hs = (0, 1, 3, 5, 6, 8, 10)
    he = (2, 4, 6, 7, 9, 11, 12)

    def pool4_col(j, c):
        colmax = jnp.maximum(a3_ref[2 * j], a3_ref[2 * j + 1])          # (12,128)
        parts = [jnp.max(colmax[hs[i]:he[i], :], axis=0, keepdims=True)
                 for i in range(7)]
        col = jax.nn.sigmoid(jnp.concatenate(parts, axis=0))            # (7,128)
        full = jnp.concatenate(
            [jnp.zeros((1, 128), f32), col, jnp.zeros((1, 128), f32)], axis=0)
        s5_ref[j + 1] = full                               # (9, 128) plane
        return c

    lax.fori_loop(0, 7, pool4_col, 0)

    # ---- features[6]+[7]: Conv2d(64,12,1) folded into Conv2d(12,128,3,1,1) --
    # Effective 3x3 conv 64(->128 padded) -> 128 plus an exact per-position
    # bias map (handles conv7's zero-padding of conv6's biased output).
    def conv67_col(w, c):
        acc = jnp.zeros((7, 128), f32)
        for dw in range(3):
            plane = s5_ref[w + dw]                         # (9, 128)
            for dh in range(3):
                t = dw * 3 + dh
                lhs = plane[dh:dh + 7, :]                  # (7, 128)
                acc = acc + jnp.dot(lhs, w67_ref[t * 128:(t + 1) * 128, :],
                                    preferred_element_type=f32)
        out_ref[w] = acc + bmap_ref[w]                     # (7, 128) plane
        return c

    lax.fori_loop(0, 7, conv67_col, 0)


# ------------------------------ Pallas wrapper -------------------------------

def _vmem_spec():
    return pl.BlockSpec(memory_space=pltpu.MemorySpace.VMEM)


def _fused_forward(xpad, kp):
    return pl.pallas_call(
        _fused_forward_kernel,
        out_shape=jax.ShapeDtypeStruct((7, 7, 128), jnp.float32),
        in_specs=[_vmem_spec() for _ in range(8)],
        out_specs=_vmem_spec(),
        scratch_shapes=[
            pltpu.VMEM((26, 22, 128), jnp.float32),   # conv0 out, padded for avgpool
            pltpu.VMEM((18, 16, 128), jnp.float32),   # avgpool+relu out, padded for conv3
            pltpu.VMEM((14, 12, 128), jnp.float32),   # conv3 out
            pltpu.VMEM((9, 9, 128), jnp.float32),     # maxpool+sigmoid out, padded for conv67
        ],
    )(xpad, kp["w0"], kp["b0"], kp["dmat"], kp["w3"], kp["b3"],
      kp["w67"], kp["bmap"])


# ------------------------------ Parameters ----------------------------------

def init_params(key):
    ks = jax.random.split(key, 8)

    def conv_init(kw_key, kb_key, co, ci, k):
        fan_in = ci * k * k
        bound = 1.0 / math.sqrt(fan_in)
        w = jax.random.uniform(kw_key, (co, ci, k, k), jnp.float32, -bound, bound)
        b = jax.random.uniform(kb_key, (co,), jnp.float32, -bound, bound)
        return w, b

    p = {}
    p["conv0_w"], p["conv0_b"] = conv_init(ks[0], ks[1], 32, 3, 3)    # Conv2d(3,32,3,1,1)
    p["conv3_w"], p["conv3_b"] = conv_init(ks[2], ks[3], 64, 32, 5)   # Conv2d(32,64,5,1,3)
    p["conv6_w"], p["conv6_b"] = conv_init(ks[4], ks[5], 12, 64, 1)   # Conv2d(64,12,1,1,0)
    p["conv7_w"], p["conv7_b"] = conv_init(ks[6], ks[7], 128, 12, 3)  # Conv2d(12,128,3,1,1)
    return p


def prepare_params(p):
    """One-time repack of torch-layout weights into kernel-ready tensors."""
    f32 = jnp.float32

    # conv0: (O,I,KH,KW) -> (KW,KH,I,O), pad I 3->8, O 32->128, flatten K dim.
    w0 = jnp.transpose(p["conv0_w"], (3, 2, 1, 0))
    w0 = jnp.pad(w0, ((0, 0), (0, 0), (0, 5), (0, 96))).reshape(72, 128)
    b0 = jnp.pad(p["conv0_b"], (0, 96)).reshape(1, 128).astype(f32)

    # avgpool H-window matrix: dmat[i, 2i..2i+2] = 1/9 (count_include_pad=True).
    ii = jnp.arange(10)[:, None]
    rr = jnp.arange(22)[None, :]
    dmat = jnp.where((rr >= 2 * ii) & (rr <= 2 * ii + 2), 1.0 / 9.0, 0.0).astype(f32)

    # conv3: (O,I,KH,KW) -> (KW,KH,I,O), pad I 32->128, O 64->128.
    w3 = jnp.transpose(p["conv3_w"], (3, 2, 1, 0))
    w3 = jnp.pad(w3, ((0, 0), (0, 0), (0, 96), (0, 64))).reshape(5 * 5 * 128, 128)
    b3 = jnp.pad(p["conv3_b"], (0, 64)).reshape(1, 128).astype(f32)

    # Fold conv6 (1x1, 64->12) into conv7 (3x3, 12->128).
    w6m = p["conv6_w"].reshape(12, 64)                       # (M, Cin)
    w7 = p["conv7_w"]                                        # (O=128, M=12, 3, 3)
    w_eff = jnp.einsum("omhw,mc->ochw", w7, w6m)             # (128, 64, 3, 3)
    w67 = jnp.transpose(w_eff, (3, 2, 1, 0))                 # (KW,KH,I=64,O=128)
    w67 = jnp.pad(w67, ((0, 0), (0, 0), (0, 64), (0, 0))).reshape(9 * 128, 128)

    # Exact position-dependent bias of the folded conv:
    # conv7 zero-pads conv6's (biased) output, so b6 only contributes at taps
    # that land inside the 7x7 valid region.
    b6img = jnp.broadcast_to(p["conv6_b"].reshape(1, 1, 1, 12), (1, 7, 7, 12))
    w7_hwio = jnp.transpose(w7, (2, 3, 1, 0))                # (3,3,12,128)
    bmap_hw = lax.conv_general_dilated(
        b6img, w7_hwio, window_strides=(1, 1), padding="SAME",
        dimension_numbers=("NHWC", "HWIO", "NHWC"))[0] + p["conv7_b"]   # (7,7,128)[h,w,o]
    bmap = jnp.transpose(bmap_hw, (1, 0, 2))                 # (w,h,o)

    return {"w0": w0.astype(f32), "b0": b0, "dmat": dmat,
            "w3": w3.astype(f32), "b3": b3,
            "w67": w67.astype(f32), "bmap": bmap.astype(f32)}


# ------------------------------ Forward pass ---------------------------------

def model_forward(x_nchw, y, kparams):
    # Specialized to the module's input: x (1, 3, 20, 20) NCHW.
    x_whc = jnp.transpose(x_nchw[0].astype(jnp.float32), (2, 1, 0))   # (W,H,C)=(20,20,3)
    xpad = jnp.pad(x_whc, ((1, 1), (1, 1), (0, 5)))                   # (22,22,8)

    out_whc = _fused_forward(xpad, kparams)                           # (7,7,128) [w,h,c]
    z1 = jnp.transpose(out_whc, (2, 1, 0))[None]                      # (1,128,7,7) NCHW

    # TODO(synk): features[8] GroupNorm(num_groups=5, num_channels=24) is invalid for the
    #             128-channel tensor produced by features[7] (PyTorch raises) -> not applied.
    # TODO(synk): forward() indexes self.features[9]/[10], which do not exist, so the z2
    #             branch and the y-based outputs (o1, o2, o2[:,:,:,:4]) are undefined.
    del y
    return z1


# --------------------------------- Main --------------------------------------

if __name__ == "__main__":
    key = jax.random.PRNGKey(0)
    kx, ky, kp = jax.random.split(key, 3)
    x = jax.random.normal(kx, (1, 3, 20, 20), dtype=jnp.float32)
    y = jax.random.normal(ky, (1, 20, 20, 16), dtype=jnp.float32)

    params = init_params(kp)
    kparams = prepare_params(params)   # one-time repack (folds conv6 into conv7)

    out = jax.jit(model_forward)(x, y, kparams)
    out = jax.block_until_ready(out)
    assert out.shape == (1, 128, 7, 7)
    assert bool(jnp.all(jnp.isfinite(out)))
    print("KERNEL_OK")
</pallas_src>

<mosaic_0001>
module attributes {stable_mosaic.version = 11 : i64} {
  func.func @_fused_forward_kernel(%arg0: memref<22x22x8xf32, #tpu.memory_space<vmem>>, %arg1: memref<72x128xf32, #tpu.memory_space<vmem>>, %arg2: memref<1x128xf32, #tpu.memory_space<vmem>>, %arg3: memref<10x22xf32, #tpu.memory_space<vmem>>, %arg4: memref<3200x128xf32, #tpu.memory_space<vmem>>, %arg5: memref<1x128xf32, #tpu.memory_space<vmem>>, %arg6: memref<1152x128xf32, #tpu.memory_space<vmem>>, %arg7: memref<7x7x128xf32, #tpu.memory_space<vmem>>, %arg8: memref<7x7x128xf32, #tpu.memory_space<vmem>>, %arg9: memref<26x22x128xf32, #tpu.memory_space<vmem>>, %arg10: memref<18x16x128xf32, #tpu.memory_space<vmem>>, %arg11: memref<14x12x128xf32, #tpu.memory_space<vmem>>, %arg12: memref<9x9x128xf32, #tpu.memory_space<vmem>>) attributes {dimension_semantics = [], scalar_prefetch = 0 : i64, scratch_operands = 4 : i64, tpu.core_type = #tpu.core_type<tc>} {
    %cst = arith.constant 0.000000e+00 : f32
    %0 = vector.broadcast %cst : f32 to vector<26x22x128xf32>
    %c0 = arith.constant 0 : index
    %c0_0 = arith.constant 0 : index
    %c0_1 = arith.constant 0 : index
    %1 = vector.load %arg9[%c0, %c0_0, %c0_1] : memref<26x22x128xf32, #tpu.memory_space<vmem>>, vector<26x22x128xf32>
    tpu.vector_store %arg9[%c0, %c0_0, %c0_1], %0 {strides = array<i32>} : memref<26x22x128xf32, #tpu.memory_space<vmem>>, vector<26x22x128xf32>,
    %cst_2 = arith.constant 0.000000e+00 : f32
    %2 = vector.broadcast %cst_2 : f32 to vector<18x16x128xf32>
    %c0_3 = arith.constant 0 : index
    %c0_4 = arith.constant 0 : index
    %c0_5 = arith.constant 0 : index
    %3 = vector.load %arg10[%c0_3, %c0_4, %c0_5] : memref<18x16x128xf32, #tpu.memory_space<vmem>>, vector<18x16x128xf32>
    tpu.vector_store %arg10[%c0_3, %c0_4, %c0_5], %2 {strides = array<i32>} : memref<18x16x128xf32, #tpu.memory_space<vmem>>, vector<18x16x128xf32>,
    %cst_6 = arith.constant 0.000000e+00 : f32
    %4 = vector.broadcast %cst_6 : f32 to vector<9x9x128xf32>
    %c0_7 = arith.constant 0 : index
    %c0_8 = arith.constant 0 : index
    %c0_9 = arith.constant 0 : index
    %5 = vector.load %arg12[%c0_7, %c0_8, %c0_9] : memref<9x9x128xf32, #tpu.memory_space<vmem>>, vector<9x9x128xf32>
    tpu.vector_store %arg12[%c0_7, %c0_8, %c0_9], %4 {strides = array<i32>} : memref<9x9x128xf32, #tpu.memory_space<vmem>>, vector<9x9x128xf32>,
    %c0_i32 = arith.constant 0 : i32
    %c20_i32 = arith.constant 20 : i32
    %6 = arith.addi %c0_i32, %c20_i32 : i32
    %c1_i32 = arith.constant 1 : i32
    scf.for %arg13 = %c0_i32 to %6 step %c1_i32  : i32 {
      %cst_24 = arith.constant 0.000000e+00 : f32
      %11 = vector.broadcast %cst_24 : f32 to vector<20x128xf32>
      %c0_i32_25 = arith.constant 0 : i32
      %12 = arith.addi %arg13, %c0_i32_25 : i32
      %13 = arith.index_cast %12 : i32 to index
      %c0_26 = arith.constant 0 : index
      %c0_27 = arith.constant 0 : index
      %14 = vector.load %arg0[%13, %c0_26, %c0_27] : memref<22x22x8xf32, #tpu.memory_space<vmem>>, vector<1x22x8xf32>
      %15 = vector.shape_cast %14 : vector<1x22x8xf32> to vector<22x8xf32>
      %16 = vector.extract_strided_slice %15 {offsets = [0, 0], sizes = [20, 8], strides = [1, 1]} : vector<22x8xf32> to vector<20x8xf32>
      %c0_28 = arith.constant 0 : index
      %c0_29 = arith.constant 0 : index
      %17 = vector.load %arg1[%c0_28, %c0_29] : memref<72x128xf32, #tpu.memory_space<vmem>>, vector<8x128xf32>
      %cst_30 = arith.constant dense<0.000000e+00> : vector<20x128xf32>
      %18 = tpu.matmul %16, %17, %cst_30 {dimension_numbers = #tpu.dot_dimension_numbers<[1], [0], [0], [1], [0, 0, 1, 1], [], []>} : vector<20x8xf32>, vector<8x128xf32>, vector<20x128xf32> -> vector<20x128xf32>
      %19 = arith.addf %11, %18 : vector<20x128xf32>
      %20 = vector.extract_strided_slice %15 {offsets = [1, 0], sizes = [20, 8], strides = [1, 1]} : vector<22x8xf32> to vector<20x8xf32>
      %c8 = arith.constant 8 : index
      %c0_31 = arith.constant 0 : index
      %21 = vector.load %arg1[%c8, %c0_31] : memref<72x128xf32, #tpu.memory_space<vmem>>, vector<8x128xf32>
      %cst_32 = arith.constant dense<0.000000e+00> : vector<20x128xf32>
      %22 = tpu.matmul %20, %21, %cst_32 {dimension_numbers = #tpu.dot_dimension_numbers<[1], [0], [0], [1], [0, 0, 1, 1], [], []>} : vector<20x8xf32>, vector<8x128xf32>, vector<20x128xf32> -> vector<20x128xf32>
      %23 = arith.addf %19, %22 : vector<20x128xf32>
      %24 = vector.extract_strided_slice %15 {offsets = [2, 0], sizes = [20, 8], strides = [1, 1]} : vector<22x8xf32> to vector<20x8xf32>
      %c16 = arith.constant 16 : index
      %c0_33 = arith.constant 0 : index
      %25 = vector.load %arg1[%c16, %c0_33] : memref<72x128xf32, #tpu.memory_space<vmem>>, vector<8x128xf32>
      %cst_34 = arith.constant dense<0.000000e+00> : vector<20x128xf32>
      %26 = tpu.matmul %24, %25, %cst_34 {dimension_numbers = #tpu.dot_dimension_numbers<[1], [0], [0], [1], [0, 0, 1, 1], [], []>} : vector<20x8xf32>, vector<8x128xf32>, vector<20x128xf32> -> vector<20x128xf32>
      %27 = arith.addf %23, %26 : vector<20x128xf32>
      %c1_i32_35 = arith.constant 1 : i32
      %28 = arith.addi %arg13, %c1_i32_35 : i32
      %29 = arith.index_cast %28 : i32 to index
      %c0_36 = arith.constant 0 : index
      %c0_37 = arith.constant 0 : index
      %30 = vector.load %arg0[%29, %c0_36, %c0_37] : memref<22x22x8xf32, #tpu.memory_space<vmem>>, vector<1x22x8xf32>
      %31 = vector.shape_cast %30 : vector<1x22x8xf32> to vector<22x8xf32>
      %32 = vector.extract_strided_slice %31 {offsets = [0, 0], sizes = [20, 8], strides = [1, 1]} : vector<22x8xf32> to vector<20x8xf32>
      %c24 = arith.constant 24 : index
      %c0_38 = arith.constant 0 : index
      %33 = vector.load %arg1[%c24, %c0_38] : memref<72x128xf32, #tpu.memory_space<vmem>>, vector<8x128xf32>
      %cst_39 = arith.constant dense<0.000000e+00> : vector<20x128xf32>
      %34 = tpu.matmul %32, %33, %cst_39 {dimension_numbers = #tpu.dot_dimension_numbers<[1], [0], [0], [1], [0, 0, 1, 1], [], []>} : vector<20x8xf32>, vector<8x128xf32>, vector<20x128xf32> -> vector<20x128xf32>
      %35 = arith.addf %27, %34 : vector<20x128xf32>
      %36 = vector.extract_strided_slice %31 {offsets = [1, 0], sizes = [20, 8], strides = [1, 1]} : vector<22x8xf32> to vector<20x8xf32>
      %c32 = arith.constant 32 : index
      %c0_40 = arith.constant 0 : index
      %37 = vector.load %arg1[%c32, %c0_40] : memref<72x128xf32, #tpu.memory_space<vmem>>, vector<8x128xf32>
      %cst_41 = arith.constant dense<0.000000e+00> : vector<20x128xf32>
      %38 = tpu.matmul %36, %37, %cst_41 {dimension_numbers = #tpu.dot_dimension_numbers<[1], [0], [0], [1], [0, 0, 1, 1], [], []>} : vector<20x8xf32>, vector<8x128xf32>, vector<20x128xf32> -> vector<20x128xf32>
      %39 = arith.addf %35, %38 : vector<20x128xf32>
      %40 = vector.extract_strided_slice %31 {offsets = [2, 0], sizes = [20, 8], strides = [1, 1]} : vector<22x8xf32> to vector<20x8xf32>
      %c40 = arith.constant 40 : index
      %c0_42 = arith.constant 0 : index
      %41 = vector.load %arg1[%c40, %c0_42] : memref<72x128xf32, #tpu.memory_space<vmem>>, vector<8x128xf32>
      %cst_43 = arith.constant dense<0.000000e+00> : vector<20x128xf32>
      %42 = tpu.matmul %40, %41, %cst_43 {dimension_numbers = #tpu.dot_dimension_numbers<[1], [0], [0], [1], [0, 0, 1, 1], [], []>} : vector<20x8xf32>, vector<8x128xf32>, vector<20x128xf32> -> vector<20x128xf32>
      %43 = arith.addf %39, %42 : vector<20x128xf32>
      %c2_i32 = arith.constant 2 : i32
      %44 = arith.addi %arg13, %c2_i32 : i32
      %45 = arith.index_cast %44 : i32 to index
      %c0_44 = arith.constant 0 : index
      %c0_45 = arith.constant 0 : index
      %46 = vector.load %arg0[%45, %c0_44, %c0_45] : memref<22x22x8xf32, #tpu.memory_space<vmem>>, vector<1x22x8xf32>
      %47 = vector.shape_cast %46 : vector<1x22x8xf32> to vector<22x8xf32>
      %48 = vector.extract_strided_slice %47 {offsets = [0, 0], sizes = [20, 8], strides = [1, 1]} : vector<22x8xf32> to vector<20x8xf32>
      %c48 = arith.constant 48 : index
      %c0_46 = arith.constant 0 : index
      %49 = vector.load %arg1[%c48, %c0_46] : memref<72x128xf32, #tpu.memory_space<vmem>>, vector<8x128xf32>
      %cst_47 = arith.constant dense<0.000000e+00> : vector<20x128xf32>
      %50 = tpu.matmul %48, %49, %cst_47 {dimension_numbers = #tpu.dot_dimension_numbers<[1], [0], [0], [1], [0, 0, 1, 1], [], []>} : vector<20x8xf32>, vector<8x128xf32>, vector<20x128xf32> -> vector<20x128xf32>
      %51 = arith.addf %43, %50 : vector<20x128xf32>
      %52 = vector.extract_strided_slice %47 {offsets = [1, 0], sizes = [20, 8], strides = [1, 1]} : vector<22x8xf32> to vector<20x8xf32>
      %c56 = arith.constant 56 : index
      %c0_48 = arith.constant 0 : index
      %53 = vector.load %arg1[%c56, %c0_48] : memref<72x128xf32, #tpu.memory_space<vmem>>, vector<8x128xf32>
      %cst_49 = arith.constant dense<0.000000e+00> : vector<20x128xf32>
      %54 = tpu.matmul %52, %53, %cst_49 {dimension_numbers = #tpu.dot_dimension_numbers<[1], [0], [0], [1], [0, 0, 1, 1], [], []>} : vector<20x8xf32>, vector<8x128xf32>, vector<20x128xf32> -> vector<20x128xf32>
      %55 = arith.addf %51, %54 : vector<20x128xf32>
      %56 = vector.extract_strided_slice %47 {offsets = [2, 0], sizes = [20, 8], strides = [1, 1]} : vector<22x8xf32> to vector<20x8xf32>
      %c64 = arith.constant 64 : index
      %c0_50 = arith.constant 0 : index
      %57 = vector.load %arg1[%c64, %c0_50] : memref<72x128xf32, #tpu.memory_space<vmem>>, vector<8x128xf32>
      %cst_51 = arith.constant dense<0.000000e+00> : vector<20x128xf32>
      %58 = tpu.matmul %56, %57, %cst_51 {dimension_numbers = #tpu.dot_dimension_numbers<[1], [0], [0], [1], [0, 0, 1, 1], [], []>} : vector<20x8xf32>, vector<8x128xf32>, vector<20x128xf32> -> vector<20x128xf32>
      %59 = arith.addf %55, %58 : vector<20x128xf32>
      %c0_52 = arith.constant 0 : index
      %c0_53 = arith.constant 0 : index
      %60 = vector.load %arg2[%c0_52, %c0_53] : memref<1x128xf32, #tpu.memory_space<vmem>>, vector<1x128xf32>
      %61 = vector.broadcast %60 : vector<1x128xf32> to vector<20x128xf32>
      %62 = arith.addf %59, %61 : vector<20x128xf32>
      %cst_54 = arith.constant 0.000000e+00 : f32
      %63 = vector.broadcast %cst_54 : f32 to vector<1x128xf32>
      %cst_55 = arith.constant 0.000000e+00 : f32
      %64 = vector.broadcast %cst_55 : f32 to vector<1x128xf32>
      %65 = tpu.concatenate %63, %62, %64 in 0 : vector<1x128xf32>, vector<20x128xf32>, vector<1x128xf32> -> vector<22x128xf32>
      %c3_i32 = arith.constant 3 : i32
      %66 = arith.addi %c3_i32, %arg13 : i32
      %67 = arith.index_cast %66 : i32 to index
      %c0_56 = arith.constant 0 : index
      %c0_57 = arith.constant 0 : index
      %68 = vector.load %arg9[%67, %c0_56, %c0_57] : memref<26x22x128xf32, #tpu.memory_space<vmem>>, vector<1x22x128xf32>
      %69 = vector.shape_cast %68 : vector<1x22x128xf32> to vector<22x128xf32>
      %70 = vector.shape_cast %65 : vector<22x128xf32> to vector<1x22x128xf32>
      tpu.vector_store %arg9[%67, %c0_56, %c0_57], %70 {strides = array<i32>} : memref<26x22x128xf32, #tpu.memory_space<vmem>>, vector<1x22x128xf32>,
    }
    %c20_i32_10 = arith.constant 20 : i32
    %c0_i32_11 = arith.constant 0 : i32
    %c12_i32 = arith.constant 12 : i32
    %7 = arith.addi %c0_i32_11, %c12_i32 : i32
    %c1_i32_12 = arith.constant 1 : i32
    scf.for %arg13 = %c0_i32_11 to %7 step %c1_i32_12  : i32 {
      %c2_i32 = arith.constant 2 : i32
      %11 = arith.muli %c2_i32, %arg13 : i32
      %12 = arith.index_cast %11 : i32 to index
      %c0_24 = arith.constant 0 : index
      %c0_25 = arith.constant 0 : index
      %13 = vector.load %arg9[%12, %c0_24, %c0_25] : memref<26x22x128xf32, #tpu.memory_space<vmem>>, vector<1x22x128xf32>
      %14 = vector.shape_cast %13 : vector<1x22x128xf32> to vector<22x128xf32>
      %c2_i32_26 = arith.constant 2 : i32
      %15 = arith.muli %c2_i32_26, %arg13 : i32
      %c1_i32_27 = arith.constant 1 : i32
      %16 = arith.addi %15, %c1_i32_27 : i32
      %17 = arith.index_cast %16 : i32 to index
      %c0_28 = arith.constant 0 : index
      %c0_29 = arith.constant 0 : index
      %18 = vector.load %arg9[%17, %c0_28, %c0_29] : memref<26x22x128xf32, #tpu.memory_space<vmem>>, vector<1x22x128xf32>
      %19 = vector.shape_cast %18 : vector<1x22x128xf32> to vector<22x128xf32>
      %20 = arith.addf %14, %19 : vector<22x128xf32>
      %c2_i32_30 = arith.constant 2 : i32
      %21 = arith.muli %c2_i32_30, %arg13 : i32
      %c2_i32_31 = arith.constant 2 : i32
      %22 = arith.addi %21, %c2_i32_31 : i32
      %23 = arith.index_cast %22 : i32 to index
      %c0_32 = arith.constant 0 : index
      %c0_33 = arith.constant 0 : index
      %24 = vector.load %arg9[%23, %c0_32, %c0_33] : memref<26x22x128xf32, #tpu.memory_space<vmem>>, vector<1x22x128xf32>
      %25 = vector.shape_cast %24 : vector<1x22x128xf32> to vector<22x128xf32>
      %26 = arith.addf %20, %25 : vector<22x128xf32>
      %c0_34 = arith.constant 0 : index
      %c0_35 = arith.constant 0 : index
      %27 = vector.load %arg3[%c0_34, %c0_35] : memref<10x22xf32, #tpu.memory_space<vmem>>, vector<10x22xf32>
      %cst_36 = arith.constant dense<0.000000e+00> : vector<10x128xf32>
      %28 = tpu.matmul %27, %26, %cst_36 {dimension_numbers = #tpu.dot_dimension_numbers<[1], [0], [0], [1], [0, 0, 1, 1], [], []>} : vector<10x22xf32>, vector<22x128xf32>, vector<10x128xf32> -> vector<10x128xf32>
      %cst_37 = arith.constant 0.000000e+00 : f32
      %29 = vector.broadcast %cst_37 : f32 to vector<10x128xf32>
      %30 = arith.maximumf %28, %29 : vector<10x128xf32>
      %cst_38 = arith.constant 0.000000e+00 : f32
      %31 = vector.broadcast %cst_38 : f32 to vector<3x128xf32>
      %cst_39 = arith.constant 0.000000e+00 : f32
      %32 = vector.broadcast %cst_39 : f32 to vector<3x128xf32>
      %33 = tpu.concatenate %31, %30, %32 in 0 : vector<3x128xf32>, vector<10x128xf32>, vector<3x128xf32> -> vector<16x128xf32>
      %c3_i32 = arith.constant 3 : i32
      %34 = arith.addi %c3_i32, %arg13 : i32
      %35 = arith.index_cast %34 : i32 to index
      %c0_40 = arith.constant 0 : index
      %c0_41 = arith.constant 0 : index
      %36 = vector.load %arg10[%35, %c0_40, %c0_41] : memref<18x16x128xf32, #tpu.memory_space<vmem>>, vector<1x16x128xf32>
      %37 = vector.shape_cast %36 : vector<1x16x128xf32> to vector<16x128xf32>
      %38 = vector.shape_cast %33 : vector<16x128xf32> to vector<1x16x128xf32>
      tpu.vector_store %arg10[%35, %c0_40, %c0_41], %38 {strides = array<i32>} : memref<18x16x128xf32, #tpu.memory_space<vmem>>, vector<1x16x128xf32>,
    }
    %c12_i32_13 = arith.constant 12 : i32
    %c0_i32_14 = arith.constant 0 : i32
    %c14_i32 = arith.constant 14 : i32
    %8 = arith.addi %c0_i32_14, %c14_i32 : i32
    %c1_i32_15 = arith.constant 1 : i32
    scf.for %arg13 = %c0_i32_14 to %8 step %c1_i32_15  : i32 {
      %cst_24 = arith.constant 0.000000e+00 : f32
      %11 = vector.broadcast %cst_24 : f32 to vector<12x128xf32>
      %c0_i32_25 = arith.constant 0 : i32
      %12 = arith.addi %arg13, %c0_i32_25 : i32
      %13 = arith.index_cast %12 : i32 to index
      %c0_26 = arith.constant 0 : index
      %c0_27 = arith.constant 0 : index
      %14 = vector.load %arg10[%13, %c0_26, %c0_27] : memref<18x16x128xf32, #tpu.memory_space<vmem>>, vector<1x16x128xf32>
      %15 = vector.shape_cast %14 : vector<1x16x128xf32> to vector<16x128xf32>
      %16 = vector.extract_strided_slice %15 {offsets = [0, 0], sizes = [12, 128], strides = [1, 1]} : vector<16x128xf32> to vector<12x128xf32>
      %c0_28 = arith.constant 0 : index
      %c0_29 = arith.constant 0 : index
      %17 = vector.load %arg4[%c0_28, %c0_29] : memref<3200x128xf32, #tpu.memory_space<vmem>>, vector<128x128xf32>
      %cst_30 = arith.constant dense<0.000000e+00> : vector<12x128xf32>
      %18 = tpu.matmul %16, %17, %cst_30 {dimension_numbers = #tpu.dot_dimension_numbers<[1], [0], [0], [1], [0, 0, 1, 1], [], []>} : vector<12x128xf32>, vector<128x128xf32>, vector<12x128xf32> -> vector<12x128xf32>
      %19 = arith.addf %11, %18 : vector<12x128xf32>
      %20 = vector.extract_strided_slice %15 {offsets = [1, 0], sizes = [12, 128], strides = [1, 1]} : vector<16x128xf32> to vector<12x128xf32>
      %c128 = arith.constant 128 : index
      %c0_31 = arith.constant 0 : index
      %21 = vector.load %arg4[%c128, %c0_31] : memref<3200x128xf32, #tpu.memory_space<vmem>>, vector<128x128xf32>
      %cst_32 = arith.constant dense<0.000000e+00> : vector<12x128xf32>
      %22 = tpu.matmul %20, %21, %cst_32 {dimension_numbers = #tpu.dot_dimension_numbers<[1], [0], [0], [1], [0, 0, 1, 1], [], []>} : vector<12x128xf32>, vector<128x128xf32>, vector<12x128xf32> -> vector<12x128xf32>
      %23 = arith.addf %19, %22 : vector<12x128xf32>
      %24 = vector.extract_strided_slice %15 {offsets = [2, 0], sizes = [12, 128], strides = [1, 1]} : vector<16x128xf32> to vector<12x128xf32>
      %c256 = arith.constant 256 : index
      %c0_33 = arith.constant 0 : index
      %25 = vector.load %arg4[%c256, %c0_33] : memref<3200x128xf32, #tpu.memory_space<vmem>>, vector<128x128xf32>
      %cst_34 = arith.constant dense<0.000000e+00> : vector<12x128xf32>
      %26 = tpu.matmul %24, %25, %cst_34 {dimension_numbers = #tpu.dot_dimension_numbers<[1], [0], [0], [1], [0, 0, 1, 1], [], []>} : vector<12x128xf32>, vector<128x128xf32>, vector<12x128xf32> -> vector<12x128xf32>
      %27 = arith.addf %23, %26 : vector<12x128xf32>
      %28 = vector.extract_strided_slice %15 {offsets = [3, 0], sizes = [12, 128], strides = [1, 1]} : vector<16x128xf32> to vector<12x128xf32>
      %c384 = arith.constant 384 : index
      %c0_35 = arith.constant 0 : index
      %29 = vector.load %arg4[%c384, %c0_35] : memref<3200x128xf32, #tpu.memory_space<vmem>>, vector<128x128xf32>
      %cst_36 = arith.constant dense<0.000000e+00> : vector<12x128xf32>
      %30 = tpu.matmul %28, %29, %cst_36 {dimension_numbers = #tpu.dot_dimension_numbers<[1], [0], [0], [1], [0, 0, 1, 1], [], []>} : vector<12x128xf32>, vector<128x128xf32>, vector<12x128xf32> -> vector<12x128xf32>
      %31 = arith.addf %27, %30 : vector<12x128xf32>
      %32 = vector.extract_strided_slice %15 {offsets = [4, 0], sizes = [12, 128], strides = [1, 1]} : vector<16x128xf32> to vector<12x128xf32>
      %c512 = arith.constant 512 : index
      %c0_37 = arith.constant 0 : index
      %33 = vector.load %arg4[%c512, %c0_37] : memref<3200x128xf32, #tpu.memory_space<vmem>>, vector<128x128xf32>
      %cst_38 = arith.constant dense<0.000000e+00> : vector<12x128xf32>
      %34 = tpu.matmul %32, %33, %cst_38 {dimension_numbers = #tpu.dot_dimension_numbers<[1], [0], [0], [1], [0, 0, 1, 1], [], []>} : vector<12x128xf32>, vector<128x128xf32>, vector<12x128xf32> -> vector<12x128xf32>
      %35 = arith.addf %31, %34 : vector<12x128xf32>
      %c1_i32_39 = arith.constant 1 : i32
      %36 = arith.addi %arg13, %c1_i32_39 : i32
      %37 = arith.index_cast %36 : i32 to index
      %c0_40 = arith.constant 0 : index
      %c0_41 = arith.constant 0 : index
      %38 = vector.load %arg10[%37, %c0_40, %c0_41] : memref<18x16x128xf32, #tpu.memory_space<vmem>>, vector<1x16x128xf32>
      %39 = vector.shape_cast %38 : vector<1x16x128xf32> to vector<16x128xf32>
      %40 = vector.extract_strided_slice %39 {offsets = [0, 0], sizes = [12, 128], strides = [1, 1]} : vector<16x128xf32> to vector<12x128xf32>
      %c640 = arith.constant 640 : index
      %c0_42 = arith.constant 0 : index
      %41 = vector.load %arg4[%c640, %c0_42] : memref<3200x128xf32, #tpu.memory_space<vmem>>, vector<128x128xf32>
      %cst_43 = arith.constant dense<0.000000e+00> : vector<12x128xf32>
      %42 = tpu.matmul %40, %41, %cst_43 {dimension_numbers = #tpu.dot_dimension_numbers<[1], [0], [0], [1], [0, 0, 1, 1], [], []>} : vector<12x128xf32>, vector<128x128xf32>, vector<12x128xf32> -> vector<12x128xf32>
      %43 = arith.addf %35, %42 : vector<12x128xf32>
      %44 = vector.extract_strided_slice %39 {offsets = [1, 0], sizes = [12, 128], strides = [1, 1]} : vector<16x128xf32> to vector<12x128xf32>
      %c768 = arith.constant 768 : index
      %c0_44 = arith.constant 0 : index
      %45 = vector.load %arg4[%c768, %c0_44] : memref<3200x128xf32, #tpu.memory_space<vmem>>, vector<128x128xf32>
      %cst_45 = arith.constant dense<0.000000e+00> : vector<12x128xf32>
      %46 = tpu.matmul %44, %45, %cst_45 {dimension_numbers = #tpu.dot_dimension_numbers<[1], [0], [0], [1], [0, 0, 1, 1], [], []>} : vector<12x128xf32>, vector<128x128xf32>, vector<12x128xf32> -> vector<12x128xf32>
      %47 = arith.addf %43, %46 : vector<12x128xf32>
      %48 = vector.extract_strided_slice %39 {offsets = [2, 0], sizes = [12, 128], strides = [1, 1]} : vector<16x128xf32> to vector<12x128xf32>
      %c896 = arith.constant 896 : index
      %c0_46 = arith.constant 0 : index
      %49 = vector.load %arg4[%c896, %c0_46] : memref<3200x128xf32, #tpu.memory_space<vmem>>, vector<128x128xf32>
      %cst_47 = arith.constant dense<0.000000e+00> : vector<12x128xf32>
      %50 = tpu.matmul %48, %49, %cst_47 {dimension_numbers = #tpu.dot_dimension_numbers<[1], [0], [0], [1], [0, 0, 1, 1], [], []>} : vector<12x128xf32>, vector<128x128xf32>, vector<12x128xf32> -> vector<12x128xf32>
      %51 = arith.addf %47, %50 : vector<12x128xf32>
      %52 = vector.extract_strided_slice %39 {offsets = [3, 0], sizes = [12, 128], strides = [1, 1]} : vector<16x128xf32> to vector<12x128xf32>
      %c1024 = arith.constant 1024 : index
      %c0_48 = arith.constant 0 : index
      %53 = vector.load %arg4[%c1024, %c0_48] : memref<3200x128xf32, #tpu.memory_space<vmem>>, vector<128x128xf32>
      %cst_49 = arith.constant dense<0.000000e+00> : vector<12x128xf32>
      %54 = tpu.matmul %52, %53, %cst_49 {dimension_numbers = #tpu.dot_dimension_numbers<[1], [0], [0], [1], [0, 0, 1, 1], [], []>} : vector<12x128xf32>, vector<128x128xf32>, vector<12x128xf32> -> vector<12x128xf32>
      %55 = arith.addf %51, %54 : vector<12x128xf32>
      %56 = vector.extract_strided_slice %39 {offsets = [4, 0], sizes = [12, 128], strides = [1, 1]} : vector<16x128xf32> to vector<12x128xf32>
      %c1152 = arith.constant 1152 : index
      %c0_50 = arith.constant 0 : index
      %57 = vector.load %arg4[%c1152, %c0_50] : memref<3200x128xf32, #tpu.memory_space<vmem>>, vector<128x128xf32>
      %cst_51 = arith.constant dense<0.000000e+00> : vector<12x128xf32>
      %58 = tpu.matmul %56, %57, %cst_51 {dimension_numbers = #tpu.dot_dimension_numbers<[1], [0], [0], [1], [0, 0, 1, 1], [], []>} : vector<12x128xf32>, vector<128x128xf32>, vector<12x128xf32> -> vector<12x128xf32>
      %59 = arith.addf %55, %58 : vector<12x128xf32>
      %c2_i32 = arith.constant 2 : i32
      %60 = arith.addi %arg13, %c2_i32 : i32
      %61 = arith.index_cast %60 : i32 to index
      %c0_52 = arith.constant 0 : index
      %c0_53 = arith.constant 0 : index
      %62 = vector.load %arg10[%61, %c0_52, %c0_53] : memref<18x16x128xf32, #tpu.memory_space<vmem>>, vector<1x16x128xf32>
      %63 = vector.shape_cast %62 : vector<1x16x128xf32> to vector<16x128xf32>
      %64 = vector.extract_strided_slice %63 {offsets = [0, 0], sizes = [12, 128], strides = [1, 1]} : vector<16x128xf32> to vector<12x128xf32>
      %c1280 = arith.constant 1280 : index
      %c0_54 = arith.constant 0 : index
      %65 = vector.load %arg4[%c1280, %c0_54] : memref<3200x128xf32, #tpu.memory_space<vmem>>, vector<128x128xf32>
      %cst_55 = arith.constant dense<0.000000e+00> : vector<12x128xf32>
      %66 = tpu.matmul %64, %65, %cst_55 {dimension_numbers = #tpu.dot_dimension_numbers<[1], [0], [0], [1], [0, 0, 1, 1], [], []>} : vector<12x128xf32>, vector<128x128xf32>, vector<12x128xf32> -> vector<12x128xf32>
      %67 = arith.addf %59, %66 : vector<12x128xf32>
      %68 = vector.extract_strided_slice %63 {offsets = [1, 0], sizes = [12, 128], strides = [1, 1]} : vector<16x128xf32> to vector<12x128xf32>
      %c1408 = arith.constant 1408 : index
      %c0_56 = arith.constant 0 : index
      %69 = vector.load %arg4[%c1408, %c0_56] : memref<3200x128xf32, #tpu.memory_space<vmem>>, vector<128x128xf32>
      %cst_57 = arith.constant dense<0.000000e+00> : vector<12x128xf32>
      %70 = tpu.matmul %68, %69, %cst_57 {dimension_numbers = #tpu.dot_dimension_numbers<[1], [0], [0], [1], [0, 0, 1, 1], [], []>} : vector<12x128xf32>, vector<128x128xf32>, vector<12x128xf32> -> vector<12x128xf32>
      %71 = arith.addf %67, %70 : vector<12x128xf32>
      %72 = vector.extract_strided_slice %63 {offsets = [2, 0], sizes = [12, 128], strides = [1, 1]} : vector<16x128xf32> to vector<12x128xf32>
      %c1536 = arith.constant 1536 : index
      %c0_58 = arith.constant 0 : index
      %73 = vector.load %arg4[%c1536, %c0_58] : memref<3200x128xf32, #tpu.memory_space<vmem>>, vector<128x128xf32>
      %cst_59 = arith.constant dense<0.000000e+00> : vector<12x128xf32>
      %74 = tpu.matmul %72, %73, %cst_59 {dimension_numbers = #tpu.dot_dimension_numbers<[1], [0], [0], [1], [0, 0, 1, 1], [], []>} : vector<12x128xf32>, vector<128x128xf32>, vector<12x128xf32> -> vector<12x128xf32>
      %75 = arith.addf %71, %74 : vector<12x128xf32>
      %76 = vector.extract_strided_slice %63 {offsets = [3, 0], sizes = [12, 128], strides = [1, 1]} : vector<16x128xf32> to vector<12x128xf32>
      %c1664 = arith.constant 1664 : index
      %c0_60 = arith.constant 0 : index
      %77 = vector.load %arg4[%c1664, %c0_60] : memref<3200x128xf32, #tpu.memory_space<vmem>>, vector<128x128xf32>
      %cst_61 = arith.constant dense<0.000000e+00> : vector<12x128xf32>
      %78 = tpu.matmul %76, %77, %cst_61 {dimension_numbers = #tpu.dot_dimension_numbers<[1], [0], [0], [1], [0, 0, 1, 1], [], []>} : vector<12x128xf32>, vector<128x128xf32>, vector<12x128xf32> -> vector<12x128xf32>
      %79 = arith.addf %75, %78 : vector<12x128xf32>
      %80 = vector.extract_strided_slice %63 {offsets = [4, 0], sizes = [12, 128], strides = [1, 1]} : vector<16x128xf32> to vector<12x128xf32>
      %c1792 = arith.constant 1792 : index
      %c0_62 = arith.constant 0 : index
      %81 = vector.load %arg4[%c1792, %c0_62] : memref<3200x128xf32, #tpu.memory_space<vmem>>, vector<128x128xf32>
      %cst_63 = arith.constant dense<0.000000e+00> : vector<12x128xf32>
      %82 = tpu.matmul %80, %81, %cst_63 {dimension_numbers = #tpu.dot_dimension_numbers<[1], [0], [0], [1], [0, 0, 1, 1], [], []>} : vector<12x128xf32>, vector<128x128xf32>, vector<12x128xf32> -> vector<12x128xf32>
      %83 = arith.addf %79, %82 : vector<12x128xf32>
      %c3_i32 = arith.constant 3 : i32
      %84 = arith.addi %arg13, %c3_i32 : i32
      %85 = arith.index_cast %84 : i32 to index
      %c0_64 = arith.constant 0 : index
      %c0_65 = arith.constant 0 : index
      %86 = vector.load %arg10[%85, %c0_64, %c0_65] : memref<18x16x128xf32, #tpu.memory_space<vmem>>, vector<1x16x128xf32>
      %87 = vector.shape_cast %86 : vector<1x16x128xf32> to vector<16x128xf32>
      %88 = vector.extract_strided_slice %87 {offsets = [0, 0], sizes = [12, 128], strides = [1, 1]} : vector<16x128xf32> to vector<12x128xf32>
      %c1920 = arith.constant 1920 : index
      %c0_66 = arith.constant 0 : index
      %89 = vector.load %arg4[%c1920, %c0_66] : memref<3200x128xf32, #tpu.memory_space<vmem>>, vector<128x128xf32>
      %cst_67 = arith.constant dense<0.000000e+00> : vector<12x128xf32>
      %90 = tpu.matmul %88, %89, %cst_67 {dimension_numbers = #tpu.dot_dimension_numbers<[1], [0], [0], [1], [0, 0, 1, 1], [], []>} : vector<12x128xf32>, vector<128x128xf32>, vector<12x128xf32> -> vector<12x128xf32>
      %91 = arith.addf %83, %90 : vector<12x128xf32>
      %92 = vector.extract_strided_slice %87 {offsets = [1, 0], sizes = [12, 128], strides = [1, 1]} : vector<16x128xf32> to vector<12x128xf32>
      %c2048 = arith.constant 2048 : index
      %c0_68 = arith.constant 0 : index
      %93 = vector.load %arg4[%c2048, %c0_68] : memref<3200x128xf32, #tpu.memory_space<vmem>>, vector<128x128xf32>
      %cst_69 = arith.constant dense<0.000000e+00> : vector<12x128xf32>
      %94 = tpu.matmul %92, %93, %cst_69 {dimension_numbers = #tpu.dot_dimension_numbers<[1], [0], [0], [1], [0, 0, 1, 1], [], []>} : vector<12x128xf32>, vector<128x128xf32>, vector<12x128xf32> -> vector<12x128xf32>
      %95 = arith.addf %91, %94 : vector<12x128xf32>
      %96 = vector.extract_strided_slice %87 {offsets = [2, 0], sizes = [12, 128], strides = [1, 1]} : vector<16x128xf32> to vector<12x128xf32>
      %c2176 = arith.constant 2176 : index
      %c0_70 = arith.constant 0 : index
      %97 = vector.load %arg4[%c2176, %c0_70] : memref<3200x128xf32, #tpu.memory_space<vmem>>, vector<128x128xf32>
      %cst_71 = arith.constant dense<0.000000e+00> : vector<12x128xf32>
      %98 = tpu.matmul %96, %97, %cst_71 {dimension_numbers = #tpu.dot_dimension_numbers<[1], [0], [0], [1], [0, 0, 1, 1], [], []>} : vector<12x128xf32>, vector<128x128xf32>, vector<12x128xf32> -> vector<12x128xf32>
      %99 = arith.addf %95, %98 : vector<12x128xf32>
      %100 = vector.extract_strided_slice %87 {offsets = [3, 0], sizes = [12, 128], strides = [1, 1]} : vector<16x128xf32> to vector<12x128xf32>
      %c2304 = arith.constant 2304 : index
      %c0_72 = arith.constant 0 : index
      %101 = vector.load %arg4[%c2304, %c0_72] : memref<3200x128xf32, #tpu.memory_space<vmem>>, vector<128x128xf32>
      %cst_73 = arith.constant dense<0.000000e+00> : vector<12x128xf32>
      %102 = tpu.matmul %100, %101, %cst_73 {dimension_numbers = #tpu.dot_dimension_numbers<[1], [0], [0], [1], [0, 0, 1, 1], [], []>} : vector<12x128xf32>, vector<128x128xf32>, vector<12x128xf32> -> vector<12x128xf32>
      %103 = arith.addf %99, %102 : vector<12x128xf32>
      %104 = vector.extract_strided_slice %87 {offsets = [4, 0], sizes = [12, 128], strides = [1, 1]} : vector<16x128xf32> to vector<12x128xf32>
      %c2432 = arith.constant 2432 : index
      %c0_74 = arith.constant 0 : index
      %105 = vector.load %arg4[%c2432, %c0_74] : memref<3200x128xf32, #tpu.memory_space<vmem>>, vector<128x128xf32>
      %cst_75 = arith.constant dense<0.000000e+00> : vector<12x128xf32>
      %106 = tpu.matmul %104, %105, %cst_75 {dimension_numbers = #tpu.dot_dimension_numbers<[1], [0], [0], [1], [0, 0, 1, 1], [], []>} : vector<12x128xf32>, vector<128x128xf32>, vector<12x128xf32> -> vector<12x128xf32>
      %107 = arith.addf %103, %106 : vector<12x128xf32>
      %c4_i32 = arith.constant 4 : i32
      %108 = arith.addi %arg13, %c4_i32 : i32
      %109 = arith.index_cast %108 : i32 to index
      %c0_76 = arith.constant 0 : index
      %c0_77 = arith.constant 0 : index
      %110 = vector.load %arg10[%109, %c0_76, %c0_77] : memref<18x16x128xf32, #tpu.memory_space<vmem>>, vector<1x16x128xf32>
      %111 = vector.shape_cast %110 : vector<1x16x128xf32> to vector<16x128xf32>
      %112 = vector.extract_strided_slice %111 {offsets = [0, 0], sizes = [12, 128], strides = [1, 1]} : vector<16x128xf32> to vector<12x128xf32>
      %c2560 = arith.constant 2560 : index
      %c0_78 = arith.constant 0 : index
      %113 = vector.load %arg4[%c2560, %c0_78] : memref<3200x128xf32, #tpu.memory_space<vmem>>, vector<128x128xf32>
      %cst_79 = arith.constant dense<0.000000e+00> : vector<12x128xf32>
      %114 = tpu.matmul %112, %113, %cst_79 {dimension_numbers = #tpu.dot_dimension_numbers<[1], [0], [0], [1], [0, 0, 1, 1], [], []>} : vector<12x128xf32>, vector<128x128xf32>, vector<12x128xf32> -> vector<12x128xf32>
      %115 = arith.addf %107, %114 : vector<12x128xf32>
      %116 = vector.extract_strided_slice %111 {offsets = [1, 0], sizes = [12, 128], strides = [1, 1]} : vector<16x128xf32> to vector<12x128xf32>
      %c2688 = arith.constant 2688 : index
      %c0_80 = arith.constant 0 : index
      %117 = vector.load %arg4[%c2688, %c0_80] : memref<3200x128xf32, #tpu.memory_space<vmem>>, vector<128x128xf32>
      %cst_81 = arith.constant dense<0.000000e+00> : vector<12x128xf32>
      %118 = tpu.matmul %116, %117, %cst_81 {dimension_numbers = #tpu.dot_dimension_numbers<[1], [0], [0], [1], [0, 0, 1, 1], [], []>} : vector<12x128xf32>, vector<128x128xf32>, vector<12x128xf32> -> vector<12x128xf32>
      %119 = arith.addf %115, %118 : vector<12x128xf32>
      %120 = vector.extract_strided_slice %111 {offsets = [2, 0], sizes = [12, 128], strides = [1, 1]} : vector<16x128xf32> to vector<12x128xf32>
      %c2816 = arith.constant 2816 : index
      %c0_82 = arith.constant 0 : index
      %121 = vector.load %arg4[%c2816, %c0_82] : memref<3200x128xf32, #tpu.memory_space<vmem>>, vector<128x128xf32>
      %cst_83 = arith.constant dense<0.000000e+00> : vector<12x128xf32>
      %122 = tpu.matmul %120, %121, %cst_83 {dimension_numbers = #tpu.dot_dimension_numbers<[1], [0], [0], [1], [0, 0, 1, 1], [], []>} : vector<12x128xf32>, vector<128x128xf32>, vector<12x128xf32> -> vector<12x128xf32>
      %123 = arith.addf %119, %122 : vector<12x128xf32>
      %124 = vector.extract_strided_slice %111 {offsets = [3, 0], sizes = [12, 128], strides = [1, 1]} : vector<16x128xf32> to vector<12x128xf32>
      %c2944 = arith.constant 2944 : index
      %c0_84 = arith.constant 0 : index
      %125 = vector.load %arg4[%c2944, %c0_84] : memref<3200x128xf32, #tpu.memory_space<vmem>>, vector<128x128xf32>
      %cst_85 = arith.constant dense<0.000000e+00> : vector<12x128xf32>
      %126 = tpu.matmul %124, %125, %cst_85 {dimension_numbers = #tpu.dot_dimension_numbers<[1], [0], [0], [1], [0, 0, 1, 1], [], []>} : vector<12x128xf32>, vector<128x128xf32>, vector<12x128xf32> -> vector<12x128xf32>
      %127 = arith.addf %123, %126 : vector<12x128xf32>
      %128 = vector.extract_strided_slice %111 {offsets = [4, 0], sizes = [12, 128], strides = [1, 1]} : vector<16x128xf32> to vector<12x128xf32>
      %c3072 = arith.constant 3072 : index
      %c0_86 = arith.constant 0 : index
      %129 = vector.load %arg4[%c3072, %c0_86] : memref<3200x128xf32, #tpu.memory_space<vmem>>, vector<128x128xf32>
      %cst_87 = arith.constant dense<0.000000e+00> : vector<12x128xf32>
      %130 = tpu.matmul %128, %129, %cst_87 {dimension_numbers = #tpu.dot_dimension_numbers<[1], [0], [0], [1], [0, 0, 1, 1], [], []>} : vector<12x128xf32>, vector<128x128xf32>, vector<12x128xf32> -> vector<12x128xf32>
      %131 = arith.addf %127, %130 : vector<12x128xf32>
      %c0_88 = arith.constant 0 : index
      %c0_89 = arith.constant 0 : index
      %132 = vector.load %arg5[%c0_88, %c0_89] : memref<1x128xf32, #tpu.memory_space<vmem>>, vector<1x128xf32>
      %133 = vector.broadcast %132 : vector<1x128xf32> to vector<12x128xf32>
      %134 = arith.addf %131, %133 : vector<12x128xf32>
      %135 = arith.index_cast %arg13 : i32 to index
      %c0_90 = arith.constant 0 : index
      %c0_91 = arith.constant 0 : index
      %136 = vector.load %arg11[%135, %c0_90, %c0_91] : memref<14x12x128xf32, #tpu.memory_space<vmem>>, vector<1x12x128xf32>
      %137 = vector.shape_cast %136 : vector<1x12x128xf32> to vector<12x128xf32>
      %138 = vector.shape_cast %134 : vector<12x128xf32> to vector<1x12x128xf32>
      tpu.vector_store %arg11[%135, %c0_90, %c0_91], %138 {strides = array<i32>} : memref<14x12x128xf32, #tpu.memory_space<vmem>>, vector<1x12x128xf32>,
    }
    %c14_i32_16 = arith.constant 14 : i32
    %c0_i32_17 = arith.constant 0 : i32
    %c7_i32 = arith.constant 7 : i32
    %9 = arith.addi %c0_i32_17, %c7_i32 : i32
    %c1_i32_18 = arith.constant 1 : i32
    scf.for %arg13 = %c0_i32_17 to %9 step %c1_i32_18  : i32 {
      %c2_i32 = arith.constant 2 : i32
      %11 = arith.muli %c2_i32, %arg13 : i32
      %12 = arith.index_cast %11 : i32 to index
      %c0_24 = arith.constant 0 : index
      %c0_25 = arith.constant 0 : index
      %13 = vector.load %arg11[%12, %c0_24, %c0_25] : memref<14x12x128xf32, #tpu.memory_space<vmem>>, vector<1x12x128xf32>
      %14 = vector.shape_cast %13 : vector<1x12x128xf32> to vector<12x128xf32>
      %c2_i32_26 = arith.constant 2 : i32
      %15 = arith.muli %c2_i32_26, %arg13 : i32
      %c1_i32_27 = arith.constant 1 : i32
      %16 = arith.addi %15, %c1_i32_27 : i32
      %17 = arith.index_cast %16 : i32 to index
      %c0_28 = arith.constant 0 : index
      %c0_29 = arith.constant 0 : index
      %18 = vector.load %arg11[%17, %c0_28, %c0_29] : memref<14x12x128xf32, #tpu.memory_space<vmem>>, vector<1x12x128xf32>
      %19 = vector.shape_cast %18 : vector<1x12x128xf32> to vector<12x128xf32>
      %20 = arith.maximumf %14, %19 : vector<12x128xf32>
      %21 = vector.extract_strided_slice %20 {offsets = [0, 0], sizes = [2, 128], strides = [1, 1]} : vector<12x128xf32> to vector<2x128xf32>
      %cst_30 = arith.constant dense<0xFF800000> : vector<128xf32>
      %22 = vector.multi_reduction <maximumf>, %21, %cst_30 [0] : vector<2x128xf32> to vector<128xf32>
      %23 = vector.shape_cast %22 : vector<128xf32> to vector<1x128xf32>
      %24 = vector.extract_strided_slice %20 {offsets = [1, 0], sizes = [3, 128], strides = [1, 1]} : vector<12x128xf32> to vector<3x128xf32>
      %cst_31 = arith.constant dense<0xFF800000> : vector<128xf32>
      %25 = vector.multi_reduction <maximumf>, %24, %cst_31 [0] : vector<3x128xf32> to vector<128xf32>
      %26 = vector.shape_cast %25 : vector<128xf32> to vector<1x128xf32>
      %27 = vector.extract_strided_slice %20 {offsets = [3, 0], sizes = [3, 128], strides = [1, 1]} : vector<12x128xf32> to vector<3x128xf32>
      %cst_32 = arith.constant dense<0xFF800000> : vector<128xf32>
      %28 = vector.multi_reduction <maximumf>, %27, %cst_32 [0] : vector<3x128xf32> to vector<128xf32>
      %29 = vector.shape_cast %28 : vector<128xf32> to vector<1x128xf32>
      %30 = vector.extract_strided_slice %20 {offsets = [5, 0], sizes = [2, 128], strides = [1, 1]} : vector<12x128xf32> to vector<2x128xf32>
      %cst_33 = arith.constant dense<0xFF800000> : vector<128xf32>
      %31 = vector.multi_reduction <maximumf>, %30, %cst_33 [0] : vector<2x128xf32> to vector<128xf32>
      %32 = vector.shape_cast %31 : vector<128xf32> to vector<1x128xf32>
      %33 = vector.extract_strided_slice %20 {offsets = [6, 0], sizes = [3, 128], strides = [1, 1]} : vector<12x128xf32> to vector<3x128xf32>
      %cst_34 = arith.constant dense<0xFF800000> : vector<128xf32>
      %34 = vector.multi_reduction <maximumf>, %33, %cst_34 [0] : vector<3x128xf32> to vector<128xf32>
      %35 = vector.shape_cast %34 : vector<128xf32> to vector<1x128xf32>
      %36 = vector.extract_strided_slice %20 {offsets = [8, 0], sizes = [3, 128], strides = [1, 1]} : vector<12x128xf32> to vector<3x128xf32>
      %cst_35 = arith.constant dense<0xFF800000> : vector<128xf32>
      %37 = vector.multi_reduction <maximumf>, %36, %cst_35 [0] : vector<3x128xf32> to vector<128xf32>
      %38 = vector.shape_cast %37 : vector<128xf32> to vector<1x128xf32>
      %39 = vector.extract_strided_slice %20 {offsets = [10, 0], sizes = [2, 128], strides = [1, 1]} : vector<12x128xf32> to vector<2x128xf32>
      %cst_36 = arith.constant dense<0xFF800000> : vector<128xf32>
      %40 = vector.multi_reduction <maximumf>, %39, %cst_36 [0] : vector<2x128xf32> to vector<128xf32>
      %41 = vector.shape_cast %40 : vector<128xf32> to vector<1x128xf32>
      %42 = tpu.concatenate %23, %26, %29, %32, %35, %38, %41 in 0 : vector<1x128xf32>, vector<1x128xf32>, vector<1x128xf32>, vector<1x128xf32>, vector<1x128xf32>, vector<1x128xf32>, vector<1x128xf32> -> vector<7x128xf32>
      %43 = arith.negf %42 : vector<7x128xf32>
      %44 = math.exp %43 : vector<7x128xf32>
      %cst_37 = arith.constant 1.000000e+00 : f32
      %45 = vector.broadcast %cst_37 : f32 to vector<7x128xf32>
      %46 = arith.addf %45, %44 : vector<7x128xf32>
      %47 = arith.divf %45, %46 : vector<7x128xf32>
      %cst_38 = arith.constant 0.000000e+00 : f32
      %48 = vector.broadcast %cst_38 : f32 to vector<1x128xf32>
      %cst_39 = arith.constant 0.000000e+00 : f32
      %49 = vector.broadcast %cst_39 : f32 to vector<1x128xf32>
      %50 = tpu.concatenate %48, %47, %49 in 0 : vector<1x128xf32>, vector<7x128xf32>, vector<1x128xf32> -> vector<9x128xf32>
      %c1_i32_40 = arith.constant 1 : i32
      %51 = arith.addi %arg13, %c1_i32_40 : i32
      %52 = arith.index_cast %51 : i32 to index
      %c0_41 = arith.constant 0 : index
      %c0_42 = arith.constant 0 : index
      %53 = vector.load %arg12[%52, %c0_41, %c0_42] : memref<9x9x128xf32, #tpu.memory_space<vmem>>, vector<1x9x128xf32>
      %54 = vector.shape_cast %53 : vector<1x9x128xf32> to vector<9x128xf32>
      %55 = vector.shape_cast %50 : vector<9x128xf32> to vector<1x9x128xf32>
      tpu.vector_store %arg12[%52, %c0_41, %c0_42], %55 {strides = array<i32>} : memref<9x9x128xf32, #tpu.memory_space<vmem>>, vector<1x9x128xf32>,
    }
    %c7_i32_19 = arith.constant 7 : i32
    %c0_i32_20 = arith.constant 0 : i32
    %c7_i32_21 = arith.constant 7 : i32
    %10 = arith.addi %c0_i32_20, %c7_i32_21 : i32
    %c1_i32_22 = arith.constant 1 : i32
    scf.for %arg13 = %c0_i32_20 to %10 step %c1_i32_22  : i32 {
      %cst_24 = arith.constant 0.000000e+00 : f32
      %11 = vector.broadcast %cst_24 : f32 to vector<7x128xf32>
      %c0_i32_25 = arith.constant 0 : i32
      %12 = arith.addi %arg13, %c0_i32_25 : i32
      %13 = arith.index_cast %12 : i32 to index
      %c0_26 = arith.constant 0 : index
      %c0_27 = arith.constant 0 : index
      %14 = vector.load %arg12[%13, %c0_26, %c0_27] : memref<9x9x128xf32, #tpu.memory_space<vmem>>, vector<1x9x128xf32>
      %15 = vector.shape_cast %14 : vector<1x9x128xf32> to vector<9x128xf32>
      %16 = vector.extract_strided_slice %15 {offsets = [0, 0], sizes = [7, 128], strides = [1, 1]} : vector<9x128xf32> to vector<7x128xf32>
      %c0_28 = arith.constant 0 : index
      %c0_29 = arith.constant 0 : index
      %17 = vector.load %arg6[%c0_28, %c0_29] : memref<1152x128xf32, #tpu.memory_space<vmem>>, vector<128x128xf32>
      %cst_30 = arith.constant dense<0.000000e+00> : vector<7x128xf32>
      %18 = tpu.matmul %16, %17, %cst_30 {dimension_numbers = #tpu.dot_dimension_numbers<[1], [0], [0], [1], [0, 0, 1, 1], [], []>} : vector<7x128xf32>, vector<128x128xf32>, vector<7x128xf32> -> vector<7x128xf32>
      %19 = arith.addf %11, %18 : vector<7x128xf32>
      %20 = vector.extract_strided_slice %15 {offsets = [1, 0], sizes = [7, 128], strides = [1, 1]} : vector<9x128xf32> to vector<7x128xf32>
      %c128 = arith.constant 128 : index
      %c0_31 = arith.constant 0 : index
      %21 = vector.load %arg6[%c128, %c0_31] : memref<1152x128xf32, #tpu.memory_space<vmem>>, vector<128x128xf32>
      %cst_32 = arith.constant dense<0.000000e+00> : vector<7x128xf32>
      %22 = tpu.matmul %20, %21, %cst_32 {dimension_numbers = #tpu.dot_dimension_numbers<[1], [0], [0], [1], [0, 0, 1, 1], [], []>} : vector<7x128xf32>, vector<128x128xf32>, vector<7x128xf32> -> vector<7x128xf32>
      %23 = arith.addf %19, %22 : vector<7x128xf32>
      %24 = vector.extract_strided_slice %15 {offsets = [2, 0], sizes = [7, 128], strides = [1, 1]} : vector<9x128xf32> to vector<7x128xf32>
      %c256 = arith.constant 256 : index
      %c0_33 = arith.constant 0 : index
      %25 = vector.load %arg6[%c256, %c0_33] : memref<1152x128xf32, #tpu.memory_space<vmem>>, vector<128x128xf32>
      %cst_34 = arith.constant dense<0.000000e+00> : vector<7x128xf32>
      %26 = tpu.matmul %24, %25, %cst_34 {dimension_numbers = #tpu.dot_dimension_numbers<[1], [0], [0], [1], [0, 0, 1, 1], [], []>} : vector<7x128xf32>, vector<128x128xf32>, vector<7x128xf32> -> vector<7x128xf32>
      %27 = arith.addf %23, %26 : vector<7x128xf32>
      %c1_i32_35 = arith.constant 1 : i32
      %28 = arith.addi %arg13, %c1_i32_35 : i32
      %29 = arith.index_cast %28 : i32 to index
      %c0_36 = arith.constant 0 : index
      %c0_37 = arith.constant 0 : index
      %30 = vector.load %arg12[%29, %c0_36, %c0_37] : memref<9x9x128xf32, #tpu.memory_space<vmem>>, vector<1x9x128xf32>
      %31 = vector.shape_cast %30 : vector<1x9x128xf32> to vector<9x128xf32>
      %32 = vector.extract_strided_slice %31 {offsets = [0, 0], sizes = [7, 128], strides = [1, 1]} : vector<9x128xf32> to vector<7x128xf32>
      %c384 = arith.constant 384 : index
      %c0_38 = arith.constant 0 : index
      %33 = vector.load %arg6[%c384, %c0_38] : memref<1152x128xf32, #tpu.memory_space<vmem>>, vector<128x128xf32>
      %cst_39 = arith.constant dense<0.000000e+00> : vector<7x128xf32>
      %34 = tpu.matmul %32, %33, %cst_39 {dimension_numbers = #tpu.dot_dimension_numbers<[1], [0], [0], [1], [0, 0, 1, 1], [], []>} : vector<7x128xf32>, vector<128x128xf32>, vector<7x128xf32> -> vector<7x128xf32>
      %35 = arith.addf %27, %34 : vector<7x128xf32>
      %36 = vector.extract_strided_slice %31 {offsets = [1, 0], sizes = [7, 128], strides = [1, 1]} : vector<9x128xf32> to vector<7x128xf32>
      %c512 = arith.constant 512 : index
      %c0_40 = arith.constant 0 : index
      %37 = vector.load %arg6[%c512, %c0_40] : memref<1152x128xf32, #tpu.memory_space<vmem>>, vector<128x128xf32>
      %cst_41 = arith.constant dense<0.000000e+00> : vector<7x128xf32>
      %38 = tpu.matmul %36, %37, %cst_41 {dimension_numbers = #tpu.dot_dimension_numbers<[1], [0], [0], [1], [0, 0, 1, 1], [], []>} : vector<7x128xf32>, vector<128x128xf32>, vector<7x128xf32> -> vector<7x128xf32>
      %39 = arith.addf %35, %38 : vector<7x128xf32>
      %40 = vector.extract_strided_slice %31 {offsets = [2, 0], sizes = [7, 128], strides = [1, 1]} : vector<9x128xf32> to vector<7x128xf32>
      %c640 = arith.constant 640 : index
      %c0_42 = arith.constant 0 : index
      %41 = vector.load %arg6[%c640, %c0_42] : memref<1152x128xf32, #tpu.memory_space<vmem>>, vector<128x128xf32>
      %cst_43 = arith.constant dense<0.000000e+00> : vector<7x128xf32>
      %42 = tpu.matmul %40, %41, %cst_43 {dimension_numbers = #tpu.dot_dimension_numbers<[1], [0], [0], [1], [0, 0, 1, 1], [], []>} : vector<7x128xf32>, vector<128x128xf32>, vector<7x128xf32> -> vector<7x128xf32>
      %43 = arith.addf %39, %42 : vector<7x128xf32>
      %c2_i32 = arith.constant 2 : i32
      %44 = arith.addi %arg13, %c2_i32 : i32
      %45 = arith.index_cast %44 : i32 to index
      %c0_44 = arith.constant 0 : index
      %c0_45 = arith.constant 0 : index
      %46 = vector.load %arg12[%45, %c0_44, %c0_45] : memref<9x9x128xf32, #tpu.memory_space<vmem>>, vector<1x9x128xf32>
      %47 = vector.shape_cast %46 : vector<1x9x128xf32> to vector<9x128xf32>
      %48 = vector.extract_strided_slice %47 {offsets = [0, 0], sizes = [7, 128], strides = [1, 1]} : vector<9x128xf32> to vector<7x128xf32>
      %c768 = arith.constant 768 : index
      %c0_46 = arith.constant 0 : index
      %49 = vector.load %arg6[%c768, %c0_46] : memref<1152x128xf32, #tpu.memory_space<vmem>>, vector<128x128xf32>
      %cst_47 = arith.constant dense<0.000000e+00> : vector<7x128xf32>
      %50 = tpu.matmul %48, %49, %cst_47 {dimension_numbers = #tpu.dot_dimension_numbers<[1], [0], [0], [1], [0, 0, 1, 1], [], []>} : vector<7x128xf32>, vector<128x128xf32>, vector<7x128xf32> -> vector<7x128xf32>
      %51 = arith.addf %43, %50 : vector<7x128xf32>
      %52 = vector.extract_strided_slice %47 {offsets = [1, 0], sizes = [7, 128], strides = [1, 1]} : vector<9x128xf32> to vector<7x128xf32>
      %c896 = arith.constant 896 : index
      %c0_48 = arith.constant 0 : index
      %53 = vector.load %arg6[%c896, %c0_48] : memref<1152x128xf32, #tpu.memory_space<vmem>>, vector<128x128xf32>
      %cst_49 = arith.constant dense<0.000000e+00> : vector<7x128xf32>
      %54 = tpu.matmul %52, %53, %cst_49 {dimension_numbers = #tpu.dot_dimension_numbers<[1], [0], [0], [1], [0, 0, 1, 1], [], []>} : vector<7x128xf32>, vector<128x128xf32>, vector<7x128xf32> -> vector<7x128xf32>
      %55 = arith.addf %51, %54 : vector<7x128xf32>
      %56 = vector.extract_strided_slice %47 {offsets = [2, 0], sizes = [7, 128], strides = [1, 1]} : vector<9x128xf32> to vector<7x128xf32>
      %c1024 = arith.constant 1024 : index
      %c0_50 = arith.constant 0 : index
      %57 = vector.load %arg6[%c1024, %c0_50] : memref<1152x128xf32, #tpu.memory_space<vmem>>, vector<128x128xf32>
      %cst_51 = arith.constant dense<0.000000e+00> : vector<7x128xf32>
      %58 = tpu.matmul %56, %57, %cst_51 {dimension_numbers = #tpu.dot_dimension_numbers<[1], [0], [0], [1], [0, 0, 1, 1], [], []>} : vector<7x128xf32>, vector<128x128xf32>, vector<7x128xf32> -> vector<7x128xf32>
      %59 = arith.addf %55, %58 : vector<7x128xf32>
      %60 = arith.index_cast %arg13 : i32 to index
      %c0_52 = arith.constant 0 : index
      %c0_53 = arith.constant 0 : index
      %61 = vector.load %arg7[%60, %c0_52, %c0_53] : memref<7x7x128xf32, #tpu.memory_space<vmem>>, vector<1x7x128xf32>
      %62 = vector.shape_cast %61 : vector<1x7x128xf32> to vector<7x128xf32>
      %63 = arith.addf %59, %62 : vector<7x128xf32>
      %64 = arith.index_cast %arg13 : i32 to index
      %c0_54 = arith.constant 0 : index
      %c0_55 = arith.constant 0 : index
      %65 = vector.load %arg8[%64, %c0_54, %c0_55] : memref<7x7x128xf32, #tpu.memory_space<vmem>>, vector<1x7x128xf32>
      %66 = vector.shape_cast %65 : vector<1x7x128xf32> to vector<7x128xf32>
      %67 = vector.shape_cast %63 : vector<7x128xf32> to vector<1x7x128xf32>
      tpu.vector_store %arg8[%64, %c0_54, %c0_55], %67 {strides = array<i32>} : memref<7x7x128xf32, #tpu.memory_space<vmem>>, vector<1x7x128xf32>,
    }
    %c7_i32_23 = arith.constant 7 : i32
    return
  }
}

</mosaic_0001>

<bundles_post_ra>
// kernel: model_forward.1
= control target key start
LH: loop header
LB: loop body
LE: loop exit
PB: predicated region body
PF: predicated region fallthrough
CT: control target
= control target key end

     0   :  { %13 = vsyncpa [#allocation7], 0  ;;  %s8952_s0 = inlined_call_operand.vmem [shape: f32[22,22,8], index: 0, kind: input, shape index: {}]   ;;  %s8953_s1 = inlined_call_operand.hbm [shape: f32[72,128], index: 1, kind: input, shape index: {}]   ;;  %s8954_s2 = inlined_call_operand.hbm [shape: f32[1,128], index: 2, kind: input, shape index: {}]   ;;  %s8955_s3 = inlined_call_operand.hbm [shape: f32[10,22], index: 3, kind: input, shape index: {}]   ;;  %s8956_s4 = inlined_call_operand.hbm [shape: f32[3200,128], index: 4, kind: input, shape index: {}]   ;;  %s8957_s5 = inlined_call_operand.hbm [shape: f32[1,128], index: 5, kind: input, shape index: {}]   ;;  %s8958_s6 = inlined_call_operand.hbm [shape: f32[1152,128], index: 6, kind: input, shape index: {}]   ;;  %s8959_s7 = inlined_call_operand.hbm [shape: f32[7,7,128], index: 7, kind: input, shape index: {}]   ;;  %s8960_s8 = inlined_call_operand.vmem [shape: f32[7,7,128], index: 8, kind: output, shape index: {}]  }
   0x1   :  { %14 = vsyncpa [#allocation9], 0 }
   0x2   :  { %15 = vsyncpa [#allocation12], 0 }
   0x3   :  { %16 = vsyncpa [#allocation15], 0  ;;  %s8157_s27 = smov [#allocation8]   ;;  %s7955_s9 = scalar_lea.hbm %s8954_s2, 16 }
   0x4   :  { %s37_s28 = sshll.u32 %s8157_s27, 4  ;;  %p7956_p0 = scmp.ne.s32.totalorder %s8954_s2, %s7955_s9  ;;  %s38_s28 = int_to_ptr.vmem [resolvable:$true] %s37_s28 }
   0x5   :  { %p7959_p1 = scmp.lt.u32.totalorder %s7955_s9, %s8954_s2 }
   0x7   :  { %p7961_p2 = pnand %p7959_p1, %p7956_p0 }
   0x9   :  { %7964 = shalt.err (!%p7961_p2)
}
   0xa   :  { %s7965_s14 = scalar_lea.vmem %s38_s28, 16  ;;  %s7969_s15 = scalar_lea.vmem %s38_s28, 32 }
   0xb   :  { %p7966_p3 = scmp.ne.s32.totalorder %s38_s28, %s7965_s14  ;;  %p7970_p4 = scmp.lt.s32.totalorder %s38_s28, %s38_s28 }
   0xc   :  { %p7971_p5 = scmp.lt.s32.totalorder %s7969_s15, %s7965_s14 }
   0xe   :  { %p7972_p6 = por %p7971_p5, %p7970_p4 }
  0x10   :  { %p7973_p7 = pnand %p7972_p6, %p7966_p3 }
  0x12   :  { %7976 = shalt.err (!%p7973_p7)
}
  0x13   :  { %40 = dma.hbm_to_vmem [thread:$0]  %s8954_s2, 16, %s38_s28, [#allocation9]  }
  0x14   :  { %s8158_s18 = smov [#allocation11]   ;;  %s8159_s20 = smov [#allocation14]  }
  0x15   :  { %s58_s19 = sshll.u32 %s8158_s18, 4  ;;  %s80_s21 = sshll.u32 %s8159_s20, 4  ;;  %s59_s19 = int_to_ptr.vmem [resolvable:$true] %s58_s19  ;;  %s81_s21 = int_to_ptr.vmem [resolvable:$true] %s80_s21 }
  0x16   :  { %s7977_s24 = scalar_lea.hbm %s8956_s4, 51200 }
  0x17   :  { %p7978_p8 = scmp.ne.s32.totalorder %s8956_s4, %s7977_s24  ;;  %p7981_p9 = scmp.lt.u32.totalorder %s7977_s24, %s8956_s4 }
  0x19   :  { %p7983_p10 = pnand %p7981_p9, %p7978_p8 }
  0x1b   :  { %7986 = shalt.err (!%p7983_p10)
}
  0x1c   :  { %s7987_s2 = scalar_lea.vmem %s59_s19, 51200  ;;  %p7992_p12 = scmp.lt.s32.totalorder %s59_s19, %s59_s19 }
  0x1d   :  { %p7988_p11 = scmp.ne.s32.totalorder %s59_s19, %s7987_s2  ;;  %p7993_p13 = scmp.lt.s32.totalorder %s7987_s2, %s7987_s2 }
  0x1f   :  { %p7994_p0 = por %p7993_p13, %p7992_p12 }
  0x21   :  { %p7995_p1 = pnand %p7994_p0, %p7988_p11 }
  0x23   :  { %7998 = shalt.err (!%p7995_p1)
}
  0x24   :  { %s8160_s28 = smov 128   ;;  %s8161_s30 = smov 8  }
  0x25   :  { %64 = dma.hbm_to_vmem [thread:$0]  %s8956_s4, 51200, %s59_s19, [#allocation12], %s8160_s28, %s8160_s28, %s8161_s30  }
  0x26   :  { %s7999_s13 = scalar_lea.hbm %s8958_s6, 18432 }
  0x27   :  { %p8000_p2 = scmp.ne.s32.totalorder %s8958_s6, %s7999_s13  ;;  %p8003_p3 = scmp.lt.u32.totalorder %s7999_s13, %s8958_s6 }
  0x29   :  { %p8005_p4 = pnand %p8003_p3, %p8000_p2 }
  0x2b   :  { %8008 = shalt.err (!%p8005_p4)
}
  0x2c   :  { %s8009_s18 = scalar_lea.vmem %s81_s21, 18432  ;;  %p8014_p6 = scmp.lt.s32.totalorder %s81_s21, %s81_s21 }
  0x2d   :  { %p8010_p5 = scmp.ne.s32.totalorder %s81_s21, %s8009_s18  ;;  %p8015_p7 = scmp.lt.s32.totalorder %s8009_s18, %s8009_s18 }
  0x2f   :  { %p8016_p8 = por %p8015_p7, %p8014_p6 }
  0x31   :  { %p8017_p9 = pnand %p8016_p8, %p8010_p5 }
  0x33   :  { %8020 = shalt.err (!%p8017_p9)
}
  0x34   :  { %86 = dma.hbm_to_vmem [thread:$0]  %s8958_s6, 18432, %s81_s21, [#allocation15], %s8160_s28, %s8160_s28, %s8161_s30  }
  0x35   :  { %s8162_s20 = smov [#allocation6]   ;;  %s8163_s23 = smov [#allocation10]  }
  0x36   :  { %s24_s22 = sshll.u32 %s8162_s20, 4  ;;  %s46_s24 = sshll.u32 %s8163_s23, 4  ;;  %s25_s22 = int_to_ptr.vmem [resolvable:$true] %s24_s22  ;;  %s47_s24 = int_to_ptr.vmem [resolvable:$true] %s46_s24 }
  0x37   :  { %s8021_s27 = scalar_lea.hbm %s8953_s1, 1152 }
  0x38   :  { %p8022_p10 = scmp.ne.s32.totalorder %s8953_s1, %s8021_s27  ;;  %p8025_p11 = scmp.lt.u32.totalorder %s8021_s27, %s8953_s1 }
  0x3a   :  { %p8027_p12 = pnand %p8025_p11, %p8022_p10 }
  0x3c   :  { %8030 = shalt.err (!%p8027_p12)
}
  0x3d   :  { %s8031_s6 = scalar_lea.vmem %s25_s22, 1152  ;;  %p8036_p0 = scmp.lt.s32.totalorder %s25_s22, %s25_s22 }
  0x3e   :  { %p8032_p13 = scmp.ne.s32.totalorder %s25_s22, %s8031_s6  ;;  %p8037_p1 = scmp.lt.s32.totalorder %s8031_s6, %s8031_s6 }
  0x40   :  { %p8038_p2 = por %p8037_p1, %p8036_p0 }
  0x42   :  { %p8039_p3 = pnand %p8038_p2, %p8032_p13 }
  0x44   :  { %8042 = shalt.err (!%p8039_p3)
}
  0x45   :  { %30 = dma.hbm_to_vmem [thread:$0]  %s8953_s1, 1152, %s25_s22, [#allocation7], %s8160_s28, %s8160_s28, %s8161_s30  }
  0x46   :  { %s8043_s14 = scalar_lea.hbm %s8955_s3, 256 }
  0x47   :  { %p8044_p4 = scmp.ne.s32.totalorder %s8955_s3, %s8043_s14  ;;  %p8047_p5 = scmp.lt.u32.totalorder %s8043_s14, %s8955_s3 }
  0x49   :  { %p8049_p6 = pnand %p8047_p5, %p8044_p4 }
  0x4b   :  { %8052 = shalt.err (!%p8049_p6)
}
  0x4c   :  { %s8053_s4 = scalar_lea.vmem %s47_s24, 256  ;;  %p8058_p8 = scmp.lt.s32.totalorder %s47_s24, %s47_s24 }
  0x4d   :  { %p8054_p7 = scmp.ne.s32.totalorder %s47_s24, %s8053_s4  ;;  %p8059_p9 = scmp.lt.s32.totalorder %s8053_s4, %s8053_s4 }
  0x4f   :  { %p8060_p10 = por %p8059_p9, %p8058_p8 }
  0x51   :  { %p8061_p11 = pnand %p8060_p10, %p8054_p7 }
  0x53   :  { %8064 = shalt.err (!%p8061_p11)
}
  0x54   :  { %52 = dma.hbm_to_vmem [thread:$0]  %s8955_s3, 256, %s47_s24, [#allocation9], %s8160_s28, %s8160_s28, %s8161_s30  }
  0x55   :  { %s8164_s20 = smov [#allocation13]   ;;  %s8165_s23 = smov [#allocation16]  }
  0x56   :  { %s71_s22 = sshll.u32 %s8164_s20, 4  ;;  %s92_s25 = sshll.u32 %s8165_s23, 4  ;;  %s72_s22 = int_to_ptr.vmem [resolvable:$true] %s71_s22  ;;  %s93_s25 = int_to_ptr.vmem [resolvable:$true] %s92_s25 }
  0x57   :  { %s8065_s29 = scalar_lea.hbm %s8957_s5, 16 }
  0x58   :  { %p8066_p12 = scmp.ne.s32.totalorder %s8957_s5, %s8065_s29  ;;  %p8069_p13 = scmp.lt.u32.totalorder %s8065_s29, %s8957_s5 }
  0x5a   :  { %p8071_p0 = pnand %p8069_p13, %p8066_p12 }
  0x5c   :  { %8074 = shalt.err (!%p8071_p0)
}
  0x5d   :  { %s8075_s3 = scalar_lea.vmem %s72_s22, 16  ;;  %s8079_s24 = scalar_lea.vmem %s72_s22, 32 }
  0x5e   :  { %p8076_p1 = scmp.ne.s32.totalorder %s72_s22, %s8075_s3  ;;  %p8080_p2 = scmp.lt.s32.totalorder %s72_s22, %s72_s22 }
  0x5f   :  { %p8081_p3 = scmp.lt.s32.totalorder %s8079_s24, %s8075_s3 }
  0x61   :  { %p8082_p4 = por %p8081_p3, %p8080_p2 }
  0x63   :  { %p8083_p5 = pnand %p8082_p4, %p8076_p1 }
  0x65   :  { %8086 = shalt.err (!%p8083_p5)
}
  0x66   :  { %74 = dma.hbm_to_vmem [thread:$0]  %s8957_s5, 16, %s72_s22, [#allocation12]  }
  0x67   :  { %s8087_s14 = scalar_lea.hbm %s8959_s7, 896 }
  0x68   :  { %p8088_p6 = scmp.ne.s32.totalorder %s8959_s7, %s8087_s14  ;;  %p8091_p7 = scmp.lt.u32.totalorder %s8087_s14, %s8959_s7 }
  0x6a   :  { %p8093_p8 = pnand %p8091_p7, %p8088_p6 }
  0x6c   :  { %8096 = shalt.err (!%p8093_p8)
}
  0x6d   :  { %s8097_s4 = scalar_lea.vmem %s93_s25, 896  ;;  %p8102_p10 = scmp.lt.s32.totalorder %s93_s25, %s93_s25 }
  0x6e   :  { %p8098_p9 = scmp.ne.s32.totalorder %s93_s25, %s8097_s4  ;;  %p8103_p11 = scmp.lt.s32.totalorder %s8097_s4, %s8097_s4 }
  0x70   :  { %p8104_p12 = por %p8103_p11, %p8102_p10 }
  0x72   :  { %p8105_p13 = pnand %p8104_p12, %p8098_p9 }
  0x74   :  { %8108 = shalt.err (!%p8105_p13)
}
  0x75   :  { %98 = dma.hbm_to_vmem [thread:$0]  %s8959_s7, 896, %s93_s25, [#allocation15], %s8160_s28, %s8160_s28, %s8161_s30  }
  0x76   :  { %8129 = dma.done.wait [#allocation7], 1152  }
  0x77   :  { %8130 = vsyncadd [#allocation7], 4294966144 }
  0x78   :  { %8131 = dma.done.wait [#allocation9], 272  }
  0x79   :  { %8132 = vsyncadd [#allocation9], 4294967024 }
  0x7a   :  { %8133 = dma.done.wait [#allocation12], 51216  }
  0x7b   :  { %8134 = vsyncadd [#allocation12], 4294916080 }
  0x7c   :  { %8135 = dma.done.wait [#allocation15], 19328  }
  0x7d   :  { %8136 = vsyncadd [#allocation15], 4294947968  ;;  %v8166_v0 = vmov 0.0   ;;  %s8449_s7 = smov 0  }
  0x7e   :  { %120 = vst [vmem:[#allocation2] sm:$0xff] %v8166_v0  ;;  %121 = vst [vmem:[#allocation2 + $0x8] sm:$0xff] %v8166_v0 }
  0x7f   :  { %122 = vst [vmem:[#allocation2 + $0x10] sm:$0x3f] %v8166_v0  ;;  %123 = vst [vmem:[#allocation2 + $0x18] sm:$0xff] %v8166_v0 }
  0x80   :  { %124 = vst [vmem:[#allocation2 + $0x20] sm:$0xff] %v8166_v0  ;;  %125 = vst [vmem:[#allocation2 + $0x28] sm:$0x3f] %v8166_v0 }
  0x81   :  { %126 = vst [vmem:[#allocation2 + $0x30] sm:$0xff] %v8166_v0  ;;  %127 = vst [vmem:[#allocation2 + $0x38] sm:$0xff] %v8166_v0 }
  0x82   :  { %128 = vst [vmem:[#allocation2 + $0x40] sm:$0x3f] %v8166_v0  ;;  %129 = vst [vmem:[#allocation2 + $0x48] sm:$0xff] %v8166_v0 }
  0x83   :  { %130 = vst [vmem:[#allocation2 + $0x50] sm:$0xff] %v8166_v0  ;;  %131 = vst [vmem:[#allocation2 + $0x58] sm:$0x3f] %v8166_v0 }
  0x84   :  { %132 = vst [vmem:[#allocation2 + $0x60] sm:$0xff] %v8166_v0  ;;  %133 = vst [vmem:[#allocation2 + $0x68] sm:$0xff] %v8166_v0 }
  0x85   :  { %134 = vst [vmem:[#allocation2 + $0x70] sm:$0x3f] %v8166_v0  ;;  %135 = vst [vmem:[#allocation2 + $0x78] sm:$0xff] %v8166_v0 }
  0x86   :  { %136 = vst [vmem:[#allocation2 + $0x80] sm:$0xff] %v8166_v0  ;;  %137 = vst [vmem:[#allocation2 + $0x88] sm:$0x3f] %v8166_v0 }
  0x87   :  { %138 = vst [vmem:[#allocation2 + $0x90] sm:$0xff] %v8166_v0  ;;  %139 = vst [vmem:[#allocation2 + $0x98] sm:$0xff] %v8166_v0 }
  0x88   :  { %140 = vst [vmem:[#allocation2 + $0xa0] sm:$0x3f] %v8166_v0  ;;  %141 = vst [vmem:[#allocation2 + $0xa8] sm:$0xff] %v8166_v0 }
  0x89   :  { %142 = vst [vmem:[#allocation2 + $0xb0] sm:$0xff] %v8166_v0  ;;  %143 = vst [vmem:[#allocation2 + $0xb8] sm:$0x3f] %v8166_v0 }
  0x8a   :  { %144 = vst [vmem:[#allocation2 + $0xc0] sm:$0xff] %v8166_v0  ;;  %145 = vst [vmem:[#allocation2 + $0xc8] sm:$0xff] %v8166_v0 }
  0x8b   :  { %146 = vst [vmem:[#allocation2 + $0xd0] sm:$0x3f] %v8166_v0  ;;  %147 = vst [vmem:[#allocation2 + $0xd8] sm:$0xff] %v8166_v0 }
  0x8c   :  { %148 = vst [vmem:[#allocation2 + $0xe0] sm:$0xff] %v8166_v0  ;;  %149 = vst [vmem:[#allocation2 + $0xe8] sm:$0x3f] %v8166_v0 }
  0x8d   :  { %150 = vst [vmem:[#allocation2 + $0xf0] sm:$0xff] %v8166_v0  ;;  %151 = vst [vmem:[#allocation2 + $0xf8] sm:$0xff] %v8166_v0 }
  0x8e   :  { %152 = vst [vmem:[#allocation2 + $0x100] sm:$0x3f] %v8166_v0  ;;  %153 = vst [vmem:[#allocation2 + $0x108] sm:$0xff] %v8166_v0 }
  0x8f   :  { %154 = vst [vmem:[#allocation2 + $0x110] sm:$0xff] %v8166_v0  ;;  %155 = vst [vmem:[#allocation2 + $0x118] sm:$0x3f] %v8166_v0 }
  0x90   :  { %156 = vst [vmem:[#allocation2 + $0x120] sm:$0xff] %v8166_v0  ;;  %157 = vst [vmem:[#allocation2 + $0x128] sm:$0xff] %v8166_v0 }
  0x91   :  { %158 = vst [vmem:[#allocation2 + $0x130] sm:$0x3f] %v8166_v0  ;;  %159 = vst [vmem:[#allocation2 + $0x138] sm:$0xff] %v8166_v0 }
  0x92   :  { %160 = vst [vmem:[#allocation2 + $0x140] sm:$0xff] %v8166_v0  ;;  %161 = vst [vmem:[#allocation2 + $0x148] sm:$0x3f] %v8166_v0 }
  0x93   :  { %162 = vst [vmem:[#allocation2 + $0x150] sm:$0xff] %v8166_v0  ;;  %163 = vst [vmem:[#allocation2 + $0x158] sm:$0xff] %v8166_v0 }
  0x94   :  { %164 = vst [vmem:[#allocation2 + $0x160] sm:$0x3f] %v8166_v0  ;;  %165 = vst [vmem:[#allocation2 + $0x168] sm:$0xff] %v8166_v0 }
  0x95   :  { %166 = vst [vmem:[#allocation2 + $0x170] sm:$0xff] %v8166_v0  ;;  %167 = vst [vmem:[#allocation2 + $0x178] sm:$0x3f] %v8166_v0 }
  0x96   :  { %168 = vst [vmem:[#allocation2 + $0x180] sm:$0xff] %v8166_v0  ;;  %169 = vst [vmem:[#allocation2 + $0x188] sm:$0xff] %v8166_v0 }
  0x97   :  { %170 = vst [vmem:[#allocation2 + $0x190] sm:$0x3f] %v8166_v0  ;;  %171 = vst [vmem:[#allocation2 + $0x198] sm:$0xff] %v8166_v0 }
  0x98   :  { %172 = vst [vmem:[#allocation2 + $0x1a0] sm:$0xff] %v8166_v0  ;;  %173 = vst [vmem:[#allocation2 + $0x1a8] sm:$0x3f] %v8166_v0 }
  0x99   :  { %174 = vst [vmem:[#allocation2 + $0x1b0] sm:$0xff] %v8166_v0  ;;  %175 = vst [vmem:[#allocation2 + $0x1b8] sm:$0xff] %v8166_v0 }
  0x9a   :  { %176 = vst [vmem:[#allocation2 + $0x1c0] sm:$0x3f] %v8166_v0  ;;  %177 = vst [vmem:[#allocation2 + $0x1c8] sm:$0xff] %v8166_v0 }
  0x9b   :  { %178 = vst [vmem:[#allocation2 + $0x1d0] sm:$0xff] %v8166_v0  ;;  %179 = vst [vmem:[#allocation2 + $0x1d8] sm:$0x3f] %v8166_v0 }
  0x9c   :  { %180 = vst [vmem:[#allocation2 + $0x1e0] sm:$0xff] %v8166_v0  ;;  %181 = vst [vmem:[#allocation2 + $0x1e8] sm:$0xff] %v8166_v0 }
  0x9d   :  { %182 = vst [vmem:[#allocation2 + $0x1f0] sm:$0x3f] %v8166_v0  ;;  %183 = vst [vmem:[#allocation2 + $0x1f8] sm:$0xff] %v8166_v0 }
  0x9e   :  { %184 = vst [vmem:[#allocation2 + $0x200] sm:$0xff] %v8166_v0  ;;  %185 = vst [vmem:[#allocation2 + $0x208] sm:$0x3f] %v8166_v0 }
  0x9f   :  { %186 = vst [vmem:[#allocation2 + $0x210] sm:$0xff] %v8166_v0  ;;  %187 = vst [vmem:[#allocation2 + $0x218] sm:$0xff] %v8166_v0 }
  0xa0   :  { %188 = vst [vmem:[#allocation2 + $0x220] sm:$0x3f] %v8166_v0  ;;  %189 = vst [vmem:[#allocation2 + $0x228] sm:$0xff] %v8166_v0 }
  0xa1   :  { %190 = vst [vmem:[#allocation2 + $0x230] sm:$0xff] %v8166_v0  ;;  %191 = vst [vmem:[#allocation2 + $0x238] sm:$0x3f] %v8166_v0 }
  0xa2   :  { %192 = vst [vmem:[#allocation2 + $0x240] sm:$0xff] %v8166_v0  ;;  %193 = vst [vmem:[#allocation2 + $0x248] sm:$0xff] %v8166_v0 }
  0xa3   :  { %194 = vst [vmem:[#allocation2 + $0x250] sm:$0x3f] %v8166_v0  ;;  %195 = vst [vmem:[#allocation2 + $0x258] sm:$0xff] %v8166_v0 }
  0xa4   :  { %196 = vst [vmem:[#allocation2 + $0x260] sm:$0xff] %v8166_v0  ;;  %197 = vst [vmem:[#allocation2 + $0x268] sm:$0x3f] %v8166_v0 }
  0xa5   :  { %198 = vst [vmem:[#allocation3] sm:$0xff] %v8166_v0  ;;  %199 = vst [vmem:[#allocation3 + $0x8] sm:$0xff] %v8166_v0 }
  0xa6   :  { %200 = vst [vmem:[#allocation3 + $0x10] sm:$0xff] %v8166_v0  ;;  %201 = vst [vmem:[#allocation3 + $0x18] sm:$0xff] %v8166_v0 }
  0xa7   :  { %202 = vst [vmem:[#allocation3 + $0x20] sm:$0xff] %v8166_v0  ;;  %203 = vst [vmem:[#allocation3 + $0x28] sm:$0xff] %v8166_v0 }
  0xa8   :  { %204 = vst [vmem:[#allocation3 + $0x30] sm:$0xff] %v8166_v0  ;;  %205 = vst [vmem:[#allocation3 + $0x38] sm:$0xff] %v8166_v0 }
  0xa9   :  { %206 = vst [vmem:[#allocation3 + $0x40] sm:$0xff] %v8166_v0  ;;  %207 = vst [vmem:[#allocation3 + $0x48] sm:$0xff] %v8166_v0 }
  0xaa   :  { %208 = vst [vmem:[#allocation3 + $0x50] sm:$0xff] %v8166_v0  ;;  %209 = vst [vmem:[#allocation3 + $0x58] sm:$0xff] %v8166_v0 }
  0xab   :  { %210 = vst [vmem:[#allocation3 + $0x60] sm:$0xff] %v8166_v0  ;;  %211 = vst [vmem:[#allocation3 + $0x68] sm:$0xff] %v8166_v0 }
  0xac   :  { %212 = vst [vmem:[#allocation3 + $0x70] sm:$0xff] %v8166_v0  ;;  %213 = vst [vmem:[#allocation3 + $0x78] sm:$0xff] %v8166_v0 }
  0xad   :  { %214 = vst [vmem:[#allocation3 + $0x80] sm:$0xff] %v8166_v0  ;;  %215 = vst [vmem:[#allocation3 + $0x88] sm:$0xff] %v8166_v0 }
  0xae   :  { %216 = vst [vmem:[#allocation3 + $0x90] sm:$0xff] %v8166_v0  ;;  %217 = vst [vmem:[#allocation3 + $0x98] sm:$0xff] %v8166_v0 }
  0xaf   :  { %218 = vst [vmem:[#allocation3 + $0xa0] sm:$0xff] %v8166_v0  ;;  %219 = vst [vmem:[#allocation3 + $0xa8] sm:$0xff] %v8166_v0 }
  0xb0   :  { %220 = vst [vmem:[#allocation3 + $0xb0] sm:$0xff] %v8166_v0  ;;  %221 = vst [vmem:[#allocation3 + $0xb8] sm:$0xff] %v8166_v0 }
  0xb1   :  { %222 = vst [vmem:[#allocation3 + $0xc0] sm:$0xff] %v8166_v0  ;;  %223 = vst [vmem:[#allocation3 + $0xc8] sm:$0xff] %v8166_v0 }
  0xb2   :  { %224 = vst [vmem:[#allocation3 + $0xd0] sm:$0xff] %v8166_v0  ;;  %225 = vst [vmem:[#allocation3 + $0xd8] sm:$0xff] %v8166_v0 }
  0xb3   :  { %226 = vst [vmem:[#allocation3 + $0xe0] sm:$0xff] %v8166_v0  ;;  %227 = vst [vmem:[#allocation3 + $0xe8] sm:$0xff] %v8166_v0 }
  0xb4   :  { %228 = vst [vmem:[#allocation3 + $0xf0] sm:$0xff] %v8166_v0  ;;  %229 = vst [vmem:[#allocation3 + $0xf8] sm:$0xff] %v8166_v0 }
  0xb5   :  { %230 = vst [vmem:[#allocation3 + $0x100] sm:$0xff] %v8166_v0  ;;  %231 = vst [vmem:[#allocation3 + $0x108] sm:$0xff] %v8166_v0 }
  0xb6   :  { %232 = vst [vmem:[#allocation3 + $0x110] sm:$0xff] %v8166_v0  ;;  %233 = vst [vmem:[#allocation3 + $0x118] sm:$0xff] %v8166_v0 }
  0xb7   :  { %234 = vst [vmem:[#allocation5] sm:$0xff] %v8166_v0  ;;  %235 = vst [vmem:[#allocation5 + $0x8] sm:$0x1] %v8166_v0 }
  0xb8   :  { %236 = vst [vmem:[#allocation5 + $0x10] sm:$0xff] %v8166_v0  ;;  %237 = vst [vmem:[#allocation5 + $0x18] sm:$0x1] %v8166_v0 }
  0xb9   :  { %238 = vst [vmem:[#allocation5 + $0x20] sm:$0xff] %v8166_v0  ;;  %239 = vst [vmem:[#allocation5 + $0x28] sm:$0x1] %v8166_v0 }
  0xba   :  { %240 = vst [vmem:[#allocation5 + $0x30] sm:$0xff] %v8166_v0  ;;  %241 = vst [vmem:[#allocation5 + $0x38] sm:$0x1] %v8166_v0 }
  0xbb   :  { %242 = vst [vmem:[#allocation5 + $0x40] sm:$0xff] %v8166_v0  ;;  %243 = vst [vmem:[#allocation5 + $0x48] sm:$0x1] %v8166_v0 }
  0xbc   :  { %244 = vst [vmem:[#allocation5 + $0x50] sm:$0xff] %v8166_v0  ;;  %245 = vst [vmem:[#allocation5 + $0x58] sm:$0x1] %v8166_v0 }
  0xbd   :  { %246 = vst [vmem:[#allocation5 + $0x60] sm:$0xff] %v8166_v0  ;;  %247 = vst [vmem:[#allocation5 + $0x68] sm:$0x1] %v8166_v0 }
  0xbe   :  { %248 = vst [vmem:[#allocation5 + $0x70] sm:$0xff] %v8166_v0  ;;  %249 = vst [vmem:[#allocation5 + $0x78] sm:$0x1] %v8166_v0 }
  0xbf   :  { %250 = vst [vmem:[#allocation5 + $0x80] sm:$0xff] %v8166_v0  ;;  %251 = vst [vmem:[#allocation5 + $0x88] sm:$0x1] %v8166_v0 }
  0xc0 LB: > { %v264_v1 = vld [vmem:[#allocation6 + $0x8] sm:$0xff]  ;;  %v8167_v2 = vmov 0.0   ;;  %vm8168_vm0 = vmmov 0   ;;  %s258_s28 = smul.u32 24, %s8139_s7  ;;  %vm268_vm1 = vcmask 1046528   ;;  %vm274_vm2 = vcmask 64512   ;;  %s8139_s7 = sphi %s8449_s7, %s257_s7  }
  0xc1   : > { %7843 = vmatprep.subr.mxu1 %v8167_v2  ;;  %5530 = vmatprep.mubr.msk.f32.mxu1 %vm8168_vm0, %v8167_v2  ;;  %v263_v10 = vld [vmem:[#allocation6] sm:$0xff]  ;;  %vm448_vm3 = vcmask 1045504   ;;  %v447_v14 = vld [vmem:[#allocation6 + $0x10] sm:$0xff]  ;;  %v549_v19 = vld [vmem:[#allocation6 + $0x18] sm:$0xff]  ;;  %vm1134_vm4 = vcmask 1040384   ;;  %vm1144_vm5 = vcmask 1044480  }
  0xc2   : > { %7844 = vmatpush3.msra.mxu1 %v264_v1  ;;  %5525 = vmatprep.subr.mxu0 %v8167_v2  ;;  %s8465_s20 = scalar_lea.vmem %s8952_s0, %s258_s28  ;;  %v642_v17 = vld [vmem:[#allocation6 + $0x20] sm:$0xff]  ;;  %v838_v27 = vld [vmem:[#allocation6 + $0x30] sm:$0xff]  ;;  %v737_v29 = vld [vmem:[#allocation6 + $0x28] sm:$0xff]  ;;  %s4715_s22 = scalar_lea.vmem [#allocation2], %s258_s28 }
  0xc3   : > { %5536 = vmatprep.subr.mxu1 %v8167_v2  ;;  %5526 = vmatpush3.msra.mxu0 %v264_v1  ;;  %v261_v3 = vld [vmem:[%s8465_s20 + $0x8] sm:$0xff]  ;;  %v262_v4 = vld [vmem:[%s8465_s20 + $0x10] sm:$0x3f]  ;;  %v260_v5 = vld [vmem:[%s8465_s20] sm:$0xff]  ;;  %s257_s7 = sadd.s32 1, %s8139_s7  }
  0xc4   : > { %5527 = vmatprep.mubr.msk.f32.mxu0 %vm8168_vm0, %v8167_v2  ;;  %5547 = vmatprep.subr.mxu0 %v8167_v2  ;;  %v270_v6 = vrot.slane %v261_v3, 1  ;;  %v272_v7 = vrot.slane %v262_v4, 1  ;;  %v269_v8 = vrot.slane %v260_v5, 1  ;;  %v449_v9 = vrot.slane %v260_v5, 2  ;;  %v4801_v20 = vld [vmem:[%s8465_s20 + $0x18] sm:$0xff]  ;;  %v4802_v21 = vld [vmem:[%s8465_s20 + $0x20] sm:$0xff] }
  0xc5   : > { %v450_v11 = vrot.slane %v261_v3, 2  ;;  %v452_v16 = vrot.slane %v262_v4, 2  ;;  %v643_v22 = vrot.slane %v4801_v20, 1  ;;  %v644_v23 = vrot.slane %v4802_v21, 1  ;;  %v4803_v24 = vld [vmem:[%s8465_s20 + $0x28] sm:$0x3f] }
  0xc6   : > { %v273_v12 = vsel %vm268_vm1, %v270_v6, %v272_v7  ;;  %v271_v13 = vsel %vm268_vm1, %v269_v8, %v270_v6  ;;  %v646_v26 = vrot.slane %v4803_v24, 1  ;;  %v738_v30 = vrot.slane %v4801_v20, 2  ;;  %v4813_v32 = vld [vmem:[%s8465_s20 + $0x30] sm:$0xff]  ;;  %v1026_v33 = vld [vmem:[#allocation6 + $0x40] sm:$0xff]  ;;  %v4814_v36 = vld [vmem:[%s8465_s20 + $0x38] sm:$0xff]  ;;  %p254_p0 = scmp.ge.s32.totalorder %s257_s7, 20  }
  0xc7   : > { %5531 = vmatmul.mubr.msk.f32.vlgmr.msra.gmra.mrb[0].mxu1 %vm274_vm2, %v273_v12  ;;  %5528 = vmatmul.mubr.msk.f32.vlgmr.msra.gmra.mrb[0].mxu0 %vm274_vm2, %v271_v13  ;;  %v451_v15 = vsel %vm448_vm3, %v449_v9, %v450_v11  ;;  %v453_v18 = vsel %vm448_vm3, %v450_v11, %v452_v16  ;;  %v645_v25 = vsel %vm268_vm1, %v643_v22, %v644_v23  ;;  %v739_v31 = vrot.slane %v4802_v21, 2  ;;  %v931_v37 = vld [vmem:[#allocation6 + $0x38] sm:$0xff]  ;;  %v4815_v41 = vld [vmem:[%s8465_s20 + $0x40] sm:$0x3f]  ;;  %s8583_s23 = smov (%p254_p0), 0  }
  0xc8   : > { %5537 = vmatpush3.msra.mxu1 %v263_v10  ;;  %5533 = vmatprep.mubr.msk.f32.mxu1 %vm8168_vm0, %v8167_v2  ;;  %v647_v28 = vsel %vm268_vm1, %v644_v23, %v646_v26  ;;  %v741_v35 = vrot.slane %v4803_v24, 2  ;;  %v1027_v38 = vrot.slane %v4813_v32, 2  ;;  %v1028_v40 = vrot.slane %v4814_v36, 2 }
  0xc9   : > { %5548 = vmatpush3.msra.mxu0 %v447_v14  ;;  %5558 = vmatprep.subr.mxu1 %v8167_v2  ;;  %v740_v34 = vsel %vm448_vm3, %v738_v30, %v739_v31  ;;  %v932_v42 = vrot.slane %v4813_v32, 1  ;;  %v933_v43 = vrot.slane %v4814_v36, 1  ;;  %v1030_v44 = vrot.slane %v4815_v41, 2 }
  0xca   : > { %5549 = vmatprep.mubr.msk.f32.mxu0 %vm8168_vm0, %v8167_v2  ;;  %5569 = vmatprep.subr.mxu0 %v8167_v2  ;;  %v742_v39 = vsel %vm448_vm3, %v739_v31, %v741_v35  ;;  %v1029_v45 = vsel %vm448_vm3, %v1027_v38, %v1028_v40  ;;  %v935_v46 = vrot.slane %v4815_v41, 1 }
  0xcb   : > { %5534 = vmatmul.mubr.msk.f32.gmra.mrb[2].mxu1 %vm274_vm2, %v272_v7  ;;  %5550 = vmatmul.mubr.msk.f32.vlgmr.msra.gmra.mrb[2].mxu0 %vm274_vm2, %v451_v15  ;;  %v934_v47 = vsel %vm268_vm1, %v932_v42, %v933_v43  ;;  %v1031_v48 = vsel %vm448_vm3, %v1028_v40, %v1030_v44 }
  0xcc   : > { %5538 = vmatprep.mubr.msk.f32.mxu1 %vm8168_vm0, %v8167_v2  ;;  %5570 = vmatpush3.msra.mxu0 %v642_v17  ;;  %v936_v49 = vsel %vm268_vm1, %v933_v43, %v935_v46 }
  0xcd   : > { %5552 = vmatprep.mubr.msk.f32.mxu0 %vm8168_vm0, %v8167_v2  ;;  %5591 = vmatprep.subr.mxu0 %v8167_v2 }
  0xcf   : > { %5539 = vmatmul.mubr.msk.f32.vlgmr.msra.gmra.mrb[4].mxu1 %vm274_vm2, %v260_v5  ;;  %5553 = vmatmul.mubr.msk.f32.gmra.mrb[4].mxu0 %vm274_vm2, %v453_v18 }
  0xd0   : > { %5559 = vmatpush3.msra.mxu1 %v549_v19  ;;  %5541 = vmatprep.mubr.msk.f32.mxu1 %vm8168_vm0, %v8167_v2 }
  0xd1   : > { %5555 = vmatprep.mubr.msk.f32.mxu0 %vm8168_vm0, %v8167_v2  ;;  %5580 = vmatprep.subr.mxu1 %v8167_v2 }
  0xd3   : > { %5542 = vmatmul.mubr.msk.f32.gmra.mrb[6].mxu1 %vm274_vm2, %v261_v3  ;;  %5556 = vmatmul.mubr.msk.f32.gmra.mrb[6].mxu0 %vm274_vm2, %v452_v16 }
  0xd4   : > { %5544 = vmatprep.mubr.msk.f32.mxu1 %vm8168_vm0, %v8167_v2  ;;  %5571 = vmatprep.mubr.msk.f32.mxu0 %vm8168_vm0, %v8167_v2 }
  0xd7   : > { %5545 = vmatmul.mubr.msk.f32.gmra.mrb[8].mxu1 %vm274_vm2, %v262_v4  ;;  %5572 = vmatmul.mubr.msk.f32.vlgmr.msra.gmra.mrb[8].mxu0 %vm274_vm2, %v645_v25 }
  0xd8   : > { %5560 = vmatprep.mubr.msk.f32.mxu1 %vm8168_vm0, %v8167_v2  ;;  %5592 = vmatpush3.msra.mxu0 %v838_v27 }
  0xd9   : > { %5574 = vmatprep.mubr.msk.f32.mxu0 %vm8168_vm0, %v8167_v2  ;;  %5613 = vmatprep.subr.mxu0 %v8167_v2 }
  0xdb   : > { %5561 = vmatmul.mubr.msk.f32.vlgmr.msra.gmra.mrb[10].mxu1 %vm274_vm2, %v4801_v20  ;;  %5575 = vmatmul.mubr.msk.f32.gmra.mrb[10].mxu0 %vm274_vm2, %v647_v28 }
  0xdc   : > { %5581 = vmatpush3.msra.mxu1 %v737_v29  ;;  %5563 = vmatprep.mubr.msk.f32.mxu1 %vm8168_vm0, %v8167_v2 }
  0xdd   : > { %5577 = vmatprep.mubr.msk.f32.mxu0 %vm8168_vm0, %v8167_v2  ;;  %5602 = vmatprep.subr.mxu1 %v8167_v2 }
  0xdf   : > { %5564 = vmatmul.mubr.msk.f32.gmra.mrb[12].mxu1 %vm274_vm2, %v4802_v21  ;;  %5578 = vmatmul.mubr.msk.f32.gmra.mrb[12].mxu0 %vm274_vm2, %v646_v26 }
  0xe0   : > { %5566 = vmatprep.mubr.msk.f32.mxu1 %vm8168_vm0, %v8167_v2  ;;  %5593 = vmatprep.mubr.msk.f32.mxu0 %vm8168_vm0, %v8167_v2 }
  0xe3   : > { %5567 = vmatmul.mubr.msk.f32.gmra.mrb[14].mxu1 %vm274_vm2, %v4803_v24  ;;  %5594 = vmatmul.mubr.msk.f32.vlgmr.msra.gmra.mrb[14].mxu0 %vm274_vm2, %v4813_v32 }
  0xe4   : > { %5582 = vmatprep.mubr.msk.f32.mxu1 %vm8168_vm0, %v8167_v2  ;;  %5614 = vmatpush3.msra.mxu0 %v1026_v33 }
  0xe5   : > { %5596 = vmatprep.mubr.msk.f32.mxu0 %vm8168_vm0, %v8167_v2 }
  0xe7   : > { %5583 = vmatmul.mubr.msk.f32.vlgmr.msra.gmra.mrb[16].mxu1 %vm274_vm2, %v740_v34  ;;  %5597 = vmatmul.mubr.msk.f32.gmra.mrb[16].mxu0 %vm274_vm2, %v4814_v36 }
  0xe8   : > { %5603 = vmatpush3.msra.mxu1 %v931_v37  ;;  %5585 = vmatprep.mubr.msk.f32.mxu1 %vm8168_vm0, %v8167_v2 }
  0xe9   : > { %5599 = vmatprep.mubr.msk.f32.mxu0 %vm8168_vm0, %v8167_v2 }
  0xeb   : > { %5586 = vmatmul.mubr.msk.f32.gmra.mrb[18].mxu1 %vm274_vm2, %v742_v39  ;;  %5600 = vmatmul.mubr.msk.f32.gmra.mrb[18].mxu0 %vm274_vm2, %v4815_v41 }
  0xec   : > { %5588 = vmatprep.mubr.msk.f32.mxu1 %vm8168_vm0, %v8167_v2  ;;  %5615 = vmatprep.mubr.msk.f32.mxu0 %vm8168_vm0, %v8167_v2 }
  0xef   : > { %5589 = vmatmul.mubr.msk.f32.gmra.mrb[20].mxu1 %vm274_vm2, %v741_v35  ;;  %5616 = vmatmul.mubr.msk.f32.vlgmr.msra.gmra.mrb[20].mxu0 %vm274_vm2, %v1029_v45 }
  0xf0   : > { %5604 = vmatprep.mubr.msk.f32.mxu1 %vm8168_vm0, %v8167_v2  ;;  %5618 = vmatprep.mubr.msk.f32.mxu0 %vm8168_vm0, %v8167_v2 }
  0xf3   : > { %5605 = vmatmul.mubr.msk.f32.vlgmr.msra.gmra.mrb[22].mxu1 %vm274_vm2, %v934_v47  ;;  %5619 = vmatmul.mubr.msk.f32.gmra.mrb[22].mxu0 %vm274_vm2, %v1031_v48 }
  0xf4   : > { %5607 = vmatprep.mubr.msk.f32.mxu1 %vm8168_vm0, %v8167_v2  ;;  %5621 = vmatprep.mubr.msk.f32.mxu0 %vm8168_vm0, %v8167_v2 }
  0xf7   : > { %5608 = vmatmul.mubr.msk.f32.gmra.mrb[24].mxu1 %vm274_vm2, %v936_v49  ;;  %5622 = vmatmul.mubr.msk.f32.gmra.mrb[24].mxu0 %vm274_vm2, %v1030_v44 }
  0xf8   : > { %5610 = vmatprep.mubr.msk.f32.mxu1 %vm8168_vm0, %v8167_v2 }
  0xfb   : > { %5611 = vmatmul.mubr.msk.f32.gmra.mrb[26].mxu1 %vm274_vm2, %v935_v46 }
 0x19a   : > { %v352_v50 = vpop.f32.mrb[0].mxu1  ;;  %v347_v51 = vpop.f32.mrb[0].mxu0 }
 0x19b   : > { %v5532_v52 = vpop.f32.mrb[1].mxu1  ;;  %v5529_v53 = vpop.f32.mrb[1].mxu0 }
 0x19c   : > { %v4825_v53 = vld [vmem:[#allocation8] ss:$0 sm:$0xff] }
 0x19e   : > { %v357_v54 = vpop.f32.mrb[2].mxu1  ;;  %v526_v55 = vpop.f32.mrb[2].mxu0 }
 0x19f   : > { %v5535_v56 = vpop.f32.mrb[3].mxu1  ;;  %v5551_v57 = vpop.f32.mrb[3].mxu0 }
 0x1a2   : > { %v433_v58 = vpop.f32.mrb[4].mxu1  ;;  %v531_v59 = vpop.f32.mrb[4].mxu0 }
 0x1a3   : > { %v434_v60 = vadd.f32 %v433_v58, %v347_v51  ;;  %v5540_v61 = vpop.f32.mrb[5].mxu1  ;;  %v5554_v62 = vpop.f32.mrb[5].mxu0 }
 0x1a5   : > { %v540_v63 = vadd.f32 %v526_v55, %v434_v60 }
 0x1a6   : > { %v438_v0 = vpop.f32.mrb[6].mxu1  ;;  %v536_v1 = vpop.f32.mrb[6].mxu0 }
 0x1a7   : > { %v439_v3 = vadd.f32 %v438_v0, %v352_v50  ;;  %v5543_v2 = vpop.f32.mrb[7].mxu1  ;;  %v5557_v4 = vpop.f32.mrb[7].mxu0 }
 0x1a9   : > { %v541_v5 = vadd.f32 %v531_v59, %v439_v3 }
 0x1aa   : > { %v443_v6 = vpop.f32.mrb[8].mxu1  ;;  %v720_v7 = vpop.f32.mrb[8].mxu0 }
 0x1ab   : > { %v444_v8 = vadd.f32 %v443_v6, %v357_v54  ;;  %v5546_v9 = vpop.f32.mrb[9].mxu1  ;;  %v5573_v10 = vpop.f32.mrb[9].mxu0 }
 0x1ad   : > { %v542_v11 = vadd.f32 %v536_v1, %v444_v8 }
 0x1ae   : > { %v625_v12 = vpop.f32.mrb[10].mxu1  ;;  %v725_v13 = vpop.f32.mrb[10].mxu0 }
 0x1af   : > { %v639_v14 = vadd.f32 %v625_v12, %v540_v63  ;;  %v5562_v15 = vpop.f32.mrb[11].mxu1  ;;  %v5576_v16 = vpop.f32.mrb[11].mxu0 }
 0x1b1   : > { %v734_v17 = vadd.f32 %v720_v7, %v639_v14 }
 0x1b2   : > { %v630_v18 = vpop.f32.mrb[12].mxu1  ;;  %v730_v19 = vpop.f32.mrb[12].mxu0 }
 0x1b3   : > { %v640_v20 = vadd.f32 %v630_v18, %v541_v5  ;;  %v5565_v21 = vpop.f32.mrb[13].mxu1  ;;  %v5579_v22 = vpop.f32.mrb[13].mxu0 }
 0x1b5   : > { %v735_v23 = vadd.f32 %v725_v13, %v640_v20 }
 0x1b6   : > { %v635_v24 = vpop.f32.mrb[14].mxu1  ;;  %v914_v25 = vpop.f32.mrb[14].mxu0 }
 0x1b7   : > { %v641_v26 = vadd.f32 %v635_v24, %v542_v11  ;;  %v5568_v27 = vpop.f32.mrb[15].mxu1  ;;  %v5595_v28 = vpop.f32.mrb[15].mxu0 }
 0x1b9   : > { %v736_v29 = vadd.f32 %v730_v19, %v641_v26 }
 0x1ba   : > { %v815_v30 = vpop.f32.mrb[16].mxu1  ;;  %v919_v31 = vpop.f32.mrb[16].mxu0 }
 0x1bb   : > { %v829_v32 = vadd.f32 %v815_v30, %v734_v17  ;;  %v5584_v33 = vpop.f32.mrb[17].mxu1  ;;  %v5598_v34 = vpop.f32.mrb[17].mxu0 }
 0x1bd   : > { %v928_v35 = vadd.f32 %v914_v25, %v829_v32 }
 0x1be   : > { %v820_v36 = vpop.f32.mrb[18].mxu1  ;;  %v924_v37 = vpop.f32.mrb[18].mxu0 }
 0x1bf   : > { %v830_v38 = vadd.f32 %v820_v36, %v735_v23  ;;  %v5587_v39 = vpop.f32.mrb[19].mxu1  ;;  %v5601_v40 = vpop.f32.mrb[19].mxu0 }
 0x1c1   : > { %v929_v41 = vadd.f32 %v919_v31, %v830_v38 }
 0x1c2   : > { %v825_v42 = vpop.f32.mrb[20].mxu1  ;;  %v1104_v43 = vpop.f32.mrb[20].mxu0 }
 0x1c3   : > { %v831_v44 = vadd.f32 %v825_v42, %v736_v29  ;;  %v5590_v45 = vpop.f32.mrb[21].mxu1  ;;  %v5617_v46 = vpop.f32.mrb[21].mxu0 }
 0x1c5   : > { %v930_v47 = vadd.f32 %v924_v37, %v831_v44 }
 0x1c6   : > { %v1009_v48 = vpop.f32.mrb[22].mxu1  ;;  %v1109_v49 = vpop.f32.mrb[22].mxu0 }
 0x1c7   : > { %v1023_v50 = vadd.f32 %v1009_v48, %v928_v35  ;;  %v5606_v51 = vpop.f32.mrb[23].mxu1  ;;  %v5620_v52 = vpop.f32.mrb[23].mxu0 }
 0x1c9   : > { %v1118_v54 = vadd.f32 %v1104_v43, %v1023_v50 }
 0x1ca   : > { %v1014_v55 = vpop.f32.mrb[24].mxu1  ;;  %v1114_v56 = vpop.f32.mrb[24].mxu0 }
 0x1cb   : > { %v1128_v57 = vadd.f32 %v4825_v53, %v1118_v54  ;;  %v1024_v58 = vadd.f32 %v1014_v55, %v929_v41  ;;  %v5609_v59 = vpop.f32.mrb[25].mxu1  ;;  %v5623_v60 = vpop.f32.mrb[25].mxu0 }
 0x1cd   : > { %v1135_v61 = vrot.slane %v1128_v57, 7  ;;  %v1119_v62 = vadd.f32 %v1109_v49, %v1024_v58 }
 0x1ce   : > { %v1019_v63 = vpop.f32.mrb[26].mxu1 }
 0x1cf   : > { %v1143_v0 = vsel %vm1134_vm4, 0.0, %v1135_v61  ;;  %v1129_v1 = vadd.f32 %v4825_v53, %v1119_v62  ;;  %v1025_v3 = vadd.f32 %v1019_v63, %v930_v47  ;;  %v5612_v2 = vpop.f32.mrb[27].mxu1 }
 0x1d0   : > { %4826 = vst [vmem:[%s4715_s22 + $0x48] sm:$0xff] %v1143_v0 }
 0x1d1   : > { %v1136_v4 = vrot.slane %v1129_v1, 7  ;;  %v1120_v5 = vadd.f32 %v1114_v56, %v1025_v3 }
 0x1d3   : > { %v1137_v6 = vsel %vm1134_vm4, %v1135_v61, %v1136_v4  ;;  %v1130_v7 = vadd.f32 %v4825_v53, %v1120_v5  ;;  %256 = sbr.rel (!%p254_p0) target bundleno = 192 (0xc0), region = 137 }
 0x1d4   : > { %4827 = vst [vmem:[%s4715_s22 + $0x50] sm:$0xff] %v1137_v6 }
 0x1d5   : > { %v1138_v8 = vrot.slane %v1130_v7, 7 }
 0x1d7   : > { %v1139_v9 = vsel %vm1134_vm4, %v1136_v4, %v1138_v8 }
 0x1d8   : > { %v1145_v10 = vsel %vm1144_vm5, %v1139_v9, 0.0 }
 0x1d9   : > { %4828 = vst [vmem:[%s4715_s22 + $0x58] sm:$0x3f] %v1145_v10 }
 0x1da LB: > { %v1182_v11 = vld [vmem:[#allocation10] sm:$0xff]  ;;  %vm1184_vm6 = vcmask 179200   ;;  %s4830_s25 = smul.u32 48, %s8143_s23  ;;  %v1183_v28 = vld [vmem:[#allocation10 + $0x8] sm:$0x3]  ;;  %s4844_s0 = sshll.u32 %s8143_s23, 4  ;;  %s8143_s23 = sphi %s8583_s23, %s1157_s23  }
 0x1db   : > { %5630 = vmatprep.mubr.msk.f32.mxu0 %vm1184_vm6, %v1182_v11  ;;  %vm1274_vm7 = vcmask 1042432   ;;  %s4728_s27 = scalar_lea.vmem [#allocation3], %s4844_s0  ;;  %s1157_s23 = sadd.s32 1, %s8143_s23  }
 0x1dc   : > { %s1160_s26 = scalar_lea.vmem [#allocation2], %s4830_s25  ;;  %p1154_p1 = scmp.ge.s32.totalorder %s1157_s23, 12  }
 0x1dd   :  { %s8600_s29 = smov (%p1154_p1), 0  }
 0x1e0   : > { %v1161_v12 = vld [vmem:[%s1160_s26] sm:$0xff]  ;;  %v1162_v13 = vld [vmem:[%s1160_s26 + $0x8] sm:$0xff]  ;;  %v4833_v14 = vld [vmem:[%s1160_s26 + $0x18] sm:$0xff] }
 0x1e1   : > { %v4834_v15 = vld [vmem:[%s1160_s26 + $0x20] sm:$0xff]  ;;  %v1170_v16 = vadd.f32 %v4833_v14, %v1161_v12  ;;  %v4838_v17 = vld [vmem:[%s1160_s26 + $0x30] sm:$0xff]  ;;  %v4839_v18 = vld [vmem:[%s1160_s26 + $0x38] sm:$0xff] }
 0x1e2   : > { %v1171_v19 = vadd.f32 %v4834_v15, %v1162_v13  ;;  %v1163_v20 = vld [vmem:[%s1160_s26 + $0x10] sm:$0x3f]  ;;  %v4835_v21 = vld [vmem:[%s1160_s26 + $0x28] sm:$0x3f]  ;;  %v4840_v24 = vld [vmem:[%s1160_s26 + $0x40] sm:$0x3f] }
 0x1e3   : > { %v1179_v22 = vadd.f32 %v4838_v17, %v1170_v16  ;;  %v1172_v23 = vadd.f32 %v4835_v21, %v1163_v20 }
 0x1e4   : > { %v1180_v25 = vadd.f32 %v4839_v18, %v1171_v19 }
 0x1e5   : > { %v1181_v27 = vadd.f32 %v4840_v24, %v1172_v23 }
 0x1e6   : > { %v6823_v26 = vpack.c.bf16 %v1180_v25, %v1179_v22 }
 0x1e8   : > { %6824 = vmatprep.subr.bf16.mxu0 %v6823_v26 }
 0x1e9   : > { %6826 = vmatpush3.bf16.msra.mxu0 %v6823_v26 }
 0x1ea   : > { %5628 = vmatprep.subr.msk.mxu0 %vm448_vm3, %v1181_v27 }
 0x1ed   : > { %5629 = vmatpush3.msk.msra.mxu0 %vm448_vm3, %v1181_v27 }
 0x1ee   : > { %5631 = vmatmul.mubr.msk.f32.vlgmr.msra.gmra.mrb[0].mxu0 %vm1184_vm6, %v1183_v28 }
 0x2c1   : > { %v5632_v29 = vpop.f32.mrb[0].mxu0 }
 0x2c2   : > { %v1271_v30 = vmax.f32 %v5632_v29, 0.0  ;;  %v1261_v31 = vpop.f32.mrb[1].mxu0 }
 0x2c3   : > { %v1270_v32 = vmax.f32 %v1261_v31, 0.0  ;;  %1156 = sbr.rel (!%p1154_p1) target bundleno = 474 (0x1da), region = 148 }
 0x2c4   : > { %v1276_v33 = vrot.slane %v1271_v30, 5 }
 0x2c5   : > { %v1275_v34 = vrot.slane %v1270_v32, 5 }
 0x2c7   : > { %v1277_v35 = vsel %vm1274_vm7, %v1275_v34, %v1276_v33  ;;  %v1280_v36 = vsel %vm1274_vm7, 0.0, %v1275_v34 }
 0x2c8   : > { %v1282_v37 = vsel %vm1144_vm5, %v1277_v35, 0.0  ;;  %4845 = vst [vmem:[%s4728_s27 + $0x30] sm:$0xff] %v1280_v36 }
 0x2c9   : > { %4846 = vst [vmem:[%s4728_s27 + $0x38] sm:$0xff] %v1282_v37 }
 0x2ca LB: > { %v1314_v38 = vld [vmem:[#allocation11 + $0x80] sm:$0xff]  ;;  %v1315_v39 = vld [vmem:[#allocation11 + $0x88] sm:$0xff]  ;;  %v1316_v43 = vld [vmem:[#allocation11 + $0x90] sm:$0xff]  ;;  %s4847_s2 = sshll.u32 %s8147_s29, 4  ;;  %vm1702_vm8 = vcmask 1043456   ;;  %s1293_s29 = sadd.s32 1, %s8147_s29   ;;  %s8147_s29 = sphi %s8600_s29, %s1293_s29  }
 0x2cb   : > { %v2475_v40 = vld [vmem:[#allocation11 + $0x600] sm:$0xff]  ;;  %v6827_v41 = vpack.c.bf16 %v1315_v39, %v1314_v38  ;;  %v2476_v42 = vld [vmem:[#allocation11 + $0x608] sm:$0xff]  ;;  %v1317_v44 = vld [vmem:[#allocation11 + $0x98] sm:$0xff]  ;;  %s8608_s9 = scalar_lea.vmem [#allocation3], %s4847_s2  ;;  %s3762_s10 = scalar_lea.vmem [#allocation4], %s4847_s2 }
 0x2cc   : > { %v7211_v45 = vpack.c.bf16 %v2476_v42, %v2475_v40  ;;  %v6831_v46 = vpack.c.bf16 %v1317_v44, %v1316_v43  ;;  %v2477_v47 = vld [vmem:[#allocation11 + $0x610] sm:$0xff]  ;;  %v2478_v48 = vld [vmem:[#allocation11 + $0x618] sm:$0xff]  ;;  %v1318_v49 = vld [vmem:[#allocation11 + $0xa0] sm:$0xff]  ;;  %p1290_p2 = scmp.ge.s32.totalorder %s1293_s29, 14  }
 0x2cd   : > { %6828 = vmatprep.subr.bf16.mxu1 %v6827_v41  ;;  %v7215_v50 = vpack.c.bf16 %v2478_v48, %v2477_v47  ;;  %v1319_v51 = vld [vmem:[#allocation11 + $0xa8] sm:$0xff]  ;;  %v2479_v52 = vld [vmem:[#allocation11 + $0x620] sm:$0xff]  ;;  %v1320_v56 = vld [vmem:[#allocation11 + $0xb0] sm:$0xff]  ;;  %s8803_s6 = smov (%p1290_p2), 0  }
 0x2ce   : > { %v2480_v53 = vld [vmem:[#allocation11 + $0x628] sm:$0xff]  ;;  %7212 = vmatprep.subr.bf16.mxu0 %v7211_v45  ;;  %6830 = vmatpush3.bf16.msra.mxu1 %v6827_v41  ;;  %v6835_v54 = vpack.c.bf16 %v1319_v51, %v1318_v49  ;;  %v1321_v57 = vld [vmem:[#allocation11 + $0xb8] sm:$0xff]  ;;  %v2481_v58 = vld [vmem:[#allocation11 + $0x630] sm:$0xff] }
 0x2cf   : > { %7214 = vmatpush3.bf16.msra.mxu0 %v7211_v45  ;;  %6832 = vmatprep.subr.bf16.mxu1 %v6831_v46  ;;  %v7219_v55 = vpack.c.bf16 %v2480_v53, %v2479_v52  ;;  %v2482_v59 = vld [vmem:[#allocation11 + $0x638] sm:$0xff]  ;;  %v6839_v60 = vpack.c.bf16 %v1321_v57, %v1320_v56  ;;  %v1322_v61 = vld [vmem:[#allocation11 + $0xc0] sm:$0xff]  ;;  %v1323_v62 = vld [vmem:[#allocation11 + $0xc8] sm:$0xff] }
 0x2d0   : > { %7216 = vmatprep.subr.bf16.mxu0 %v7215_v50  ;;  %v7223_v63 = vpack.c.bf16 %v2482_v59, %v2481_v58  ;;  %v8611_v0 = vld [vmem:[%s8608_s9] sm:$0xff]  ;;  %v8614_v2 = vld [vmem:[%s8608_s9 + $0x8] sm:$0xff]  ;;  %v6843_v5 = vpack.c.bf16 %v1323_v62, %v1322_v61  ;;  %v1325_v15 = vld [vmem:[#allocation11 + $0xd8] sm:$0xff] }
 0x2d1   : > { %v2483_v1 = vld [vmem:[#allocation11 + $0x640] sm:$0xff]  ;;  %v2484_v3 = vld [vmem:[#allocation11 + $0x648] sm:$0xff]  ;;  %v1333_v4 = vrot.slane %v8611_v0, 1  ;;  %v1334_v6 = vrot.slane %v8614_v2, 1  ;;  %v1604_v11 = vrot.slane %v8611_v0, 3  ;;  %v1605_v12 = vrot.slane %v8614_v2, 3 }
 0x2d2   : > { %6834 = vmatpush3.bf16.msra.mxu1 %v6831_v46  ;;  %v8619_v7 = vld [vmem:[%s8608_s9 + $0x20] sm:$0xff]  ;;  %v8622_v8 = vld [vmem:[%s8608_s9 + $0x28] sm:$0xff]  ;;  %v7227_v13 = vpack.c.bf16 %v2484_v3, %v2483_v1  ;;  %v2486_v18 = vld [vmem:[#allocation11 + $0x658] sm:$0xff]  ;;  %v1703_v48 = vrot.slane %v8611_v0, 4  ;;  %v1704_v49 = vrot.slane %v8614_v2, 4 }
 0x2d3   : > { %7218 = vmatpush3.bf16.msra.mxu0 %v7215_v50  ;;  %6836 = vmatprep.subr.bf16.mxu1 %v6835_v54  ;;  %v2491_v9 = vrot.slane %v8619_v7, 2  ;;  %v2492_v10 = vrot.slane %v8622_v8, 2  ;;  %v1324_v14 = vld [vmem:[#allocation11 + $0xd0] sm:$0xff]  ;;  %v1335_v16 = vsel %vm268_vm1, %v1333_v4, %v1334_v6  ;;  %v8637_v21 = vsel %vm1144_vm5, %v1604_v11, %v1605_v12  ;;  %v1326_v23 = vld [vmem:[#allocation11 + $0xe0] sm:$0xff]  ;;  %v1327_v24 = vld [vmem:[#allocation11 + $0xe8] sm:$0xff] }
 0x2d4   : > { %7220 = vmatprep.subr.bf16.mxu0 %v7219_v55  ;;  %v2485_v17 = vld [vmem:[#allocation11 + $0x650] sm:$0xff]  ;;  %5665 = vmatprep.mubr.f32.mxu1 %v1335_v16  ;;  %v6847_v20 = vpack.c.bf16 %v1325_v15, %v1324_v14  ;;  %v2487_v25 = vld [vmem:[#allocation11 + $0x660] sm:$0xff]  ;;  %v2488_v26 = vld [vmem:[#allocation11 + $0x668] sm:$0xff]  ;;  %v6851_v27 = vpack.c.bf16 %v1327_v24, %v1326_v23  ;;  %v2589_v45 = vrot.slane %v8619_v7, 3  ;;  %v2590_v46 = vrot.slane %v8622_v8, 3 }
 0x2d5   : > { %v2493_v19 = vsel %vm448_vm3, %v2491_v9, %v2492_v10  ;;  %v7231_v22 = vpack.c.bf16 %v2486_v18, %v2485_v17  ;;  %v7235_v28 = vpack.c.bf16 %v2488_v26, %v2487_v25  ;;  %v1328_v29 = vld [vmem:[#allocation11 + $0xf0] sm:$0xff]  ;;  %v1329_v30 = vld [vmem:[#allocation11 + $0xf8] sm:$0xff]  ;;  %v1298_v35 = vld [vmem:[#allocation11] sm:$0xff] }
 0x2d6   : > { %6838 = vmatpush3.bf16.msra.mxu1 %v6835_v54  ;;  %6085 = vmatprep.mubr.f32.mxu0 %v2493_v19  ;;  %v2489_v31 = vld [vmem:[#allocation11 + $0x670] sm:$0xff]  ;;  %v2490_v32 = vld [vmem:[#allocation11 + $0x678] sm:$0xff]  ;;  %v6855_v33 = vpack.c.bf16 %v1329_v30, %v1328_v29  ;;  %v1299_v36 = vld [vmem:[#allocation11 + $0x8] sm:$0xff]  ;;  %v2591_v56 = vsel %vm1144_vm5, %v2589_v45, %v2590_v46 }
 0x2d7   : > { %7222 = vmatpush3.bf16.msra.mxu0 %v7219_v55  ;;  %6840 = vmatprep.subr.bf16.mxu1 %v6839_v60  ;;  %v7239_v34 = vpack.c.bf16 %v2490_v32, %v2489_v31  ;;  %v2573_v37 = vld [vmem:[#allocation11 + $0x680] sm:$0xff]  ;;  %v2574_v38 = vld [vmem:[#allocation11 + $0x688] sm:$0xff]  ;;  %v6859_v39 = vpack.c.bf16 %v1299_v36, %v1298_v35  ;;  %v1300_v41 = vld [vmem:[#allocation11 + $0x10] sm:$0xff]  ;;  %v8648_v55 = vsel %vm1702_vm8, %v1703_v48, %v1704_v49 }
 0x2d8   : > { %7224 = vmatprep.subr.bf16.mxu0 %v7223_v63  ;;  %v7243_v40 = vpack.c.bf16 %v2574_v38, %v2573_v37  ;;  %v1301_v42 = vld [vmem:[#allocation11 + $0x18] sm:$0xff]  ;;  %v2575_v43 = vld [vmem:[#allocation11 + $0x690] sm:$0xff]  ;;  %v1302_v51 = vld [vmem:[#allocation11 + $0x20] sm:$0xff] }
 0x2d9   : > { %v2576_v44 = vld [vmem:[#allocation11 + $0x698] sm:$0xff]  ;;  %v6863_v47 = vpack.c.bf16 %v1301_v42, %v1300_v41  ;;  %v1303_v52 = vld [vmem:[#allocation11 + $0x28] sm:$0xff]  ;;  %v2577_v53 = vld [vmem:[#allocation11 + $0x6a0] sm:$0xff]  ;;  %v1505_v41 = vrot.slane %v8611_v0, 2  ;;  %v1506_v42 = vrot.slane %v8614_v2, 2 }
 0x2da   : > { %6842 = vmatpush3.bf16.msra.mxu1 %v6839_v60  ;;  %v7247_v50 = vpack.c.bf16 %v2576_v44, %v2575_v43  ;;  %v2578_v54 = vld [vmem:[#allocation11 + $0x6a8] sm:$0xff]  ;;  %v6867_v57 = vpack.c.bf16 %v1303_v52, %v1302_v51  ;;  %v1304_v59 = vld [vmem:[#allocation11 + $0x30] sm:$0xff]  ;;  %v1305_v60 = vld [vmem:[#allocation11 + $0x38] sm:$0xff]  ;;  %v2687_v43 = vrot.slane %v8619_v7, 4  ;;  %v2688_v44 = vrot.slane %v8622_v8, 4 }
 0x2db   : > { %7226 = vmatpush3.bf16.msra.mxu0 %v7223_v63  ;;  %6844 = vmatprep.subr.bf16.mxu1 %v6843_v5  ;;  %v7251_v58 = vpack.c.bf16 %v2578_v54, %v2577_v53  ;;  %v2579_v61 = vld [vmem:[#allocation11 + $0x6b0] sm:$0xff]  ;;  %v2580_v62 = vld [vmem:[#allocation11 + $0x6b8] sm:$0xff]  ;;  %v6871_v63 = vpack.c.bf16 %v1305_v60, %v1304_v59  ;;  %v1306_v3 = vld [vmem:[#allocation11 + $0x40] sm:$0xff] }
 0x2dc   : > { %7228 = vmatprep.subr.bf16.mxu0 %v7227_v13  ;;  %v7255_v1 = vpack.c.bf16 %v2580_v62, %v2579_v61  ;;  %v1307_v4 = vld [vmem:[#allocation11 + $0x48] sm:$0xff]  ;;  %v1308_v11 = vld [vmem:[#allocation11 + $0x50] sm:$0xff]  ;;  %v2584_v15 = vld [vmem:[#allocation11 + $0x6d8] sm:$0xff]  ;;  %v2689_v7 = vsel %vm1702_vm8, %v2687_v43, %v2688_v44 }
 0x2dd   : > { %v6875_v9 = vpack.c.bf16 %v1307_v4, %v1306_v3  ;;  %v2583_v14 = vld [vmem:[#allocation11 + $0x6d0] sm:$0xff]  ;;  %v1310_v18 = vld [vmem:[#allocation11 + $0x60] sm:$0xff]  ;;  %v1311_v19 = vld [vmem:[#allocation11 + $0x68] sm:$0xff] }
 0x2de   : > { %6846 = vmatpush3.bf16.msra.mxu1 %v6843_v5  ;;  %v2581_v5 = vld [vmem:[#allocation11 + $0x6c0] sm:$0xff]  ;;  %v7263_v17 = vpack.c.bf16 %v2584_v15, %v2583_v14  ;;  %v6883_v23 = vpack.c.bf16 %v1311_v19, %v1310_v18  ;;  %v1312_v25 = vld [vmem:[#allocation11 + $0x70] sm:$0xff]  ;;  %v1313_v26 = vld [vmem:[#allocation11 + $0x78] sm:$0xff] }
 0x2df   : > { %7230 = vmatpush3.bf16.msra.mxu0 %v7227_v13  ;;  %6848 = vmatprep.subr.bf16.mxu1 %v6847_v20  ;;  %v1309_v13 = vld [vmem:[#allocation11 + $0x58] sm:$0xff]  ;;  %v6887_v29 = vpack.c.bf16 %v1313_v26, %v1312_v25  ;;  %v1488_v31 = vld [vmem:[#allocation11 + $0x100] sm:$0xff]  ;;  %v1489_v32 = vld [vmem:[#allocation11 + $0x108] sm:$0xff] }
 0x2e0   : > { %7232 = vmatprep.subr.bf16.mxu0 %v7231_v22  ;;  %v6879_v16 = vpack.c.bf16 %v1309_v13, %v1308_v11  ;;  %v6891_v35 = vpack.c.bf16 %v1489_v32, %v1488_v31  ;;  %v1490_v37 = vld [vmem:[#allocation11 + $0x110] sm:$0xff]  ;;  %v1491_v38 = vld [vmem:[#allocation11 + $0x118] sm:$0xff]  ;;  %v1492_v48 = vld [vmem:[#allocation11 + $0x120] sm:$0xff] }
 0x2e1   : > { %v6895_v45 = vpack.c.bf16 %v1491_v38, %v1490_v37  ;;  %v2675_v51 = vld [vmem:[#allocation11 + $0x720] sm:$0xff]  ;;  %v2676_v52 = vld [vmem:[#allocation11 + $0x728] sm:$0xff]  ;;  %v2678_v59 = vld [vmem:[#allocation11 + $0x738] sm:$0xff] }
 0x2e2   : > { %6850 = vmatpush3.bf16.msra.mxu1 %v6847_v20  ;;  %v2585_v20 = vld [vmem:[#allocation11 + $0x6e0] sm:$0xff]  ;;  %v7283_v54 = vpack.c.bf16 %v2676_v52, %v2675_v51  ;;  %v1497_v62 = vld [vmem:[#allocation11 + $0x148] sm:$0xff]  ;;  %v1594_v51 = vld [vmem:[#allocation11 + $0x1b8] sm:$0xff] }
 0x2e3   : > { %7234 = vmatpush3.bf16.msra.mxu0 %v7231_v22  ;;  %6852 = vmatprep.subr.bf16.mxu1 %v6851_v27  ;;  %v2586_v22 = vld [vmem:[#allocation11 + $0x6e8] sm:$0xff]  ;;  %v1496_v61 = vld [vmem:[#allocation11 + $0x140] sm:$0xff]  ;;  %v2780_v52 = vld [vmem:[#allocation11 + $0x7b0] sm:$0xff] }
 0x2e4   : > { %7236 = vmatprep.subr.bf16.mxu0 %v7235_v28  ;;  %v7267_v24 = vpack.c.bf16 %v2586_v22, %v2585_v20  ;;  %v6907_v3 = vpack.c.bf16 %v1497_v62, %v1496_v61  ;;  %v1500_v14 = vld [vmem:[#allocation11 + $0x160] sm:$0xff]  ;;  %v1501_v15 = vld [vmem:[#allocation11 + $0x168] sm:$0xff]  ;;  %v1502_v20 = vld [vmem:[#allocation11 + $0x170] sm:$0xff] }
 0x2e5   : > { %v6915_v18 = vpack.c.bf16 %v1501_v15, %v1500_v14  ;;  %v1503_v22 = vld [vmem:[#allocation11 + $0x178] sm:$0xff]  ;;  %v2779_v43 = vld [vmem:[#allocation11 + $0x7a8] sm:$0xff]  ;;  %v1599_v62 = vld [vmem:[#allocation11 + $0x1e0] sm:$0xff] }
 0x2e6   : > { %6854 = vmatpush3.bf16.msra.mxu1 %v6851_v27  ;;  %v2587_v27 = vld [vmem:[#allocation11 + $0x6f0] sm:$0xff]  ;;  %v6919_v25 = vpack.c.bf16 %v1503_v22, %v1502_v20  ;;  %v1686_v15 = vld [vmem:[#allocation11 + $0x200] sm:$0xff] }
 0x2e7   : > { %7238 = vmatpush3.bf16.msra.mxu0 %v7235_v28  ;;  %6856 = vmatprep.subr.bf16.mxu1 %v6855_v33  ;;  %v2588_v28 = vld [vmem:[#allocation11 + $0x6f8] sm:$0xff]  ;;  %v1688_v22 = vld [vmem:[#allocation11 + $0x210] sm:$0xff] }
 0x2e8   : > { %7240 = vmatprep.subr.bf16.mxu0 %v7239_v34  ;;  %v7271_v30 = vpack.c.bf16 %v2588_v28, %v2587_v27  ;;  %v1587_v27 = vld [vmem:[#allocation11 + $0x180] sm:$0xff]  ;;  %v1588_v28 = vld [vmem:[#allocation11 + $0x188] sm:$0xff] }
 0x2e9   : > { %v6923_v31 = vpack.c.bf16 %v1588_v28, %v1587_v27 }
 0x2ea   : > { %6858 = vmatpush3.bf16.msra.mxu1 %v6855_v33  ;;  %v2671_v33 = vld [vmem:[#allocation11 + $0x700] sm:$0xff] }
 0x2eb   : > { %7242 = vmatpush3.bf16.msra.mxu0 %v7239_v34  ;;  %6860 = vmatprep.subr.bf16.mxu1 %v6859_v39  ;;  %v2672_v34 = vld [vmem:[#allocation11 + $0x708] sm:$0xff] }
 0x2ec   : > { %7244 = vmatprep.subr.bf16.mxu0 %v7243_v40  ;;  %v7275_v36 = vpack.c.bf16 %v2672_v34, %v2671_v33  ;;  %v1589_v33 = vld [vmem:[#allocation11 + $0x190] sm:$0xff]  ;;  %v1590_v34 = vld [vmem:[#allocation11 + $0x198] sm:$0xff] }
 0x2ed   : > { %5666 = vmatmul.mubr.f32.vlgmr.msra.gmra.mrb[0].mxu1 %v1334_v6  ;;  %v2582_v6 = vld [vmem:[#allocation11 + $0x6c8] sm:$0xff]  ;;  %v6927_v37 = vpack.c.bf16 %v1590_v34, %v1589_v33  ;;  %v2871_v33 = vld [vmem:[#allocation11 + $0x820] sm:$0xff] }
 0x2ee   : > { %6862 = vmatpush3.bf16.msra.mxu1 %v6859_v39  ;;  %6086 = vmatmul.mubr.f32.vlgmr.msra.gmra.mrb[0].mxu0 %v2492_v10  ;;  %v7259_v10 = vpack.c.bf16 %v2582_v6, %v2581_v5  ;;  %v2673_v39 = vld [vmem:[#allocation11 + $0x710] sm:$0xff]  ;;  %v1499_v6 = vld [vmem:[#allocation11 + $0x158] sm:$0xff]  ;;  %v2872_v34 = vld [vmem:[#allocation11 + $0x828] sm:$0xff] }
 0x2ef   : > { %7246 = vmatpush3.bf16.msra.mxu0 %v7243_v40  ;;  %6864 = vmatprep.subr.bf16.mxu1 %v6863_v47  ;;  %v2674_v40 = vld [vmem:[#allocation11 + $0x718] sm:$0xff]  ;;  %v1498_v5 = vld [vmem:[#allocation11 + $0x150] sm:$0xff] }
 0x2f0   : > { %7248 = vmatprep.subr.bf16.mxu0 %v7247_v50  ;;  %5700 = vmatprep.mubr.f32.mxu1 %v8611_v0  ;;  %v1507_v0 = vsel %vm448_vm3, %v1505_v41, %v1506_v42  ;;  %v6911_v11 = vpack.c.bf16 %v1499_v6, %v1498_v5  ;;  %v2778_v41 = vld [vmem:[#allocation11 + $0x7a0] sm:$0xff]  ;;  %v1601_v6 = vld [vmem:[#allocation11 + $0x1f0] sm:$0xff] }
 0x2f1   : > { %6120 = vmatprep.mubr.f32.mxu0 %v2591_v56  ;;  %v1494_v56 = vld [vmem:[#allocation11 + $0x130] sm:$0xff] }
 0x2f2   : > { %6866 = vmatpush3.bf16.msra.mxu1 %v6863_v47  ;;  %v7279_v47 = vpack.c.bf16 %v2674_v40, %v2673_v39  ;;  %v1591_v39 = vld [vmem:[#allocation11 + $0x1a0] sm:$0xff]  ;;  %v1592_v40 = vld [vmem:[#allocation11 + $0x1a8] sm:$0xff] }
 0x2f3   : > { %7250 = vmatpush3.bf16.msra.mxu0 %v7247_v50  ;;  %6868 = vmatprep.subr.bf16.mxu1 %v6867_v57  ;;  %v1493_v50 = vld [vmem:[#allocation11 + $0x128] sm:$0xff] }
 0x2f4   : > { %7252 = vmatprep.subr.bf16.mxu0 %v7251_v58  ;;  %v6899_v53 = vpack.c.bf16 %v1493_v50, %v1492_v48  ;;  %v7315_v48 = vpack.c.bf16 %v2779_v43, %v2778_v41  ;;  %v1593_v50 = vld [vmem:[#allocation11 + $0x1b0] sm:$0xff] }
 0x2f5   : > { %v6935_v8 = vpack.c.bf16 %v1594_v51, %v1593_v50  ;;  %v2875_v50 = vld [vmem:[#allocation11 + $0x840] sm:$0xff]  ;;  %v2876_v51 = vld [vmem:[#allocation11 + $0x848] sm:$0xff] }
 0x2f6   : > { %6870 = vmatpush3.bf16.msra.mxu1 %v6867_v57  ;;  %v1495_v57 = vld [vmem:[#allocation11 + $0x138] sm:$0xff] }
 0x2f7   : > { %7254 = vmatpush3.bf16.msra.mxu0 %v7251_v58  ;;  %6872 = vmatprep.subr.bf16.mxu1 %v6871_v63  ;;  %v2677_v58 = vld [vmem:[#allocation11 + $0x730] sm:$0xff]  ;;  %v6903_v60 = vpack.c.bf16 %v1495_v57, %v1494_v56 }
 0x2f8   : > { %7256 = vmatprep.subr.bf16.mxu0 %v7255_v1  ;;  %v1597_v57 = vld [vmem:[#allocation11 + $0x1d0] sm:$0xff] }
 0x2fa   : > { %6874 = vmatpush3.bf16.msra.mxu1 %v6871_v63  ;;  %v2679_v63 = vld [vmem:[#allocation11 + $0x740] sm:$0xff] }
 0x2fb   : > { %7258 = vmatpush3.bf16.msra.mxu0 %v7255_v1  ;;  %6876 = vmatprep.subr.bf16.mxu1 %v6875_v9  ;;  %v2680_v1 = vld [vmem:[#allocation11 + $0x748] sm:$0xff] }
 0x2fc   : > { %7260 = vmatprep.subr.bf16.mxu0 %v7259_v10  ;;  %v7291_v4 = vpack.c.bf16 %v2680_v1, %v2679_v63  ;;  %v1600_v63 = vld [vmem:[#allocation11 + $0x1e8] sm:$0xff]  ;;  %v2786_v1 = vld [vmem:[#allocation11 + $0x7e0] sm:$0xff] }
 0x2fe   : > { %6878 = vmatpush3.bf16.msra.mxu1 %v6875_v9  ;;  %v2681_v9 = vld [vmem:[#allocation11 + $0x750] sm:$0xff] }
 0x2ff   : > { %7262 = vmatpush3.bf16.msra.mxu0 %v7259_v10  ;;  %6880 = vmatprep.subr.bf16.mxu1 %v6879_v16  ;;  %v2682_v10 = vld [vmem:[#allocation11 + $0x758] sm:$0xff] }
 0x300   : > { %7264 = vmatprep.subr.bf16.mxu0 %v7263_v17  ;;  %v7295_v13 = vpack.c.bf16 %v2682_v10, %v2681_v9  ;;  %v1602_v9 = vld [vmem:[#allocation11 + $0x1f8] sm:$0xff]  ;;  %v2788_v10 = vld [vmem:[#allocation11 + $0x7f0] sm:$0xff] }
 0x302   : > { %6882 = vmatpush3.bf16.msra.mxu1 %v6879_v16  ;;  %v2683_v16 = vld [vmem:[#allocation11 + $0x760] sm:$0xff] }
 0x303   : > { %7266 = vmatpush3.bf16.msra.mxu0 %v7263_v17  ;;  %6884 = vmatprep.subr.bf16.mxu1 %v6883_v23  ;;  %v2684_v17 = vld [vmem:[#allocation11 + $0x768] sm:$0xff] }
 0x304   : > { %7268 = vmatprep.subr.bf16.mxu0 %v7267_v24  ;;  %v7299_v19 = vpack.c.bf16 %v2684_v17, %v2683_v16  ;;  %v1687_v16 = vld [vmem:[#allocation11 + $0x208] sm:$0xff]  ;;  %v2867_v17 = vld [vmem:[#allocation11 + $0x800] sm:$0xff] }
 0x306   : > { %6886 = vmatpush3.bf16.msra.mxu1 %v6883_v23  ;;  %v2685_v23 = vld [vmem:[#allocation11 + $0x770] sm:$0xff] }
 0x307   : > { %7270 = vmatpush3.bf16.msra.mxu0 %v7267_v24  ;;  %6888 = vmatprep.subr.bf16.mxu1 %v6887_v29  ;;  %v2686_v24 = vld [vmem:[#allocation11 + $0x778] sm:$0xff] }
 0x308   : > { %7272 = vmatprep.subr.bf16.mxu0 %v7271_v30  ;;  %v7303_v26 = vpack.c.bf16 %v2686_v24, %v2685_v23  ;;  %v1689_v23 = vld [vmem:[#allocation11 + $0x218] sm:$0xff] }
 0x309   : > { %v8679_v24 = vld [vmem:[%s8608_s9 + $0x38] sm:$0xff] }
 0x30a   : > { %6890 = vmatpush3.bf16.msra.mxu1 %v6887_v29  ;;  %v2774_v29 = vld [vmem:[#allocation11 + $0x780] sm:$0xff]  ;;  %v2886_v28 = vrot.slane %v8679_v24, 1 }
 0x30b   : > { %7274 = vmatpush3.bf16.msra.mxu0 %v7271_v30  ;;  %6892 = vmatprep.subr.bf16.mxu1 %v6891_v35  ;;  %v2775_v30 = vld [vmem:[#allocation11 + $0x788] sm:$0xff] }
 0x30c   : > { %7276 = vmatprep.subr.bf16.mxu0 %v7275_v36  ;;  %v7307_v32 = vpack.c.bf16 %v2775_v30, %v2774_v29  ;;  %v6959_v29 = vpack.c.bf16 %v1689_v23, %v1688_v22  ;;  %v1795_v22 = vld [vmem:[#allocation11 + $0x2a8] sm:$0xff]  ;;  %v2971_v23 = vld [vmem:[#allocation11 + $0x8a0] sm:$0xff] }
 0x30d   : > { %5701 = vmatmul.mubr.f32.vlgmr.msra.gmra.mrb[0].mxu1 %v8614_v2  ;;  %v1797_v2 = vld [vmem:[#allocation11 + $0x2b8] sm:$0xff] }
 0x30e   : > { %6894 = vmatpush3.bf16.msra.mxu1 %v6891_v35  ;;  %6121 = vmatmul.mubr.f32.vlgmr.msra.gmra.mrb[0].mxu0 %v2590_v46  ;;  %v7287_v46 = vpack.c.bf16 %v2678_v59, %v2677_v58  ;;  %v2776_v35 = vld [vmem:[#allocation11 + $0x790] sm:$0xff]  ;;  %v1598_v58 = vld [vmem:[#allocation11 + $0x1d8] sm:$0xff] }
 0x30f   : > { %7278 = vmatpush3.bf16.msra.mxu0 %v7275_v36  ;;  %6896 = vmatprep.subr.bf16.mxu1 %v6895_v45  ;;  %v2777_v36 = vld [vmem:[#allocation11 + $0x798] sm:$0xff]  ;;  %v2784_v59 = vld [vmem:[#allocation11 + $0x7d0] sm:$0xff] }
 0x310   : > { %7280 = vmatprep.subr.bf16.mxu0 %v7279_v47  ;;  %5735 = vmatprep.mubr.f32.mxu1 %v1507_v0  ;;  %v7311_v38 = vpack.c.bf16 %v2777_v36, %v2776_v35  ;;  %v2781_v0 = vld [vmem:[#allocation11 + $0x7b8] sm:$0xff] }
 0x311   : > { %6155 = vmatprep.mubr.f32.mxu0 %v2689_v7  ;;  %v1596_v7 = vld [vmem:[#allocation11 + $0x1c8] sm:$0xff] }
 0x312   : > { %6898 = vmatpush3.bf16.msra.mxu1 %v6895_v45  ;;  %v8674_v45 = vld [vmem:[%s8608_s9 + $0x30] sm:$0xff] }
 0x313   : > { %7282 = vmatpush3.bf16.msra.mxu0 %v7279_v47  ;;  %6900 = vmatprep.subr.bf16.mxu1 %v6899_v53  ;;  %v6931_v47 = vpack.c.bf16 %v1592_v40, %v1591_v39  ;;  %v2885_v27 = vrot.slane %v8674_v45, 1  ;;  %v1693_v39 = vld [vmem:[#allocation11 + $0x238] sm:$0xff]  ;;  %v2873_v40 = vld [vmem:[#allocation11 + $0x830] sm:$0xff] }
 0x314   : > { %7284 = vmatprep.subr.bf16.mxu0 %v7283_v54 }
 0x315   : > { %v2887_v35 = vsel %vm268_vm1, %v2885_v27, %v2886_v28 }
 0x316   : > { %6902 = vmatpush3.bf16.msra.mxu1 %v6899_v53  ;;  %v2782_v53 = vld [vmem:[#allocation11 + $0x7c0] sm:$0xff] }
 0x317   : > { %7286 = vmatpush3.bf16.msra.mxu0 %v7283_v54  ;;  %6904 = vmatprep.subr.bf16.mxu1 %v6903_v60  ;;  %v2783_v54 = vld [vmem:[#allocation11 + $0x7c8] sm:$0xff] }
 0x318   : > { %7288 = vmatprep.subr.bf16.mxu0 %v7287_v46 }
 0x31a   : > { %6906 = vmatpush3.bf16.msra.mxu1 %v6903_v60  ;;  %v2785_v60 = vld [vmem:[#allocation11 + $0x7d8] sm:$0xff] }
 0x31b   : > { %7290 = vmatpush3.bf16.msra.mxu0 %v7287_v46  ;;  %6908 = vmatprep.subr.bf16.mxu1 %v6907_v3  ;;  %v6943_v46 = vpack.c.bf16 %v1598_v58, %v1597_v57  ;;  %v7327_v61 = vpack.c.bf16 %v2785_v60, %v2784_v59  ;;  %v2880_v57 = vld [vmem:[#allocation11 + $0x868] sm:$0xff]  ;;  %v1700_v60 = vld [vmem:[#allocation11 + $0x270] sm:$0xff] }
 0x31c   : > { %7292 = vmatprep.subr.bf16.mxu0 %v7291_v4 }
 0x31e   : > { %6910 = vmatpush3.bf16.msra.mxu1 %v6907_v3  ;;  %v2787_v3 = vld [vmem:[#allocation11 + $0x7e8] sm:$0xff] }
 0x31f   : > { %7294 = vmatpush3.bf16.msra.mxu0 %v7291_v4  ;;  %6912 = vmatprep.subr.bf16.mxu1 %v6911_v11  ;;  %v6947_v4 = vpack.c.bf16 %v1600_v63, %v1599_v62  ;;  %v7331_v5 = vpack.c.bf16 %v2787_v3, %v2786_v1  ;;  %v2882_v62 = vld [vmem:[#allocation11 + $0x878] sm:$0xff]  ;;  %v1790_v3 = vld [vmem:[#allocation11 + $0x280] sm:$0xff] }
 0x320   : > { %7296 = vmatprep.subr.bf16.mxu0 %v7295_v13 }
 0x322   : > { %6914 = vmatpush3.bf16.msra.mxu1 %v6911_v11  ;;  %v2789_v11 = vld [vmem:[#allocation11 + $0x7f8] sm:$0xff] }
 0x323   : > { %7298 = vmatpush3.bf16.msra.mxu0 %v7295_v13  ;;  %6916 = vmatprep.subr.bf16.mxu1 %v6915_v18  ;;  %v6951_v13 = vpack.c.bf16 %v1602_v9, %v1601_v6  ;;  %v7335_v14 = vpack.c.bf16 %v2789_v11, %v2788_v10  ;;  %v2968_v6 = vld [vmem:[#allocation11 + $0x888] sm:$0xff]  ;;  %v1792_v11 = vld [vmem:[#allocation11 + $0x290] sm:$0xff] }
 0x324   : > { %7300 = vmatprep.subr.bf16.mxu0 %v7299_v19 }
 0x326   : > { %6918 = vmatpush3.bf16.msra.mxu1 %v6915_v18  ;;  %v2868_v18 = vld [vmem:[#allocation11 + $0x808] sm:$0xff] }
 0x327   : > { %7302 = vmatpush3.bf16.msra.mxu0 %v7299_v19  ;;  %6920 = vmatprep.subr.bf16.mxu1 %v6919_v25  ;;  %v6955_v19 = vpack.c.bf16 %v1687_v16, %v1686_v15  ;;  %v7339_v20 = vpack.c.bf16 %v2868_v18, %v2867_v17  ;;  %v2970_v15 = vld [vmem:[#allocation11 + $0x898] sm:$0xff]  ;;  %v2983_v16 = vrot.slane %v8674_v45, 2  ;;  %v2984_v17 = vrot.slane %v8679_v24, 2 }
 0x328   : > { %7304 = vmatprep.subr.bf16.mxu0 %v7303_v26 }
 0x329   : > { %v2985_v27 = vsel %vm448_vm3, %v2983_v16, %v2984_v17  ;;  %v3070_v16 = vld [vmem:[#allocation11 + $0x928] sm:$0xff] }
 0x32a   : > { %6922 = vmatpush3.bf16.msra.mxu1 %v6919_v25  ;;  %v2869_v25 = vld [vmem:[#allocation11 + $0x810] sm:$0xff] }
 0x32b   : > { %7306 = vmatpush3.bf16.msra.mxu0 %v7303_v26  ;;  %6924 = vmatprep.subr.bf16.mxu1 %v6923_v31  ;;  %v2870_v26 = vld [vmem:[#allocation11 + $0x818] sm:$0xff] }
 0x32c   : > { %7308 = vmatprep.subr.bf16.mxu0 %v7307_v32  ;;  %v7343_v30 = vpack.c.bf16 %v2870_v26, %v2869_v25  ;;  %v2972_v25 = vld [vmem:[#allocation11 + $0x8a8] sm:$0xff]  ;;  %v8695_v26 = vld [vmem:[%s8608_s9 + $0x10] sm:$0xff] }
 0x32d   : > { %5736 = vmatmul.mubr.f32.vlgmr.msra.gmra.mrb[0].mxu1 %v1506_v42  ;;  %v7319_v42 = vpack.c.bf16 %v2781_v0, %v2780_v52  ;;  %v7355_v0 = vpack.c.bf16 %v2876_v51, %v2875_v50  ;;  %v1802_v50 = vld [vmem:[#allocation11 + $0x2e0] sm:$0xff]  ;;  %v1803_v51 = vld [vmem:[#allocation11 + $0x2e8] sm:$0xff] }
 0x32e   : > { %6926 = vmatpush3.bf16.msra.mxu1 %v6923_v31  ;;  %6156 = vmatmul.mubr.f32.vlgmr.msra.gmra.mrb[0].mxu0 %v2688_v44  ;;  %v1595_v44 = vld [vmem:[#allocation11 + $0x1c0] sm:$0xff] }
 0x32f   : > { %7310 = vmatpush3.bf16.msra.mxu0 %v7307_v32  ;;  %6928 = vmatprep.subr.bf16.mxu1 %v6927_v37  ;;  %v6939_v56 = vpack.c.bf16 %v1596_v7, %v1595_v44  ;;  %v1690_v31 = vld [vmem:[#allocation11 + $0x220] sm:$0xff]  ;;  %v1691_v32 = vld [vmem:[#allocation11 + $0x228] sm:$0xff]  ;;  %v2878_v44 = vld [vmem:[#allocation11 + $0x858] sm:$0xff] }
 0x330   : > { %7312 = vmatprep.subr.bf16.mxu0 %v7311_v38  ;;  %5770 = vmatprep.mubr.f32.mxu1 %v8637_v21  ;;  %v7323_v21 = vpack.c.bf16 %v2783_v54, %v2782_v53  ;;  %v6963_v36 = vpack.c.bf16 %v1691_v32, %v1690_v31  ;;  %v1698_v54 = vld [vmem:[#allocation11 + $0x260] sm:$0xff]  ;;  %v1796_v31 = vld [vmem:[#allocation11 + $0x2b0] sm:$0xff]  ;;  %v2974_v32 = vld [vmem:[#allocation11 + $0x8b8] sm:$0xff] }
 0x331   : > { %6190 = vmatprep.mubr.f32.mxu0 %v8674_v45 }
 0x332   : > { %6930 = vmatpush3.bf16.msra.mxu1 %v6927_v37  ;;  %v7347_v37 = vpack.c.bf16 %v2872_v34, %v2871_v33  ;;  %v1798_v34 = vld [vmem:[#allocation11 + $0x2c0] sm:$0xff] }
 0x333   : > { %7314 = vmatpush3.bf16.msra.mxu0 %v7311_v38  ;;  %6932 = vmatprep.subr.bf16.mxu1 %v6931_v47  ;;  %v1692_v38 = vld [vmem:[#allocation11 + $0x230] sm:$0xff] }
 0x334   : > { %7316 = vmatprep.subr.bf16.mxu0 %v7315_v48  ;;  %v6967_v41 = vpack.c.bf16 %v1693_v39, %v1692_v38 }
 0x336   : > { %6934 = vmatpush3.bf16.msra.mxu1 %v6931_v47  ;;  %v1694_v47 = vld [vmem:[#allocation11 + $0x240] sm:$0xff] }
 0x337   : > { %7318 = vmatpush3.bf16.msra.mxu0 %v7315_v48  ;;  %6936 = vmatprep.subr.bf16.mxu1 %v6935_v8  ;;  %v1695_v48 = vld [vmem:[#allocation11 + $0x248] sm:$0xff] }
 0x338   : > { %7320 = vmatprep.subr.bf16.mxu0 %v7319_v42  ;;  %v6971_v52 = vpack.c.bf16 %v1695_v48, %v1694_v47 }
 0x33a   : > { %6938 = vmatpush3.bf16.msra.mxu1 %v6935_v8  ;;  %v1697_v8 = vld [vmem:[#allocation11 + $0x258] sm:$0xff] }
 0x33b   : > { %7322 = vmatpush3.bf16.msra.mxu0 %v7319_v42  ;;  %6940 = vmatprep.subr.bf16.mxu1 %v6939_v56  ;;  %v2877_v42 = vld [vmem:[#allocation11 + $0x850] sm:$0xff] }
 0x33c   : > { %7324 = vmatprep.subr.bf16.mxu0 %v7323_v21  ;;  %v7359_v53 = vpack.c.bf16 %v2878_v44, %v2877_v42  ;;  %v1804_v42 = vld [vmem:[#allocation11 + $0x2f0] sm:$0xff]  ;;  %v1805_v44 = vld [vmem:[#allocation11 + $0x2f8] sm:$0xff] }
 0x33e   : > { %6942 = vmatpush3.bf16.msra.mxu1 %v6939_v56  ;;  %v1699_v56 = vld [vmem:[#allocation11 + $0x268] sm:$0xff] }
 0x33f   : > { %7326 = vmatpush3.bf16.msra.mxu0 %v7323_v21  ;;  %6944 = vmatprep.subr.bf16.mxu1 %v6943_v46  ;;  %v2879_v21 = vld [vmem:[#allocation11 + $0x860] sm:$0xff]  ;;  %v6979_v58 = vpack.c.bf16 %v1699_v56, %v1698_v54  ;;  %v7015_v54 = vpack.c.bf16 %v1805_v44, %v1804_v42  ;;  %v1984_v44 = vld [vmem:[#allocation11 + $0x388] sm:$0xff] }
 0x340   : > { %7328 = vmatprep.subr.bf16.mxu0 %v7327_v61  ;;  %v7363_v59 = vpack.c.bf16 %v2880_v57, %v2879_v21  ;;  %v1883_v21 = vld [vmem:[#allocation11 + $0x300] sm:$0xff]  ;;  %v1884_v57 = vld [vmem:[#allocation11 + $0x308] sm:$0xff] }
 0x341   : > { %v1983_v42 = vld [vmem:[#allocation11 + $0x380] sm:$0xff] }
 0x342   : > { %6946 = vmatpush3.bf16.msra.mxu1 %v6943_v46  ;;  %v1701_v46 = vld [vmem:[#allocation11 + $0x278] sm:$0xff] }
 0x343   : > { %7330 = vmatpush3.bf16.msra.mxu0 %v7327_v61  ;;  %6948 = vmatprep.subr.bf16.mxu1 %v6947_v4  ;;  %v2881_v61 = vld [vmem:[#allocation11 + $0x870] sm:$0xff]  ;;  %v6983_v63 = vpack.c.bf16 %v1701_v46, %v1700_v60  ;;  %v7019_v60 = vpack.c.bf16 %v1884_v57, %v1883_v21  ;;  %v1986_v57 = vld [vmem:[#allocation11 + $0x398] sm:$0xff] }
 0x344   : > { %7332 = vmatprep.subr.bf16.mxu0 %v7331_v5  ;;  %v7367_v1 = vpack.c.bf16 %v2882_v62, %v2881_v61  ;;  %v8704_v61 = vld [vmem:[%s8608_s9 + $0x18] sm:$0xff]  ;;  %v1885_v62 = vld [vmem:[#allocation11 + $0x310] sm:$0xff] }
 0x345   : > { %v1985_v21 = vld [vmem:[#allocation11 + $0x390] sm:$0xff] }
 0x346   : > { %6950 = vmatpush3.bf16.msra.mxu1 %v6947_v4  ;;  %v1791_v4 = vld [vmem:[#allocation11 + $0x288] sm:$0xff] }
 0x347   : > { %7334 = vmatpush3.bf16.msra.mxu0 %v7331_v5  ;;  %6952 = vmatprep.subr.bf16.mxu1 %v6951_v13  ;;  %v2967_v5 = vld [vmem:[#allocation11 + $0x880] sm:$0xff]  ;;  %v6987_v9 = vpack.c.bf16 %v1791_v4, %v1790_v3  ;;  %v3068_v3 = vld [vmem:[#allocation11 + $0x918] sm:$0xff]  ;;  %v1901_v4 = vrot.slane %v8695_v26, 1 }
 0x348   : > { %7336 = vmatprep.subr.bf16.mxu0 %v7335_v14  ;;  %v7371_v10 = vpack.c.bf16 %v2968_v6, %v2967_v5  ;;  %v1902_v5 = vrot.slane %v8704_v61, 1  ;;  %v3081_v6 = vrot.slane %v8674_v45, 3 }
 0x34a   : > { %6954 = vmatpush3.bf16.msra.mxu1 %v6951_v13  ;;  %v1793_v13 = vld [vmem:[#allocation11 + $0x298] sm:$0xff] }
 0x34b   : > { %7338 = vmatpush3.bf16.msra.mxu0 %v7335_v14  ;;  %6956 = vmatprep.subr.bf16.mxu1 %v6955_v19  ;;  %v2969_v14 = vld [vmem:[#allocation11 + $0x890] sm:$0xff]  ;;  %v6991_v18 = vpack.c.bf16 %v1793_v13, %v1792_v11  ;;  %v1887_v13 = vld [vmem:[#allocation11 + $0x320] sm:$0xff] }
 0x34c   : > { %7340 = vmatprep.subr.bf16.mxu0 %v7339_v20 }
 0x34d   : > { %5771 = vmatmul.mubr.f32.vlgmr.msra.gmra.mrb[0].mxu1 %v1605_v12  ;;  %v2874_v12 = vld [vmem:[#allocation11 + $0x838] sm:$0xff] }
 0x34e   : > { %6958 = vmatpush3.bf16.msra.mxu1 %v6955_v19  ;;  %6191 = vmatmul.mubr.f32.vlgmr.msra.gmra.mrb[0].mxu0 %v8679_v24  ;;  %v7351_v43 = vpack.c.bf16 %v2874_v12, %v2873_v40  ;;  %v7375_v19 = vpack.c.bf16 %v2970_v15, %v2969_v14  ;;  %v1800_v40 = vld [vmem:[#allocation11 + $0x2d0] sm:$0xff]  ;;  %v1801_v12 = vld [vmem:[#allocation11 + $0x2d8] sm:$0xff]  ;;  %v1888_v14 = vld [vmem:[#allocation11 + $0x328] sm:$0xff] }
 0x34f   : > { %7342 = vmatpush3.bf16.msra.mxu0 %v7339_v20  ;;  %6960 = vmatprep.subr.bf16.mxu1 %v6959_v29  ;;  %v1794_v20 = vld [vmem:[#allocation11 + $0x2a0] sm:$0xff]  ;;  %v7007_v47 = vpack.c.bf16 %v1801_v12, %v1800_v40  ;;  %v1896_v12 = vld [vmem:[#allocation11 + $0x368] sm:$0xff] }
 0x350   : > { %7344 = vmatprep.subr.bf16.mxu0 %v7343_v30  ;;  %5805 = vmatprep.mubr.f32.mxu1 %v8648_v55  ;;  %v1696_v55 = vld [vmem:[#allocation11 + $0x250] sm:$0xff]  ;;  %v3069_v15 = vld [vmem:[#allocation11 + $0x920] sm:$0xff] }
 0x351   : > { %6225 = vmatprep.mubr.f32.mxu0 %v2887_v35  ;;  %v6975_v7 = vpack.c.bf16 %v1697_v8, %v1696_v55  ;;  %v1799_v35 = vld [vmem:[#allocation11 + $0x2c8] sm:$0xff]  ;;  %v7011_v55 = vpack.c.bf16 %v1803_v51, %v1802_v50  ;;  %v1895_v40 = vld [vmem:[#allocation11 + $0x360] sm:$0xff]  ;;  %v1897_v50 = vld [vmem:[#allocation11 + $0x370] sm:$0xff] }
 0x352   : > { %6962 = vmatpush3.bf16.msra.mxu1 %v6959_v29  ;;  %v6995_v29 = vpack.c.bf16 %v1795_v22, %v1794_v20  ;;  %v7003_v38 = vpack.c.bf16 %v1799_v35, %v1798_v34  ;;  %v7027_v20 = vpack.c.bf16 %v1888_v14, %v1887_v13  ;;  %v7411_v22 = vpack.c.bf16 %v3070_v16, %v3069_v15  ;;  %v1893_v34 = vld [vmem:[#allocation11 + $0x350] sm:$0xff]  ;;  %v1894_v35 = vld [vmem:[#allocation11 + $0x358] sm:$0xff] }
 0x353   : > { %7346 = vmatpush3.bf16.msra.mxu0 %v7343_v30  ;;  %6964 = vmatprep.subr.bf16.mxu1 %v6963_v36  ;;  %v7379_v30 = vpack.c.bf16 %v2972_v25, %v2971_v23  ;;  %v1889_v23 = vld [vmem:[#allocation11 + $0x330] sm:$0xff]  ;;  %v1890_v25 = vld [vmem:[#allocation11 + $0x338] sm:$0xff] }
 0x354   : > { %7348 = vmatprep.subr.bf16.mxu0 %v7347_v37  ;;  %v1898_v51 = vld [vmem:[#allocation11 + $0x378] sm:$0xff] }
 0x355   : > { %v1990_v16 = vld [vmem:[#allocation11 + $0x3b8] sm:$0xff] }
 0x356   : > { %6966 = vmatpush3.bf16.msra.mxu1 %v6963_v36  ;;  %v2975_v36 = vld [vmem:[#allocation11 + $0x8c0] sm:$0xff] }
 0x357   : > { %7350 = vmatpush3.bf16.msra.mxu0 %v7347_v37  ;;  %6968 = vmatprep.subr.bf16.mxu1 %v6967_v41  ;;  %v2976_v37 = vld [vmem:[#allocation11 + $0x8c8] sm:$0xff] }
 0x358   : > { %7352 = vmatprep.subr.bf16.mxu0 %v7351_v43  ;;  %v7387_v39 = vpack.c.bf16 %v2976_v37, %v2975_v36  ;;  %v3075_v36 = vld [vmem:[#allocation11 + $0x950] sm:$0xff]  ;;  %v3076_v37 = vld [vmem:[#allocation11 + $0x958] sm:$0xff] }
 0x35a   : > { %6970 = vmatpush3.bf16.msra.mxu1 %v6967_v41  ;;  %v2977_v41 = vld [vmem:[#allocation11 + $0x8d0] sm:$0xff] }
 0x35b   : > { %7354 = vmatpush3.bf16.msra.mxu0 %v7351_v43  ;;  %6972 = vmatprep.subr.bf16.mxu1 %v6971_v52  ;;  %v2978_v43 = vld [vmem:[#allocation11 + $0x8d8] sm:$0xff] }
 0x35c   : > { %7356 = vmatprep.subr.bf16.mxu0 %v7355_v0  ;;  %v7391_v48 = vpack.c.bf16 %v2978_v43, %v2977_v41  ;;  %v3077_v41 = vld [vmem:[#allocation11 + $0x960] sm:$0xff]  ;;  %v3078_v43 = vld [vmem:[#allocation11 + $0x968] sm:$0xff] }
 0x35e   : > { %6974 = vmatpush3.bf16.msra.mxu1 %v6971_v52  ;;  %v2979_v52 = vld [vmem:[#allocation11 + $0x8e0] sm:$0xff] }
 0x35f   : > { %7358 = vmatpush3.bf16.msra.mxu0 %v7355_v0  ;;  %6976 = vmatprep.subr.bf16.mxu1 %v6975_v7  ;;  %v2980_v0 = vld [vmem:[#allocation11 + $0x8e8] sm:$0xff] }
 0x360   : > { %7360 = vmatprep.subr.bf16.mxu0 %v7359_v53  ;;  %v7395_v8 = vpack.c.bf16 %v2980_v0, %v2979_v52  ;;  %v3079_v52 = vld [vmem:[#allocation11 + $0x970] sm:$0xff]  ;;  %v3080_v0 = vld [vmem:[#allocation11 + $0x978] sm:$0xff] }
 0x362   : > { %6978 = vmatpush3.bf16.msra.mxu1 %v6975_v7  ;;  %v2981_v7 = vld [vmem:[#allocation11 + $0x8f0] sm:$0xff] }
 0x363   : > { %7362 = vmatpush3.bf16.msra.mxu0 %v7359_v53  ;;  %6980 = vmatprep.subr.bf16.mxu1 %v6979_v58  ;;  %v2982_v53 = vld [vmem:[#allocation11 + $0x8f8] sm:$0xff] }
 0x364   : > { %7364 = vmatprep.subr.bf16.mxu0 %v7363_v59  ;;  %v7399_v56 = vpack.c.bf16 %v2982_v53, %v2981_v7  ;;  %v3163_v7 = vld [vmem:[#allocation11 + $0x980] sm:$0xff]  ;;  %v3164_v53 = vld [vmem:[#allocation11 + $0x988] sm:$0xff] }
 0x366   : > { %6982 = vmatpush3.bf16.msra.mxu1 %v6979_v58  ;;  %v3065_v58 = vld [vmem:[#allocation11 + $0x900] sm:$0xff] }
 0x367   : > { %7366 = vmatpush3.bf16.msra.mxu0 %v7363_v59  ;;  %6984 = vmatprep.subr.bf16.mxu1 %v6983_v63  ;;  %v3066_v59 = vld [vmem:[#allocation11 + $0x908] sm:$0xff] }
 0x368   : > { %7368 = vmatprep.subr.bf16.mxu0 %v7367_v1  ;;  %v7403_v46 = vpack.c.bf16 %v3066_v59, %v3065_v58  ;;  %v3165_v58 = vld [vmem:[#allocation11 + $0x990] sm:$0xff]  ;;  %v3166_v59 = vld [vmem:[#allocation11 + $0x998] sm:$0xff] }
 0x36a   : > { %6986 = vmatpush3.bf16.msra.mxu1 %v6983_v63  ;;  %v1886_v63 = vld [vmem:[#allocation11 + $0x318] sm:$0xff] }
 0x36b   : > { %7370 = vmatpush3.bf16.msra.mxu0 %v7367_v1  ;;  %6988 = vmatprep.subr.bf16.mxu1 %v6987_v9  ;;  %v3067_v1 = vld [vmem:[#allocation11 + $0x910] sm:$0xff] }
 0x36c   : > { %7372 = vmatprep.subr.bf16.mxu0 %v7371_v10  ;;  %v7407_v11 = vpack.c.bf16 %v3068_v3, %v3067_v1  ;;  %v7055_v1 = vpack.c.bf16 %v1986_v57, %v1985_v21  ;;  %v7439_v3 = vpack.c.bf16 %v3166_v59, %v3165_v58  ;;  %v2085_v57 = vld [vmem:[#allocation11 + $0x420] sm:$0xff]  ;;  %v2086_v58 = vld [vmem:[#allocation11 + $0x428] sm:$0xff] }
 0x36d   : > { %5806 = vmatmul.mubr.f32.vlgmr.msra.gmra.mrb[0].mxu1 %v1704_v49  ;;  %v2973_v49 = vld [vmem:[#allocation11 + $0x8b0] sm:$0xff]  ;;  %v3270_v59 = vld [vmem:[#allocation11 + $0xa20] sm:$0xff] }
 0x36e   : > { %6990 = vmatpush3.bf16.msra.mxu1 %v6987_v9  ;;  %6226 = vmatmul.mubr.f32.vlgmr.msra.gmra.mrb[0].mxu0 %v2886_v28  ;;  %v6999_v28 = vpack.c.bf16 %v1797_v2, %v1796_v31  ;;  %v7383_v33 = vpack.c.bf16 %v2974_v32, %v2973_v49  ;;  %v3082_v9 = vrot.slane %v8679_v24, 3  ;;  %v1891_v31 = vld [vmem:[#allocation11 + $0x340] sm:$0xff]  ;;  %v1892_v2 = vld [vmem:[#allocation11 + $0x348] sm:$0xff] }
 0x36f   : > { %7374 = vmatpush3.bf16.msra.mxu0 %v7371_v10  ;;  %6992 = vmatprep.subr.bf16.mxu1 %v6991_v18  ;;  %v7023_v10 = vpack.c.bf16 %v1886_v63, %v1885_v62  ;;  %v3073_v49 = vld [vmem:[#allocation11 + $0x940] sm:$0xff]  ;;  %v3074_v32 = vld [vmem:[#allocation11 + $0x948] sm:$0xff]  ;;  %v3179_v62 = vrot.slane %v8674_v45, 4  ;;  %v3180_v63 = vrot.slane %v8679_v24, 4 }
 0x370   : > { %7376 = vmatprep.subr.bf16.mxu0 %v7375_v19  ;;  %5840 = vmatprep.mubr.f32.mxu1 %v8695_v26 }
 0x371   : > { %6260 = vmatprep.mubr.f32.mxu0 %v2985_v27  ;;  %v3071_v27 = vld [vmem:[#allocation11 + $0x930] sm:$0xff]  ;;  %v3181_v45 = vsel %vm1702_vm8, %v3179_v62, %v3180_v63 }
 0x372   : > { %6994 = vmatpush3.bf16.msra.mxu1 %v6991_v18  ;;  %v1903_v18 = vsel %vm268_vm1, %v1901_v4, %v1902_v5  ;;  %v1987_v4 = vld [vmem:[#allocation11 + $0x3a0] sm:$0xff] }
 0x373   : > { %7378 = vmatpush3.bf16.msra.mxu0 %v7375_v19  ;;  %6996 = vmatprep.subr.bf16.mxu1 %v6995_v29  ;;  %v3083_v19 = vsel %vm1144_vm5, %v3081_v6, %v3082_v9  ;;  %v1988_v6 = vld [vmem:[#allocation11 + $0x3a8] sm:$0xff] }
 0x374   : > { %7380 = vmatprep.subr.bf16.mxu0 %v7379_v30  ;;  %v7059_v14 = vpack.c.bf16 %v1988_v6, %v1987_v4  ;;  %v2087_v6 = vld [vmem:[#allocation11 + $0x430] sm:$0xff] }
 0x376   : > { %6998 = vmatpush3.bf16.msra.mxu1 %v6995_v29  ;;  %v3072_v29 = vld [vmem:[#allocation11 + $0x938] sm:$0xff] }
 0x377   : > { %7382 = vmatpush3.bf16.msra.mxu0 %v7379_v30  ;;  %7000 = vmatprep.subr.bf16.mxu1 %v6999_v28  ;;  %v7031_v30 = vpack.c.bf16 %v1890_v25, %v1889_v23  ;;  %v1992_v23 = vld [vmem:[#allocation11 + $0x3c8] sm:$0xff]  ;;  %v3171_v25 = vld [vmem:[#allocation11 + $0x9c0] sm:$0xff] }
 0x378   : > { %7384 = vmatprep.subr.bf16.mxu0 %v7383_v33 }
 0x37a   : > { %7002 = vmatpush3.bf16.msra.mxu1 %v6999_v28  ;;  %v7035_v28 = vpack.c.bf16 %v1892_v2, %v1891_v31  ;;  %v1994_v31 = vld [vmem:[#allocation11 + $0x3d8] sm:$0xff]  ;;  %v3173_v2 = vld [vmem:[#allocation11 + $0x9d0] sm:$0xff] }
 0x37b   : > { %7386 = vmatpush3.bf16.msra.mxu0 %v7383_v33  ;;  %7004 = vmatprep.subr.bf16.mxu1 %v7003_v38  ;;  %v7419_v33 = vpack.c.bf16 %v3074_v32, %v3073_v49  ;;  %v3174_v49 = vld [vmem:[#allocation11 + $0x9d8] sm:$0xff] }
 0x37c   : > { %7388 = vmatprep.subr.bf16.mxu0 %v7387_v39 }
 0x37e   : > { %7006 = vmatpush3.bf16.msra.mxu1 %v7003_v38  ;;  %v7039_v38 = vpack.c.bf16 %v1894_v35, %v1893_v34  ;;  %v1996_v34 = vld [vmem:[#allocation11 + $0x3e8] sm:$0xff]  ;;  %v3175_v35 = vld [vmem:[#allocation11 + $0x9e0] sm:$0xff] }
 0x37f   : > { %7390 = vmatpush3.bf16.msra.mxu0 %v7387_v39  ;;  %7008 = vmatprep.subr.bf16.mxu1 %v7007_v47  ;;  %v7423_v39 = vpack.c.bf16 %v3076_v37, %v3075_v36  ;;  %v3176_v36 = vld [vmem:[#allocation11 + $0x9e8] sm:$0xff] }
 0x380   : > { %7392 = vmatprep.subr.bf16.mxu0 %v7391_v48 }
 0x382   : > { %7010 = vmatpush3.bf16.msra.mxu1 %v7007_v47  ;;  %v7043_v47 = vpack.c.bf16 %v1896_v12, %v1895_v40  ;;  %v1998_v40 = vld [vmem:[#allocation11 + $0x3f8] sm:$0xff]  ;;  %v3177_v12 = vld [vmem:[#allocation11 + $0x9f0] sm:$0xff] }
 0x383   : > { %7394 = vmatpush3.bf16.msra.mxu0 %v7391_v48  ;;  %7012 = vmatprep.subr.bf16.mxu1 %v7011_v55  ;;  %v7427_v48 = vpack.c.bf16 %v3078_v43, %v3077_v41  ;;  %v3178_v41 = vld [vmem:[#allocation11 + $0x9f8] sm:$0xff] }
 0x384   : > { %7396 = vmatprep.subr.bf16.mxu0 %v7395_v8 }
 0x386   : > { %7014 = vmatpush3.bf16.msra.mxu1 %v7011_v55  ;;  %v7047_v55 = vpack.c.bf16 %v1898_v51, %v1897_v50  ;;  %v2082_v50 = vld [vmem:[#allocation11 + $0x408] sm:$0xff]  ;;  %v3266_v51 = vld [vmem:[#allocation11 + $0xa00] sm:$0xff] }
 0x387   : > { %7398 = vmatpush3.bf16.msra.mxu0 %v7395_v8  ;;  %7016 = vmatprep.subr.bf16.mxu1 %v7015_v54  ;;  %v7431_v8 = vpack.c.bf16 %v3080_v0, %v3079_v52  ;;  %v3267_v52 = vld [vmem:[#allocation11 + $0xa08] sm:$0xff] }
 0x388   : > { %7400 = vmatprep.subr.bf16.mxu0 %v7399_v56 }
 0x38a   : > { %7018 = vmatpush3.bf16.msra.mxu1 %v7015_v54  ;;  %v7051_v54 = vpack.c.bf16 %v1984_v44, %v1983_v42  ;;  %v2084_v42 = vld [vmem:[#allocation11 + $0x418] sm:$0xff]  ;;  %v3268_v44 = vld [vmem:[#allocation11 + $0xa10] sm:$0xff] }
 0x38b   : > { %7402 = vmatpush3.bf16.msra.mxu0 %v7399_v56  ;;  %7020 = vmatprep.subr.bf16.mxu1 %v7019_v60  ;;  %v7435_v56 = vpack.c.bf16 %v3164_v53, %v3163_v7  ;;  %v3269_v7 = vld [vmem:[#allocation11 + $0xa18] sm:$0xff]  ;;  %v2097_v53 = vrot.slane %v8695_v26, 3 }
 0x38c   : > { %7404 = vmatprep.subr.bf16.mxu0 %v7403_v46  ;;  %v7471_v21 = vpack.c.bf16 %v3269_v7, %v3268_v44  ;;  %v2184_v44 = vld [vmem:[#allocation11 + $0x4a8] sm:$0xff]  ;;  %v3363_v7 = vld [vmem:[#allocation11 + $0xaa0] sm:$0xff] }
 0x38d   : > { %5841 = vmatmul.mubr.f32.vlgmr.msra.gmra.mrb[0].mxu1 %v8704_v61 }
 0x38e   : > { %7022 = vmatpush3.bf16.msra.mxu1 %v7019_v60  ;;  %6261 = vmatmul.mubr.f32.vlgmr.msra.gmra.mrb[0].mxu0 %v2984_v17  ;;  %v7415_v17 = vpack.c.bf16 %v3072_v29, %v3071_v27  ;;  %v1999_v60 = vrot.slane %v8695_v26, 2  ;;  %v3172_v27 = vld [vmem:[#allocation11 + $0x9c8] sm:$0xff] }
 0x38f   : > { %7406 = vmatpush3.bf16.msra.mxu0 %v7403_v46  ;;  %7024 = vmatprep.subr.bf16.mxu1 %v7023_v10  ;;  %v2000_v46 = vrot.slane %v8704_v61, 2 }
 0x390   : > { %7408 = vmatprep.subr.bf16.mxu0 %v7407_v11  ;;  %5875 = vmatprep.mubr.f32.mxu1 %v1903_v18  ;;  %v3169_v18 = vld [vmem:[#allocation11 + $0x9b0] sm:$0xff] }
 0x391   : > { %6295 = vmatprep.mubr.f32.mxu0 %v3083_v19  ;;  %v2001_v13 = vsel %vm448_vm3, %v1999_v60, %v2000_v46  ;;  %v3170_v19 = vld [vmem:[#allocation11 + $0x9b8] sm:$0xff]  ;;  %v3271_v60 = vld [vmem:[#allocation11 + $0xa28] sm:$0xff] }
 0x392   : > { %7026 = vmatpush3.bf16.msra.mxu1 %v7023_v10  ;;  %v3167_v10 = vld [vmem:[#allocation11 + $0x9a0] sm:$0xff]  ;;  %v7475_v4 = vpack.c.bf16 %v3271_v60, %v3270_v59  ;;  %v3365_v59 = vld [vmem:[#allocation11 + $0xab0] sm:$0xff]  ;;  %v3366_v60 = vld [vmem:[#allocation11 + $0xab8] sm:$0xff] }
 0x393   : > { %7410 = vmatpush3.bf16.msra.mxu0 %v7407_v11  ;;  %7028 = vmatprep.subr.bf16.mxu1 %v7027_v20  ;;  %v3168_v11 = vld [vmem:[#allocation11 + $0x9a8] sm:$0xff] }
 0x394   : > { %7412 = vmatprep.subr.bf16.mxu0 %v7411_v22  ;;  %v7443_v15 = vpack.c.bf16 %v3168_v11, %v3167_v10  ;;  %v2088_v10 = vld [vmem:[#allocation11 + $0x438] sm:$0xff] }
 0x395   : > { %v3273_v11 = vld [vmem:[#allocation11 + $0xa38] sm:$0xff] }
 0x396   : > { %7030 = vmatpush3.bf16.msra.mxu1 %v7027_v20 }
 0x397   : > { %7414 = vmatpush3.bf16.msra.mxu0 %v7411_v22  ;;  %7032 = vmatprep.subr.bf16.mxu1 %v7031_v30  ;;  %v1991_v22 = vld [vmem:[#allocation11 + $0x3c0] sm:$0xff] }
 0x398   : > { %7416 = vmatprep.subr.bf16.mxu0 %v7415_v17  ;;  %v7067_v29 = vpack.c.bf16 %v1992_v23, %v1991_v22 }
 0x39a   : > { %7034 = vmatpush3.bf16.msra.mxu1 %v7031_v30  ;;  %v7451_v30 = vpack.c.bf16 %v3172_v27, %v3171_v25  ;;  %v2093_v25 = vld [vmem:[#allocation11 + $0x460] sm:$0xff]  ;;  %v2094_v27 = vld [vmem:[#allocation11 + $0x468] sm:$0xff] }
 0x39b   : > { %7418 = vmatpush3.bf16.msra.mxu0 %v7415_v17  ;;  %7036 = vmatprep.subr.bf16.mxu1 %v7035_v28  ;;  %v1993_v17 = vld [vmem:[#allocation11 + $0x3d0] sm:$0xff] }
 0x39c   : > { %7420 = vmatprep.subr.bf16.mxu0 %v7419_v33  ;;  %v7071_v32 = vpack.c.bf16 %v1994_v31, %v1993_v17  ;;  %v7107_v17 = vpack.c.bf16 %v2094_v27, %v2093_v25  ;;  %v2194_v25 = vld [vmem:[#allocation11 + $0x4f8] sm:$0xff]  ;;  %v3373_v27 = vld [vmem:[#allocation11 + $0xaf0] sm:$0xff] }
 0x39e   : > { %7038 = vmatpush3.bf16.msra.mxu1 %v7035_v28  ;;  %v7455_v28 = vpack.c.bf16 %v3174_v49, %v3173_v2  ;;  %v2095_v2 = vld [vmem:[#allocation11 + $0x470] sm:$0xff]  ;;  %v2096_v49 = vld [vmem:[#allocation11 + $0x478] sm:$0xff] }
 0x39f   : > { %7422 = vmatpush3.bf16.msra.mxu0 %v7419_v33  ;;  %7040 = vmatprep.subr.bf16.mxu1 %v7039_v38  ;;  %v1995_v33 = vld [vmem:[#allocation11 + $0x3e0] sm:$0xff] }
 0x3a0   : > { %7424 = vmatprep.subr.bf16.mxu0 %v7423_v39  ;;  %v7075_v37 = vpack.c.bf16 %v1996_v34, %v1995_v33  ;;  %v7111_v33 = vpack.c.bf16 %v2096_v49, %v2095_v2  ;;  %v2283_v2 = vld [vmem:[#allocation11 + $0x508] sm:$0xff]  ;;  %v3459_v49 = vld [vmem:[#allocation11 + $0xb00] sm:$0xff] }
 0x3a2   : > { %7042 = vmatpush3.bf16.msra.mxu1 %v7039_v38  ;;  %v7459_v38 = vpack.c.bf16 %v3176_v36, %v3175_v35  ;;  %v2179_v35 = vld [vmem:[#allocation11 + $0x480] sm:$0xff]  ;;  %v2180_v36 = vld [vmem:[#allocation11 + $0x488] sm:$0xff] }
 0x3a3   : > { %7426 = vmatpush3.bf16.msra.mxu0 %v7423_v39  ;;  %7044 = vmatprep.subr.bf16.mxu1 %v7043_v47  ;;  %v1997_v39 = vld [vmem:[#allocation11 + $0x3f0] sm:$0xff] }
 0x3a4   : > { %7428 = vmatprep.subr.bf16.mxu0 %v7427_v48  ;;  %v7079_v43 = vpack.c.bf16 %v1998_v40, %v1997_v39  ;;  %v7115_v39 = vpack.c.bf16 %v2180_v36, %v2179_v35  ;;  %v2285_v35 = vld [vmem:[#allocation11 + $0x518] sm:$0xff]  ;;  %v3461_v36 = vld [vmem:[#allocation11 + $0xb10] sm:$0xff] }
 0x3a6   : > { %7046 = vmatpush3.bf16.msra.mxu1 %v7043_v47  ;;  %v7463_v47 = vpack.c.bf16 %v3178_v41, %v3177_v12  ;;  %v2181_v12 = vld [vmem:[#allocation11 + $0x490] sm:$0xff]  ;;  %v2182_v41 = vld [vmem:[#allocation11 + $0x498] sm:$0xff] }
 0x3a7   : > { %7430 = vmatpush3.bf16.msra.mxu0 %v7427_v48  ;;  %7048 = vmatprep.subr.bf16.mxu1 %v7047_v55  ;;  %v2081_v48 = vld [vmem:[#allocation11 + $0x400] sm:$0xff] }
 0x3a8   : > { %7432 = vmatprep.subr.bf16.mxu0 %v7431_v8  ;;  %v7083_v0 = vpack.c.bf16 %v2082_v50, %v2081_v48  ;;  %v3362_v48 = vld [vmem:[#allocation11 + $0xa98] sm:$0xff]  ;;  %v2195_v50 = vrot.slane %v8695_v26, 4 }
 0x3aa   : > { %7050 = vmatpush3.bf16.msra.mxu1 %v7047_v55  ;;  %v7467_v55 = vpack.c.bf16 %v3267_v52, %v3266_v51  ;;  %v2196_v51 = vrot.slane %v8704_v61, 4 }
 0x3ab   : > { %7434 = vmatpush3.bf16.msra.mxu0 %v7431_v8  ;;  %7052 = vmatprep.subr.bf16.mxu1 %v7051_v54  ;;  %v2083_v8 = vld [vmem:[#allocation11 + $0x410] sm:$0xff] }
 0x3ac   : > { %7436 = vmatprep.subr.bf16.mxu0 %v7435_v56  ;;  %v2197_v26 = vsel %vm1702_vm8, %v2195_v50, %v2196_v51  ;;  %v3464_v50 = vld [vmem:[#allocation11 + $0xb28] sm:$0xff] }
 0x3ad   : > { %5876 = vmatmul.mubr.f32.vlgmr.msra.gmra.mrb[0].mxu1 %v1902_v5  ;;  %v1989_v5 = vld [vmem:[#allocation11 + $0x3b0] sm:$0xff] }
 0x3ae   : > { %7054 = vmatpush3.bf16.msra.mxu1 %v7051_v54  ;;  %6296 = vmatmul.mubr.f32.vlgmr.msra.gmra.mrb[0].mxu0 %v3082_v9  ;;  %v7063_v20 = vpack.c.bf16 %v1990_v16, %v1989_v5  ;;  %v7447_v9 = vpack.c.bf16 %v3170_v19, %v3169_v18  ;;  %v2098_v54 = vrot.slane %v8704_v61, 3  ;;  %v2091_v18 = vld [vmem:[#allocation11 + $0x450] sm:$0xff]  ;;  %v2092_v19 = vld [vmem:[#allocation11 + $0x458] sm:$0xff] }
 0x3af   : > { %7438 = vmatpush3.bf16.msra.mxu0 %v7435_v56  ;;  %7056 = vmatprep.subr.bf16.mxu1 %v7055_v1  ;;  %v7087_v56 = vpack.c.bf16 %v2084_v42, %v2083_v8  ;;  %v7103_v22 = vpack.c.bf16 %v2092_v19, %v2091_v18  ;;  %v2183_v42 = vld [vmem:[#allocation11 + $0x4a0] sm:$0xff]  ;;  %v2192_v18 = vld [vmem:[#allocation11 + $0x4e8] sm:$0xff]  ;;  %v3465_v61 = vld [vmem:[#allocation11 + $0xb30] sm:$0xff] }
 0x3b0   : > { %7440 = vmatprep.subr.bf16.mxu0 %v7439_v3  ;;  %5910 = vmatprep.mubr.f32.mxu1 %v2001_v13  ;;  %v2099_v62 = vsel %vm1144_vm5, %v2097_v53, %v2098_v54  ;;  %v7095_v13 = vpack.c.bf16 %v2088_v10, %v2087_v6  ;;  %v3364_v53 = vld [vmem:[#allocation11 + $0xaa8] sm:$0xff]  ;;  %v3367_v10 = vld [vmem:[#allocation11 + $0xac0] sm:$0xff] }
 0x3b1   : > { %6330 = vmatprep.mubr.f32.mxu0 %v3181_v45  ;;  %v2090_v45 = vld [vmem:[#allocation11 + $0x448] sm:$0xff]  ;;  %v3371_v19 = vld [vmem:[#allocation11 + $0xae0] sm:$0xff] }
 0x3b2   : > { %7058 = vmatpush3.bf16.msra.mxu1 %v7055_v1  ;;  %v8743_v1 = vld [vmem:[%s8608_s9 + $0x40] sm:$0xff] }
 0x3b3   : > { %7442 = vmatpush3.bf16.msra.mxu0 %v7439_v3  ;;  %7060 = vmatprep.subr.bf16.mxu1 %v7059_v14  ;;  %v7091_v3 = vpack.c.bf16 %v2086_v58, %v2085_v57  ;;  %v3377_v52 = vrot.slane %v8743_v1, 1  ;;  %v7507_v57 = vpack.c.bf16 %v3364_v53, %v3363_v7  ;;  %v2185_v58 = vld [vmem:[#allocation11 + $0x4b0] sm:$0xff]  ;;  %v2188_v6 = vld [vmem:[#allocation11 + $0x4c8] sm:$0xff] }
 0x3b4   : > { %7444 = vmatprep.subr.bf16.mxu0 %v7443_v15  ;;  %v8772_v7 = vld [vmem:[%s8608_s9 + $0x20] sm:$0xff] }
 0x3b6   : > { %7062 = vmatpush3.bf16.msra.mxu1 %v7059_v14  ;;  %v3274_v14 = vld [vmem:[#allocation11 + $0xa40] sm:$0xff] }
 0x3b7   : > { %7446 = vmatpush3.bf16.msra.mxu0 %v7443_v15  ;;  %7064 = vmatprep.subr.bf16.mxu1 %v7063_v20  ;;  %v3275_v15 = vld [vmem:[#allocation11 + $0xa48] sm:$0xff] }
 0x3b8   : > { %7448 = vmatprep.subr.bf16.mxu0 %v7447_v9  ;;  %v7483_v16 = vpack.c.bf16 %v3275_v15, %v3274_v14  ;;  %v3370_v14 = vld [vmem:[#allocation11 + $0xad8] sm:$0xff] }
 0x3ba   : > { %7066 = vmatpush3.bf16.msra.mxu1 %v7063_v20  ;;  %v3276_v20 = vld [vmem:[#allocation11 + $0xa50] sm:$0xff] }
 0x3bb   : > { %7450 = vmatpush3.bf16.msra.mxu0 %v7447_v9  ;;  %7068 = vmatprep.subr.bf16.mxu1 %v7067_v29  ;;  %v3277_v9 = vld [vmem:[#allocation11 + $0xa58] sm:$0xff] }
 0x3bc   : > { %7452 = vmatprep.subr.bf16.mxu0 %v7451_v30  ;;  %v7487_v23 = vpack.c.bf16 %v3277_v9, %v3276_v20  ;;  %v3372_v20 = vld [vmem:[#allocation11 + $0xae8] sm:$0xff] }
 0x3be   : > { %7070 = vmatpush3.bf16.msra.mxu1 %v7067_v29  ;;  %v3278_v29 = vld [vmem:[#allocation11 + $0xa60] sm:$0xff] }
 0x3bf   : > { %7454 = vmatpush3.bf16.msra.mxu0 %v7451_v30  ;;  %7072 = vmatprep.subr.bf16.mxu1 %v7071_v32  ;;  %v3279_v30 = vld [vmem:[#allocation11 + $0xa68] sm:$0xff] }
 0x3c0   : > { %7456 = vmatprep.subr.bf16.mxu0 %v7455_v28  ;;  %v7491_v31 = vpack.c.bf16 %v3279_v30, %v3278_v29  ;;  %v3374_v29 = vld [vmem:[#allocation11 + $0xaf8] sm:$0xff] }
 0x3c2   : > { %7074 = vmatpush3.bf16.msra.mxu1 %v7071_v32  ;;  %v3280_v32 = vld [vmem:[#allocation11 + $0xa70] sm:$0xff] }
 0x3c3   : > { %7458 = vmatpush3.bf16.msra.mxu0 %v7455_v28  ;;  %7076 = vmatprep.subr.bf16.mxu1 %v7075_v37  ;;  %v3281_v28 = vld [vmem:[#allocation11 + $0xa78] sm:$0xff] }
 0x3c4   : > { %7460 = vmatprep.subr.bf16.mxu0 %v7459_v38  ;;  %v7495_v34 = vpack.c.bf16 %v3281_v28, %v3280_v32  ;;  %v3460_v32 = vld [vmem:[#allocation11 + $0xb08] sm:$0xff] }
 0x3c6   : > { %7078 = vmatpush3.bf16.msra.mxu1 %v7075_v37  ;;  %v3359_v37 = vld [vmem:[#allocation11 + $0xa80] sm:$0xff] }
 0x3c7   : > { %7462 = vmatpush3.bf16.msra.mxu0 %v7459_v38  ;;  %7080 = vmatprep.subr.bf16.mxu1 %v7079_v43  ;;  %v3360_v38 = vld [vmem:[#allocation11 + $0xa88] sm:$0xff] }
 0x3c8   : > { %7464 = vmatprep.subr.bf16.mxu0 %v7463_v47  ;;  %v7499_v40 = vpack.c.bf16 %v3360_v38, %v3359_v37  ;;  %v3462_v37 = vld [vmem:[#allocation11 + $0xb18] sm:$0xff]  ;;  %v3475_v38 = vrot.slane %v8743_v1, 2 }
 0x3ca   : > { %7082 = vmatpush3.bf16.msra.mxu1 %v7079_v43  ;;  %v8747_v43 = vld [vmem:[%s8608_s9 + $0x48] sm:$0xff] }
 0x3cb   : > { %7466 = vmatpush3.bf16.msra.mxu0 %v7463_v47  ;;  %7084 = vmatprep.subr.bf16.mxu1 %v7083_v0  ;;  %v3361_v47 = vld [vmem:[#allocation11 + $0xa90] sm:$0xff] }
 0x3cc   : > { %7468 = vmatprep.subr.bf16.mxu0 %v7467_v55  ;;  %v7503_v8 = vpack.c.bf16 %v3362_v48, %v3361_v47  ;;  %v2287_v47 = vld [vmem:[#allocation11 + $0x528] sm:$0xff]  ;;  %v3463_v48 = vld [vmem:[#allocation11 + $0xb20] sm:$0xff] }
 0x3cd   : > { %5911 = vmatmul.mubr.f32.vlgmr.msra.gmra.mrb[0].mxu1 %v2000_v46  ;;  %v3272_v46 = vld [vmem:[#allocation11 + $0xa30] sm:$0xff] }
 0x3ce   : > { %7086 = vmatpush3.bf16.msra.mxu1 %v7083_v0  ;;  %6331 = vmatmul.mubr.f32.vlgmr.msra.gmra.mrb[0].mxu0 %v3180_v63  ;;  %v7479_v24 = vpack.c.bf16 %v3273_v11, %v3272_v46  ;;  %v2089_v63 = vld [vmem:[#allocation11 + $0x440] sm:$0xff]  ;;  %v3378_v0 = vrot.slane %v8747_v43, 1  ;;  %v3368_v46 = vld [vmem:[#allocation11 + $0xac8] sm:$0xff] }
 0x3cf   : > { %7470 = vmatpush3.bf16.msra.mxu0 %v7467_v55  ;;  %7088 = vmatprep.subr.bf16.mxu1 %v7087_v56  ;;  %v7099_v5 = vpack.c.bf16 %v2090_v45, %v2089_v63  ;;  %v7119_v55 = vpack.c.bf16 %v2182_v41, %v2181_v12  ;;  %v2190_v63 = vld [vmem:[#allocation11 + $0x4d8] sm:$0xff]  ;;  %v3369_v45 = vld [vmem:[#allocation11 + $0xad0] sm:$0xff]  ;;  %v7535_v12 = vpack.c.bf16 %v3462_v37, %v3461_v36  ;;  %v2286_v41 = vld [vmem:[#allocation11 + $0x520] sm:$0xff] }
 0x3d0   : > { %7472 = vmatprep.subr.bf16.mxu0 %v7471_v21  ;;  %5945 = vmatprep.mubr.f32.mxu1 %v2099_v62  ;;  %v2380_v36 = vld [vmem:[#allocation11 + $0x5a8] sm:$0xff]  ;;  %v3561_v37 = vld [vmem:[#allocation11 + $0xba0] sm:$0xff] }
 0x3d1   : > { %6365 = vmatprep.mubr.f32.mxu0 %v8743_v1 }
 0x3d2   : > { %7090 = vmatpush3.bf16.msra.mxu1 %v7087_v56  ;;  %v3379_v56 = vsel %vm268_vm1, %v3377_v52, %v3378_v0 }
 0x3d3   : > { %7474 = vmatpush3.bf16.msra.mxu0 %v7471_v21  ;;  %7092 = vmatprep.subr.bf16.mxu1 %v7091_v3  ;;  %v7123_v21 = vpack.c.bf16 %v2184_v44, %v2183_v42  ;;  %v2288_v42 = vld [vmem:[#allocation11 + $0x530] sm:$0xff]  ;;  %v2289_v44 = vld [vmem:[#allocation11 + $0x538] sm:$0xff] }
 0x3d4   : > { %7476 = vmatprep.subr.bf16.mxu0 %v7475_v4 }
 0x3d6   : > { %7094 = vmatpush3.bf16.msra.mxu1 %v7091_v3  ;;  %v7511_v3 = vpack.c.bf16 %v3366_v60, %v3365_v59  ;;  %v2292_v59 = vld [vmem:[#allocation11 + $0x550] sm:$0xff]  ;;  %v2293_v60 = vld [vmem:[#allocation11 + $0x558] sm:$0xff] }
 0x3d7   : > { %7478 = vmatpush3.bf16.msra.mxu0 %v7475_v4  ;;  %7096 = vmatprep.subr.bf16.mxu1 %v7095_v13  ;;  %v2187_v4 = vld [vmem:[#allocation11 + $0x4c0] sm:$0xff] }
 0x3d8   : > { %7480 = vmatprep.subr.bf16.mxu0 %v7479_v24  ;;  %v7131_v11 = vpack.c.bf16 %v2188_v6, %v2187_v4  ;;  %v7167_v4 = vpack.c.bf16 %v2293_v60, %v2292_v59  ;;  %v2388_v59 = vld [vmem:[#allocation11 + $0x5e8] sm:$0xff]  ;;  %v3569_v60 = vld [vmem:[#allocation11 + $0xbe0] sm:$0xff] }
 0x3da   : > { %7098 = vmatpush3.bf16.msra.mxu1 %v7095_v13  ;;  %v7515_v13 = vpack.c.bf16 %v3368_v46, %v3367_v10  ;;  %v2294_v10 = vld [vmem:[#allocation11 + $0x560] sm:$0xff]  ;;  %v2295_v46 = vld [vmem:[#allocation11 + $0x568] sm:$0xff] }
 0x3db   : > { %7482 = vmatpush3.bf16.msra.mxu0 %v7479_v24  ;;  %7100 = vmatprep.subr.bf16.mxu1 %v7099_v5  ;;  %v2189_v24 = vld [vmem:[#allocation11 + $0x4d0] sm:$0xff] }
 0x3dc   : > { %7484 = vmatprep.subr.bf16.mxu0 %v7483_v16  ;;  %v7135_v15 = vpack.c.bf16 %v2190_v63, %v2189_v24  ;;  %v7171_v24 = vpack.c.bf16 %v2295_v46, %v2294_v10  ;;  %v2390_v10 = vld [vmem:[#allocation11 + $0x5f8] sm:$0xff]  ;;  %v3571_v46 = vld [vmem:[#allocation11 + $0xbf0] sm:$0xff] }
 0x3de   : > { %7102 = vmatpush3.bf16.msra.mxu1 %v7099_v5  ;;  %v7519_v5 = vpack.c.bf16 %v3370_v14, %v3369_v45  ;;  %v2296_v45 = vld [vmem:[#allocation11 + $0x570] sm:$0xff]  ;;  %v2297_v14 = vld [vmem:[#allocation11 + $0x578] sm:$0xff] }
 0x3df   : > { %7486 = vmatpush3.bf16.msra.mxu0 %v7483_v16  ;;  %7104 = vmatprep.subr.bf16.mxu1 %v7103_v22  ;;  %v2191_v16 = vld [vmem:[#allocation11 + $0x4e0] sm:$0xff] }
 0x3e0   : > { %7488 = vmatprep.subr.bf16.mxu0 %v7487_v23  ;;  %v7139_v9 = vpack.c.bf16 %v2192_v18, %v2191_v16  ;;  %v7175_v16 = vpack.c.bf16 %v2297_v14, %v2296_v45  ;;  %v3656_v45 = vld [vmem:[#allocation11 + $0xc08] sm:$0xff] }
 0x3e2   : > { %7106 = vmatpush3.bf16.msra.mxu1 %v7103_v22  ;;  %v7523_v22 = vpack.c.bf16 %v3372_v20, %v3371_v19  ;;  %v2375_v19 = vld [vmem:[#allocation11 + $0x580] sm:$0xff]  ;;  %v2376_v20 = vld [vmem:[#allocation11 + $0x588] sm:$0xff] }
 0x3e3   : > { %7490 = vmatpush3.bf16.msra.mxu0 %v7487_v23  ;;  %7108 = vmatprep.subr.bf16.mxu1 %v7107_v17  ;;  %v2193_v23 = vld [vmem:[#allocation11 + $0x4f0] sm:$0xff] }
 0x3e4   : > { %7492 = vmatprep.subr.bf16.mxu0 %v7491_v31  ;;  %v7143_v30 = vpack.c.bf16 %v2194_v25, %v2193_v23  ;;  %v7179_v23 = vpack.c.bf16 %v2376_v20, %v2375_v19 }
 0x3e6   : > { %7110 = vmatpush3.bf16.msra.mxu1 %v7107_v17  ;;  %v7527_v17 = vpack.c.bf16 %v3374_v29, %v3373_v27  ;;  %v2377_v27 = vld [vmem:[#allocation11 + $0x590] sm:$0xff]  ;;  %v2378_v29 = vld [vmem:[#allocation11 + $0x598] sm:$0xff] }
 0x3e7   : > { %7494 = vmatpush3.bf16.msra.mxu0 %v7491_v31  ;;  %7112 = vmatprep.subr.bf16.mxu1 %v7111_v33  ;;  %v2282_v31 = vld [vmem:[#allocation11 + $0x500] sm:$0xff] }
 0x3e8   : > { %7496 = vmatprep.subr.bf16.mxu0 %v7495_v34  ;;  %v7147_v28 = vpack.c.bf16 %v2283_v2, %v2282_v31  ;;  %v2393_v31 = vrot.slane %v8772_v7, 1  ;;  %v8777_v2 = vld [vmem:[%s8608_s9 + $0x28] sm:$0xff] }
 0x3ea   : > { %7114 = vmatpush3.bf16.msra.mxu1 %v7111_v33  ;;  %v7531_v33 = vpack.c.bf16 %v3460_v32, %v3459_v49  ;;  %v2394_v49 = vrot.slane %v8777_v2, 1  ;;  %v3573_v32 = vrot.slane %v8743_v1, 3 }
 0x3eb   : > { %7498 = vmatpush3.bf16.msra.mxu0 %v7495_v34  ;;  %7116 = vmatprep.subr.bf16.mxu1 %v7115_v39  ;;  %v2284_v34 = vld [vmem:[#allocation11 + $0x510] sm:$0xff] }
 0x3ec   : > { %7500 = vmatprep.subr.bf16.mxu0 %v7499_v40 }
 0x3ed   : > { %5946 = vmatmul.mubr.f32.vlgmr.msra.gmra.mrb[0].mxu1 %v2098_v54  ;;  %v2186_v54 = vld [vmem:[#allocation11 + $0x4b8] sm:$0xff] }
 0x3ee   : > { %7118 = vmatpush3.bf16.msra.mxu1 %v7115_v39  ;;  %6366 = vmatmul.mubr.f32.vlgmr.msra.gmra.mrb[0].mxu0 %v8747_v43  ;;  %v7127_v62 = vpack.c.bf16 %v2186_v54, %v2185_v58  ;;  %v3476_v39 = vrot.slane %v8747_v43, 2 }
 0x3ef   : > { %7502 = vmatpush3.bf16.msra.mxu0 %v7499_v40  ;;  %7120 = vmatprep.subr.bf16.mxu1 %v7119_v55  ;;  %v7151_v40 = vpack.c.bf16 %v2285_v35, %v2284_v34  ;;  %v2379_v35 = vld [vmem:[#allocation11 + $0x5a0] sm:$0xff] }
 0x3f0   : > { %7504 = vmatprep.subr.bf16.mxu0 %v7503_v8  ;;  %5980 = vmatprep.mubr.f32.mxu1 %v2197_v26  ;;  %v3477_v52 = vsel %vm448_vm3, %v3475_v38, %v3476_v39  ;;  %v2290_v26 = vld [vmem:[#allocation11 + $0x540] sm:$0xff]  ;;  %v3562_v38 = vld [vmem:[#allocation11 + $0xba8] sm:$0xff] }
 0x3f1   : > { %6400 = vmatprep.mubr.f32.mxu0 %v3379_v56  ;;  %v2291_v56 = vld [vmem:[#allocation11 + $0x548] sm:$0xff] }
 0x3f2   : > { %7122 = vmatpush3.bf16.msra.mxu1 %v7119_v55  ;;  %v7155_v55 = vpack.c.bf16 %v2287_v47, %v2286_v41  ;;  %v7163_v58 = vpack.c.bf16 %v2291_v56, %v2290_v26  ;;  %v7187_v41 = vpack.c.bf16 %v2380_v36, %v2379_v35  ;;  %v7571_v47 = vpack.c.bf16 %v3562_v38, %v3561_v37  ;;  %v2386_v26 = vld [vmem:[#allocation11 + $0x5d8] sm:$0xff]  ;;  %v3567_v56 = vld [vmem:[#allocation11 + $0xbd0] sm:$0xff] }
 0x3f3   : > { %7506 = vmatpush3.bf16.msra.mxu0 %v7503_v8  ;;  %7124 = vmatprep.subr.bf16.mxu1 %v7123_v21  ;;  %v7539_v8 = vpack.c.bf16 %v3464_v50, %v3463_v48  ;;  %v2381_v48 = vld [vmem:[#allocation11 + $0x5b0] sm:$0xff]  ;;  %v2382_v50 = vld [vmem:[#allocation11 + $0x5b8] sm:$0xff] }
 0x3f4   : > { %7508 = vmatprep.subr.bf16.mxu0 %v7507_v57 }
 0x3f6   : > { %7126 = vmatpush3.bf16.msra.mxu1 %v7123_v21  ;;  %v3467_v21 = vld [vmem:[#allocation11 + $0xb40] sm:$0xff] }
 0x3f7   : > { %7510 = vmatpush3.bf16.msra.mxu0 %v7507_v57  ;;  %7128 = vmatprep.subr.bf16.mxu1 %v7127_v62  ;;  %v3468_v57 = vld [vmem:[#allocation11 + $0xb48] sm:$0xff] }
 0x3f8   : > { %7512 = vmatprep.subr.bf16.mxu0 %v7511_v3  ;;  %v7547_v54 = vpack.c.bf16 %v3468_v57, %v3467_v21  ;;  %v3568_v21 = vld [vmem:[#allocation11 + $0xbd8] sm:$0xff] }
 0x3fa   : > { %7130 = vmatpush3.bf16.msra.mxu1 %v7127_v62  ;;  %v3469_v62 = vld [vmem:[#allocation11 + $0xb50] sm:$0xff] }
 0x3fb   : > { %7514 = vmatpush3.bf16.msra.mxu0 %v7511_v3  ;;  %7132 = vmatprep.subr.bf16.mxu1 %v7131_v11  ;;  %v3470_v3 = vld [vmem:[#allocation11 + $0xb58] sm:$0xff] }
 0x3fc   : > { %7516 = vmatprep.subr.bf16.mxu0 %v7515_v13  ;;  %v7551_v6 = vpack.c.bf16 %v3470_v3, %v3469_v62  ;;  %v3570_v62 = vld [vmem:[#allocation11 + $0xbe8] sm:$0xff] }
 0x3fe   : > { %7134 = vmatpush3.bf16.msra.mxu1 %v7131_v11  ;;  %v3471_v11 = vld [vmem:[#allocation11 + $0xb60] sm:$0xff] }
 0x3ff   : > { %7518 = vmatpush3.bf16.msra.mxu0 %v7515_v13  ;;  %7136 = vmatprep.subr.bf16.mxu1 %v7135_v15  ;;  %v3472_v13 = vld [vmem:[#allocation11 + $0xb68] sm:$0xff] }
 0x400   : > { %7520 = vmatprep.subr.bf16.mxu0 %v7519_v5  ;;  %v7555_v63 = vpack.c.bf16 %v3472_v13, %v3471_v11  ;;  %v3572_v11 = vld [vmem:[#allocation11 + $0xbf8] sm:$0xff] }
 0x402   : > { %7138 = vmatpush3.bf16.msra.mxu1 %v7135_v15  ;;  %v3473_v15 = vld [vmem:[#allocation11 + $0xb70] sm:$0xff] }
 0x403   : > { %7522 = vmatpush3.bf16.msra.mxu0 %v7519_v5  ;;  %7140 = vmatprep.subr.bf16.mxu1 %v7139_v9  ;;  %v3474_v5 = vld [vmem:[#allocation11 + $0xb78] sm:$0xff] }
 0x404   : > { %7524 = vmatprep.subr.bf16.mxu0 %v7523_v22  ;;  %v7559_v18 = vpack.c.bf16 %v3474_v5, %v3473_v15  ;;  %v3671_v15 = vrot.slane %v8743_v1, 4  ;;  %v3672_v5 = vrot.slane %v8747_v43, 4 }
 0x406   : > { %7142 = vmatpush3.bf16.msra.mxu1 %v7139_v9  ;;  %v3557_v9 = vld [vmem:[#allocation11 + $0xb80] sm:$0xff]  ;;  %v3673_v20 = vsel %vm1702_vm8, %v3671_v15, %v3672_v5 }
 0x407   : > { %7526 = vmatpush3.bf16.msra.mxu0 %v7523_v22  ;;  %7144 = vmatprep.subr.bf16.mxu1 %v7143_v30  ;;  %v3558_v22 = vld [vmem:[#allocation11 + $0xb88] sm:$0xff] }
 0x408   : > { %7528 = vmatprep.subr.bf16.mxu0 %v7527_v17  ;;  %v7563_v25 = vpack.c.bf16 %v3558_v22, %v3557_v9  ;;  %v3659_v9 = vld [vmem:[#allocation11 + $0xc20] sm:$0xff]  ;;  %v3660_v22 = vld [vmem:[#allocation11 + $0xc28] sm:$0xff] }
 0x409   : > { %v7603_v1 = vpack.c.bf16 %v3660_v22, %v3659_v9 }
 0x40a   : > { %7146 = vmatpush3.bf16.msra.mxu1 %v7143_v30  ;;  %v3559_v30 = vld [vmem:[#allocation11 + $0xb90] sm:$0xff] }
 0x40b   : > { %7530 = vmatpush3.bf16.msra.mxu0 %v7527_v17  ;;  %7148 = vmatprep.subr.bf16.mxu1 %v7147_v28  ;;  %v3560_v17 = vld [vmem:[#allocation11 + $0xb98] sm:$0xff] }
 0x40c   : > { %7532 = vmatprep.subr.bf16.mxu0 %v7531_v33  ;;  %v7567_v34 = vpack.c.bf16 %v3560_v17, %v3559_v30  ;;  %v3664_v30 = vld [vmem:[#allocation11 + $0xc48] sm:$0xff] }
 0x40d   : > { %5981 = vmatmul.mubr.f32.vlgmr.msra.gmra.mrb[0].mxu1 %v2196_v51  ;;  %v3466_v51 = vld [vmem:[#allocation11 + $0xb38] sm:$0xff] }
 0x40e   : > { %7150 = vmatpush3.bf16.msra.mxu1 %v7147_v28  ;;  %6401 = vmatmul.mubr.f32.vlgmr.msra.gmra.mrb[0].mxu0 %v3378_v0  ;;  %v7159_v0 = vpack.c.bf16 %v2289_v44, %v2288_v42  ;;  %v7543_v53 = vpack.c.bf16 %v3466_v51, %v3465_v61  ;;  %v3574_v28 = vrot.slane %v8747_v43, 3  ;;  %v2383_v42 = vld [vmem:[#allocation11 + $0x5c0] sm:$0xff]  ;;  %v2384_v44 = vld [vmem:[#allocation11 + $0x5c8] sm:$0xff] }
 0x40f   : > { %7534 = vmatpush3.bf16.msra.mxu0 %v7531_v33  ;;  %7152 = vmatprep.subr.bf16.mxu1 %v7151_v40  ;;  %v7183_v33 = vpack.c.bf16 %v2378_v29, %v2377_v27  ;;  %v3566_v61 = vld [vmem:[#allocation11 + $0xbc8] sm:$0xff]  ;;  %v7195_v51 = vpack.c.bf16 %v2384_v44, %v2383_v42  ;;  %v3663_v29 = vld [vmem:[#allocation11 + $0xc40] sm:$0xff] }
 0x410   : > { %7536 = vmatprep.subr.bf16.mxu0 %v7535_v12  ;;  %6015 = vmatprep.mubr.f32.mxu1 %v8772_v7  ;;  %v3565_v7 = vld [vmem:[#allocation11 + $0xbc0] sm:$0xff]  ;;  %v7611_v17 = vpack.c.bf16 %v3664_v30, %v3663_v29 }
 0x411   : > { %6435 = vmatprep.mubr.f32.mxu0 %v3477_v52  ;;  %v3563_v52 = vld [vmem:[#allocation11 + $0xbb0] sm:$0xff] }
 0x412   : > { %7154 = vmatpush3.bf16.msra.mxu1 %v7151_v40  ;;  %v2395_v40 = vsel %vm268_vm1, %v2393_v31, %v2394_v49  ;;  %v3665_v31 = vld [vmem:[#allocation11 + $0xc50] sm:$0xff] }
 0x413   : > { %7538 = vmatpush3.bf16.msra.mxu0 %v7535_v12  ;;  %7156 = vmatprep.subr.bf16.mxu1 %v7155_v55  ;;  %v3575_v12 = vsel %vm1144_vm5, %v3573_v32, %v3574_v28  ;;  %v3668_v32 = vld [vmem:[#allocation11 + $0xc68] sm:$0xff] }
 0x414   : > { %7540 = vmatprep.subr.bf16.mxu0 %v7539_v8 }
 0x416   : > { %7158 = vmatpush3.bf16.msra.mxu1 %v7155_v55  ;;  %v3564_v55 = vld [vmem:[#allocation11 + $0xbb8] sm:$0xff] }
 0x417   : > { %7542 = vmatpush3.bf16.msra.mxu0 %v7539_v8  ;;  %7160 = vmatprep.subr.bf16.mxu1 %v7159_v0  ;;  %v7191_v8 = vpack.c.bf16 %v2382_v50, %v2381_v48 }
 0x418   : > { %7544 = vmatprep.subr.bf16.mxu0 %v7543_v53 }
 0x41a   : > { %7162 = vmatpush3.bf16.msra.mxu1 %v7159_v0  ;;  %v7579_v0 = vpack.c.bf16 %v3566_v61, %v3565_v7 }
 0x41b   : > { %7546 = vmatpush3.bf16.msra.mxu0 %v7543_v53  ;;  %7164 = vmatprep.subr.bf16.mxu1 %v7163_v58  ;;  %v2385_v53 = vld [vmem:[#allocation11 + $0x5d0] sm:$0xff] }
 0x41c   : > { %7548 = vmatprep.subr.bf16.mxu0 %v7547_v54  ;;  %v7199_v57 = vpack.c.bf16 %v2386_v26, %v2385_v53 }
 0x41e   : > { %7166 = vmatpush3.bf16.msra.mxu1 %v7163_v58  ;;  %v7583_v58 = vpack.c.bf16 %v3568_v21, %v3567_v56 }
 0x41f   : > { %7550 = vmatpush3.bf16.msra.mxu0 %v7547_v54  ;;  %7168 = vmatprep.subr.bf16.mxu1 %v7167_v4  ;;  %v2387_v54 = vld [vmem:[#allocation11 + $0x5e0] sm:$0xff] }
 0x420   : > { %7552 = vmatprep.subr.bf16.mxu0 %v7551_v6  ;;  %v7203_v3 = vpack.c.bf16 %v2388_v59, %v2387_v54 }
 0x422   : > { %7170 = vmatpush3.bf16.msra.mxu1 %v7167_v4  ;;  %v7587_v4 = vpack.c.bf16 %v3570_v62, %v3569_v60 }
 0x423   : > { %7554 = vmatpush3.bf16.msra.mxu0 %v7551_v6  ;;  %7172 = vmatprep.subr.bf16.mxu1 %v7171_v24  ;;  %v2389_v6 = vld [vmem:[#allocation11 + $0x5f0] sm:$0xff] }
 0x424   : > { %7556 = vmatprep.subr.bf16.mxu0 %v7555_v63  ;;  %v7207_v13 = vpack.c.bf16 %v2390_v10, %v2389_v6 }
 0x426   : > { %7174 = vmatpush3.bf16.msra.mxu1 %v7171_v24  ;;  %v7591_v24 = vpack.c.bf16 %v3572_v11, %v3571_v46 }
 0x427   : > { %7558 = vmatpush3.bf16.msra.mxu0 %v7555_v63  ;;  %7176 = vmatprep.subr.bf16.mxu1 %v7175_v16  ;;  %v3655_v63 = vld [vmem:[#allocation11 + $0xc00] sm:$0xff] }
 0x428   : > { %7560 = vmatprep.subr.bf16.mxu0 %v7559_v18  ;;  %v7595_v14 = vpack.c.bf16 %v3656_v45, %v3655_v63 }
 0x42a   : > { %7178 = vmatpush3.bf16.msra.mxu1 %v7175_v16  ;;  %v3657_v16 = vld [vmem:[#allocation11 + $0xc10] sm:$0xff] }
 0x42b   : > { %7562 = vmatpush3.bf16.msra.mxu0 %v7559_v18  ;;  %7180 = vmatprep.subr.bf16.mxu1 %v7179_v23  ;;  %v3658_v18 = vld [vmem:[#allocation11 + $0xc18] sm:$0xff] }
 0x42c   : > { %7564 = vmatprep.subr.bf16.mxu0 %v7563_v25  ;;  %v7599_v19 = vpack.c.bf16 %v3658_v18, %v3657_v16 }
 0x42d   : > { %6016 = vmatmul.mubr.f32.vlgmr.msra.gmra.mrb[0].mxu1 %v8777_v2  ;;  %v3666_v2 = vld [vmem:[#allocation11 + $0xc58] sm:$0xff] }
 0x42e   : > { %7182 = vmatpush3.bf16.msra.mxu1 %v7179_v23  ;;  %6436 = vmatmul.mubr.f32.vlgmr.msra.gmra.mrb[0].mxu0 %v3476_v39  ;;  %v7575_v39 = vpack.c.bf16 %v3564_v55, %v3563_v52  ;;  %v3661_v23 = vld [vmem:[#allocation11 + $0xc30] sm:$0xff]  ;;  %v7615_v43 = vpack.c.bf16 %v3666_v2, %v3665_v31 }
 0x42f   : > { %7566 = vmatpush3.bf16.msra.mxu0 %v7563_v25  ;;  %7184 = vmatprep.subr.bf16.mxu1 %v7183_v33  ;;  %v3662_v25 = vld [vmem:[#allocation11 + $0xc38] sm:$0xff] }
 0x430   : > { %7568 = vmatprep.subr.bf16.mxu0 %v7567_v34  ;;  %6050 = vmatprep.mubr.f32.mxu1 %v2395_v40  ;;  %v7607_v27 = vpack.c.bf16 %v3662_v25, %v3661_v23  ;;  %v4860_v40 = vld [vmem:[#allocation13] ss:$0 sm:$0xff] }
 0x431   : > { %6470 = vmatprep.mubr.f32.mxu0 %v3575_v12 }
 0x432   : > { %7186 = vmatpush3.bf16.msra.mxu1 %v7183_v33  ;;  %v3669_v33 = vld [vmem:[#allocation11 + $0xc70] sm:$0xff] }
 0x433   : > { %7570 = vmatpush3.bf16.msra.mxu0 %v7567_v34  ;;  %7188 = vmatprep.subr.bf16.mxu1 %v7187_v41  ;;  %v3670_v34 = vld [vmem:[#allocation11 + $0xc78] sm:$0xff] }
 0x434   : > { %7572 = vmatprep.subr.bf16.mxu0 %v7571_v47  ;;  %v7623_v35 = vpack.c.bf16 %v3670_v34, %v3669_v33 }
 0x436   : > { %7190 = vmatpush3.bf16.msra.mxu1 %v7187_v41 }
 0x437   : > { %7574 = vmatpush3.bf16.msra.mxu0 %v7571_v47  ;;  %7192 = vmatprep.subr.bf16.mxu1 %v7191_v8 }
 0x438   : > { %7576 = vmatprep.subr.bf16.mxu0 %v7575_v39 }
 0x43a   : > { %7194 = vmatpush3.bf16.msra.mxu1 %v7191_v8 }
 0x43b   : > { %7578 = vmatpush3.bf16.msra.mxu0 %v7575_v39  ;;  %7196 = vmatprep.subr.bf16.mxu1 %v7195_v51 }
 0x43c   : > { %7580 = vmatprep.subr.bf16.mxu0 %v7579_v0 }
 0x43e   : > { %7198 = vmatpush3.bf16.msra.mxu1 %v7195_v51 }
 0x43f   : > { %7582 = vmatpush3.bf16.msra.mxu0 %v7579_v0  ;;  %7200 = vmatprep.subr.bf16.mxu1 %v7199_v57 }
 0x440   : > { %7584 = vmatprep.subr.bf16.mxu0 %v7583_v58 }
 0x442   : > { %7202 = vmatpush3.bf16.msra.mxu1 %v7199_v57 }
 0x443   : > { %7586 = vmatpush3.bf16.msra.mxu0 %v7583_v58  ;;  %7204 = vmatprep.subr.bf16.mxu1 %v7203_v3 }
 0x444   : > { %7588 = vmatprep.subr.bf16.mxu0 %v7587_v4 }
 0x446   : > { %7206 = vmatpush3.bf16.msra.mxu1 %v7203_v3 }
 0x447   : > { %7590 = vmatpush3.bf16.msra.mxu0 %v7587_v4  ;;  %7208 = vmatprep.subr.bf16.mxu1 %v7207_v13 }
 0x448   : > { %7592 = vmatprep.subr.bf16.mxu0 %v7591_v24 }
 0x44a   : > { %7210 = vmatpush3.bf16.msra.mxu1 %v7207_v13 }
 0x44b   : > { %7594 = vmatpush3.bf16.msra.mxu0 %v7591_v24 }
 0x44c   : > { %7596 = vmatprep.subr.bf16.mxu0 %v7595_v14 }
 0x44d   : > { %6051 = vmatmul.mubr.f32.vlgmr.msra.gmra.mrb[0].mxu1 %v2394_v49  ;;  %v3667_v49 = vld [vmem:[#allocation11 + $0xc60] sm:$0xff] }
 0x44e   : > { %6471 = vmatmul.mubr.f32.vlgmr.msra.gmra.mrb[0].mxu0 %v3574_v28  ;;  %v7619_v28 = vpack.c.bf16 %v3668_v32, %v3667_v49 }
 0x44f   : > { %7598 = vmatpush3.bf16.msra.mxu0 %v7595_v14  ;;  %6505 = vmatprep.mubr.f32.mxu0 %v3673_v20 }
 0x450   : > { %7600 = vmatprep.subr.bf16.mxu0 %v7599_v19 }
 0x453   : > { %7602 = vmatpush3.bf16.msra.mxu0 %v7599_v19 }
 0x454   : > { %7604 = vmatprep.subr.bf16.mxu0 %v7603_v1 }
 0x457   : > { %7606 = vmatpush3.bf16.msra.mxu0 %v7603_v1 }
 0x458   : > { %7608 = vmatprep.subr.bf16.mxu0 %v7607_v27 }
 0x45b   : > { %7610 = vmatpush3.bf16.msra.mxu0 %v7607_v27 }
 0x45c   : > { %7612 = vmatprep.subr.bf16.mxu0 %v7611_v17 }
 0x45f   : > { %7614 = vmatpush3.bf16.msra.mxu0 %v7611_v17 }
 0x460   : > { %7616 = vmatprep.subr.bf16.mxu0 %v7615_v43 }
 0x463   : > { %7618 = vmatpush3.bf16.msra.mxu0 %v7615_v43 }
 0x464   : > { %7620 = vmatprep.subr.bf16.mxu0 %v7619_v28 }
 0x467   : > { %7622 = vmatpush3.bf16.msra.mxu0 %v7619_v28 }
 0x468   : > { %7624 = vmatprep.subr.bf16.mxu0 %v7623_v35 }
 0x46b   : > { %7626 = vmatpush3.bf16.msra.mxu0 %v7623_v35 }
 0x46e   : > { %6506 = vmatmul.mubr.f32.vlgmr.msra.gmra.mrb[0].mxu0 %v3672_v5 }
 0x520   : > { %v6052_v36 = vpop.f32.mrb[0].mxu1 }
 0x521   : > { %v2464_v37 = vpop.f32.mrb[1].mxu1 }
 0x541   : > { %v6507_v38 = vpop.f32.mrb[0].mxu0  ;;  %1292 = sbr.rel (!%p1290_p2) target bundleno = 714 (0x2ca), region = 159 }
 0x542   : > { %v7845_v12 = vadd.f32 %v6507_v38, %v6052_v36  ;;  %v3742_v41 = vpop.f32.mrb[1].mxu0 }
 0x543   : > { %v7846_v47 = vadd.f32 %v3742_v41, %v2464_v37 }
 0x544   : > { %v3761_v48 = vadd.f32 %v7845_v12, %v4860_v40 }
 0x545   : > { %v3760_v50 = vadd.f32 %v7846_v47, %v4860_v40 }
 0x546   : > { %3764 = vst [vmem:[%s3762_s10 + $0x8] sm:$0xf] %v3761_v48 }
 0x547   : > { %3763 = vst [vmem:[%s3762_s10] sm:$0xff] %v3760_v50 }
 0x548 LB: > { %s4879_s3 = sshll.u32 %s8151_s6, 5  ;;  %s4868_s24 = sshll.u32 %s8151_s6, 4  ;;  %vm3783_vm9 = vcmask 1041408   ;;  %vm3791_vm10 = vcmask 1043457   ;;  %vm3799_vm11 = vcmask 1045507   ;;  %vm3807_vm12 = vcmask 1046533   ;;  %s8151_s6 = sphi %s8803_s6, %s3770_s6  }
 0x549   : > { %s3773_s21 = scalar_lea.vmem [#allocation4], %s4879_s3  ;;  %s8810_s11 = scalar_lea.vmem [#allocation5], %s4868_s24  ;;  %v8169_v39 = vmov 0.0   ;;  %vm3815_vm13 = vcmask 1047558   ;;  %vm3834_vm14 = vcmask 1043458  }
 0x54a   : > { %4870 = vst [vmem:[%s8810_s11 + $0x18] sm:$0x1] %v8169_v39  ;;  %s3770_s6 = sadd.s32 1, %s8151_s6  }
 0x54b   : > { %p3767_p3 = scmp.ge.s32.totalorder %s3770_s6, 7  }
 0x54c   :  { %s8828_s12 = smov (%p3767_p3), 0  }
 0x54e   : > { %v3774_v52 = vld [vmem:[%s3773_s21] sm:$0xff]  ;;  %v3775_v55 = vld [vmem:[%s3773_s21 + $0x8] sm:$0xf]  ;;  %v4865_v8 = vld [vmem:[%s3773_s21 + $0x10] sm:$0xff] }
 0x54f   : > { %v4866_v42 = vld [vmem:[%s3773_s21 + $0x18] sm:$0xf]  ;;  %v3781_v44 = vmax.f32 %v3774_v52, %v4865_v8 }
 0x550   : > { %v3782_v7 = vmax.f32 %v3775_v55, %v4866_v42 }
 0x551   : > { %v3784_v61 = vsel %vm3783_vm9, %v3781_v44, -inf  ;;  %v3792_v51 = vsel %vm3791_vm10, %v3781_v44, -inf  ;;  %v3800_v0 = vsel %vm3799_vm11, %v3781_v44, -inf  ;;  %v3808_v53 = vsel %vm3807_vm12, %v3781_v44, -inf }
 0x552   : > { %v3785_v26 = vrot.slane %v3784_v61, 4  ;;  %v3793_v56 = vrot.slane %v3792_v51, 4  ;;  %v3801_v21 = vrot.slane %v3800_v0, 4  ;;  %v3809_v57 = vrot.slane %v3808_v53, 4 }
 0x553   : > { %v3816_v58 = vsel %vm3815_vm13, %v3781_v44, -inf  ;;  %v3818_v54 = vsel %vm1134_vm4, %v3782_v7, -inf  ;;  %v3827_v59 = vsel %vm1274_vm7, %v3782_v7, -inf  ;;  %v3835_v60 = vsel %vm3834_vm14, %v3782_v7, -inf }
 0x554   : > { %v3786_v62 = vmax.f32 %v3784_v61, %v3785_v26  ;;  %v3794_v3 = vmax.f32 %v3792_v51, %v3793_v56  ;;  %v3802_v4 = vmax.f32 %v3800_v0, %v3801_v21  ;;  %v3810_v6 = vmax.f32 %v3808_v53, %v3809_v57 }
 0x555   : > { %v3819_v10 = vmax.f32 %v3816_v58, %v3818_v54  ;;  %v3828_v46 = vrot.slane %v3827_v59, 4  ;;  %v3836_v11 = vrot.slane %v3835_v60, 4 }
 0x556   : > { %v3787_v13 = vrot.slane %v3786_v62, 2  ;;  %v3795_v24 = vrot.slane %v3794_v3, 2  ;;  %v3803_v63 = vrot.slane %v3802_v4, 2  ;;  %v3811_v45 = vrot.slane %v3810_v6, 2 }
 0x557   : > { %v3820_v14 = vrot.slane %v3819_v10, 4  ;;  %v3829_v15 = vmax.f32 %v3827_v59, %v3828_v46  ;;  %v3837_v5 = vmax.f32 %v3835_v60, %v3836_v11 }
 0x558   : > { %v3788_v16 = vmax.f32 %v3786_v62, %v3787_v13  ;;  %v3796_v18 = vmax.f32 %v3794_v3, %v3795_v24  ;;  %v3804_v19 = vmax.f32 %v3802_v4, %v3803_v63  ;;  %v3812_v20 = vmax.f32 %v3810_v6, %v3811_v45 }
 0x559   : > { %v3821_v9 = vmax.f32 %v3819_v10, %v3820_v14  ;;  %v3830_v22 = vrot.slane %v3829_v15, 2  ;;  %v3838_v1 = vrot.slane %v3837_v5, 2 }
 0x55a   : > { %v3789_v23 = vrot.slane %v3788_v16, 1  ;;  %v3797_v25 = vrot.slane %v3796_v18, 1  ;;  %v3805_v27 = vrot.slane %v3804_v19, 1  ;;  %v3813_v29 = vrot.slane %v3812_v20, 1 }
 0x55b   : > { %v3822_v30 = vrot.slane %v3821_v9, 2  ;;  %v3831_v17 = vmax.f32 %v3829_v15, %v3830_v22  ;;  %v3839_v31 = vmax.f32 %v3837_v5, %v3838_v1 }
 0x55c   : > { %v3790_v2 = vmax.f32 %v3788_v16, %v3789_v23  ;;  %v3798_v43 = vmax.f32 %v3796_v18, %v3797_v25  ;;  %v3806_v49 = vmax.f32 %v3804_v19, %v3805_v27  ;;  %v3814_v32 = vmax.f32 %v3812_v20, %v3813_v29 }
 0x55d   : > { %v3823_v28 = vmax.f32 %v3821_v9, %v3822_v30  ;;  %v3832_v33 = vrot.slane %v3831_v17, 1  ;;  %v3840_v34 = vrot.slane %v3839_v31, 1 }
 0x55e   : > { %v3842_v35 = vsel %vm1134_vm4, %v3790_v2, %v3798_v43 }
 0x55f   : > { %v3824_v36 = vrot.slane %v3823_v28, 1  ;;  %v3843_v37 = vsel %vm3783_vm9, %v3842_v35, %v3806_v49  ;;  %v3833_v38 = vmax.f32 %v3831_v17, %v3832_v33  ;;  %v3841_v41 = vmax.f32 %v3839_v31, %v3840_v34 }
 0x560   : > { %v3844_v40 = vsel %vm1274_vm7, %v3843_v37, %v3814_v32 }
 0x561   : > { %v3825_v12 = vmax.f32 %v3823_v28, %v3824_v36 }
 0x563   : > { %v3846_v47 = vsel %vm1702_vm8, %v3844_v40, %v3825_v12 }
 0x564   : > { %v3848_v48 = vsel %vm1144_vm5, %v3846_v47, %v3833_v38 }
 0x565   : > { %v3850_v50 = vsel %vm448_vm3, %v3848_v48, %v3841_v41 }
 0x566   : > { %v4867_v52 = vmul.f32 -1.442695, %v3850_v50 }
 0x568   : > { %7951 = vpow2.f32 %v4867_v52 }
 0x572   : > { %v7952_v55 = vpop.eup %7951 }
 0x573   : > { %v3854_v8 = vadd.f32 1.0, %v7952_v55 }
 0x575   : > { %7953 = vrcp.f32 %v3854_v8 }
 0x57d   :  { %3769 = sbr.rel (!%p3767_p3) target bundleno = 1352 (0x548), region = 170 }
 0x57f   : > { %v7954_v39 = vpop.eup %7953 }
 0x580   : > { %v3858_v42 = vrot.slane %v7954_v39, 7 }
 0x582   : > { %v3860_v44 = vsel %vm1134_vm4, 0.0, %v3858_v42 }
 0x583   : > { %4869 = vst [vmem:[%s8810_s11 + $0x10] sm:$0xff] %v3860_v44 }
 0x584 LB: > { %v3892_v7 = vld [vmem:[#allocation14 + $0x80] sm:$0xff]  ;;  %v3893_v61 = vld [vmem:[#allocation14 + $0x88] sm:$0xff]  ;;  %v8170_v0 = vmov 0.0|0.0   ;;  %v3894_v56 = vld [vmem:[#allocation14 + $0x90] sm:$0xff]  ;;  %vm8171_vm15 = vmmov 0   ;;  %v8172_v59 = vmov 0.0   ;;  %s8155_s12 = sphi %s8828_s12, %s3871_s12  }
 0x585   : > { %v3876_v51 = vld [vmem:[#allocation14] sm:$0xff]  ;;  %7627 = vmatprep.subr.bf16.mxu0 %v8170_v0  ;;  %v7628_v53 = vpack.c.bf16 %v3893_v61, %v3892_v7  ;;  %7651 = vmatprep.subr.bf16.mxu1 %v8170_v0  ;;  %v3877_v26 = vld [vmem:[#allocation14 + $0x8] sm:$0xff]  ;;  %v3895_v21 = vld [vmem:[#allocation14 + $0x98] sm:$0xff]  ;;  %s4871_s13 = sshll.u32 %s8155_s12, 4  ;;  %s4878_s15 = sshll.u32 %s8155_s12, 3 }
 0x586   : > { %v7652_v57 = vpack.c.bf16 %v3877_v26, %v3876_v51  ;;  %v3878_v58 = vld [vmem:[#allocation14 + $0x10] sm:$0xff]  ;;  %v3879_v54 = vld [vmem:[#allocation14 + $0x18] sm:$0xff]  ;;  %6540 = vmatprep.mubr.msk.f32.mxu0 %vm8171_vm15, %v8172_v59  ;;  %6575 = vmatprep.mubr.msk.f32.mxu1 %vm8171_vm15, %v8172_v59  ;;  %v7631_v60 = vpack.c.bf16 %v3895_v21, %v3894_v56  ;;  %v3896_v3 = vld [vmem:[#allocation14 + $0xa0] sm:$0xff]  ;;  %s8852_s14 = scalar_lea.vmem [#allocation5], %s4871_s13  ;;  %s4693_s16 = scalar_lea.vmem [#allocation16], %s4878_s15 }
 0x587   : > { %7629 = vmatpush3.bf16.msra.mxu0 %v7628_v53  ;;  %v7655_v62 = vpack.c.bf16 %v3879_v54, %v3878_v58  ;;  %v3897_v4 = vld [vmem:[#allocation14 + $0xa8] sm:$0xff]  ;;  %v3880_v6 = vld [vmem:[#allocation14 + $0x20] sm:$0xff]  ;;  %v3898_v13 = vld [vmem:[#allocation14 + $0xb0] sm:$0xff]  ;;  %s4696_s4 = scalar_lea.vmem %s8960_s8, %s4878_s15  ;;  %s3871_s12 = sadd.s32 1, %s8155_s12  }
 0x588   : > { %7653 = vmatpush3.bf16.msra.mxu1 %v7652_v57  ;;  %7630 = vmatprep.subr.bf16.mxu0 %v8170_v0  ;;  %v3881_v10 = vld [vmem:[#allocation14 + $0x28] sm:$0xff]  ;;  %v7634_v46 = vpack.c.bf16 %v3897_v4, %v3896_v3  ;;  %v3899_v24 = vld [vmem:[#allocation14 + $0xb8] sm:$0xff]  ;;  %v3882_v63 = vld [vmem:[#allocation14 + $0x30] sm:$0xff]  ;;  %p3868_p4 = scmp.ge.s32.totalorder %s3871_s12, 7  }
 0x589   : > { %7654 = vmatprep.subr.bf16.mxu1 %v8170_v0  ;;  %v7658_v11 = vpack.c.bf16 %v3881_v10, %v3880_v6  ;;  %v3883_v45 = vld [vmem:[#allocation14 + $0x38] sm:$0xff]  ;;  %v7637_v14 = vpack.c.bf16 %v3899_v24, %v3898_v13  ;;  %v3900_v5 = vld [vmem:[#allocation14 + $0xc0] sm:$0xff]  ;;  %v3901_v16 = vld [vmem:[#allocation14 + $0xc8] sm:$0xff] }
 0x58a   : > { %v7661_v15 = vpack.c.bf16 %v3883_v45, %v3882_v63  ;;  %v3884_v18 = vld [vmem:[#allocation14 + $0x40] sm:$0xff]  ;;  %v3885_v19 = vld [vmem:[#allocation14 + $0x48] sm:$0xff]  ;;  %v7640_v20 = vpack.c.bf16 %v3901_v16, %v3900_v5  ;;  %v3902_v22 = vld [vmem:[#allocation14 + $0xd0] sm:$0xff] }
 0x58b   : > { %7632 = vmatpush3.bf16.msra.mxu0 %v7631_v60  ;;  %v7664_v9 = vpack.c.bf16 %v3885_v19, %v3884_v18  ;;  %v3903_v1 = vld [vmem:[#allocation14 + $0xd8] sm:$0xff]  ;;  %v3886_v23 = vld [vmem:[#allocation14 + $0x50] sm:$0xff]  ;;  %v3904_v30 = vld [vmem:[#allocation14 + $0xe0] sm:$0xff] }
 0x58c   : > { %7656 = vmatpush3.bf16.msra.mxu1 %v7655_v62  ;;  %7633 = vmatprep.subr.bf16.mxu0 %v8170_v0  ;;  %v3887_v25 = vld [vmem:[#allocation14 + $0x58] sm:$0xff]  ;;  %v7643_v27 = vpack.c.bf16 %v3903_v1, %v3902_v22  ;;  %v3905_v17 = vld [vmem:[#allocation14 + $0xe8] sm:$0xff]  ;;  %v3888_v31 = vld [vmem:[#allocation14 + $0x60] sm:$0xff] }
 0x58d   : > { %7657 = vmatprep.subr.bf16.mxu1 %v8170_v0  ;;  %v7667_v29 = vpack.c.bf16 %v3887_v25, %v3886_v23  ;;  %v3889_v2 = vld [vmem:[#allocation14 + $0x68] sm:$0xff]  ;;  %v7646_v43 = vpack.c.bf16 %v3905_v17, %v3904_v30  ;;  %v3906_v32 = vld [vmem:[#allocation14 + $0xf0] sm:$0xff]  ;;  %v3907_v28 = vld [vmem:[#allocation14 + $0xf8] sm:$0xff] }
 0x58e   : > { %v7670_v49 = vpack.c.bf16 %v3889_v2, %v3888_v31  ;;  %v3890_v33 = vld [vmem:[#allocation14 + $0x70] sm:$0xff]  ;;  %v3891_v34 = vld [vmem:[#allocation14 + $0x78] sm:$0xff]  ;;  %v7649_v35 = vpack.c.bf16 %v3907_v28, %v3906_v32  ;;  %v8855_v36 = vld [vmem:[%s8852_s14] sm:$0xff] }
 0x58f   : > { %7635 = vmatpush3.bf16.msra.mxu0 %v7634_v46  ;;  %v7673_v37 = vpack.c.bf16 %v3891_v34, %v3890_v33  ;;  %v4051_v38 = vld [vmem:[#allocation14 + $0x100] sm:$0xff]  ;;  %v4052_v40 = vld [vmem:[#allocation14 + $0x108] sm:$0xff]  ;;  %v3909_v47 = vrot.slane %v8855_v36, 1  ;;  %v4053_v52 = vld [vmem:[#allocation14 + $0x110] sm:$0xff]  ;;  %v4069_v30 = vrot.slane %v8855_v36, 2 }
 0x590   : > { %7659 = vmatpush3.bf16.msra.mxu1 %v7658_v11  ;;  %7636 = vmatprep.subr.bf16.mxu0 %v8170_v0  ;;  %v4149_v12 = vld [vmem:[#allocation14 + $0x180] sm:$0xff]  ;;  %v4150_v41 = vld [vmem:[#allocation14 + $0x188] sm:$0xff]  ;;  %v7676_v48 = vpack.c.bf16 %v4052_v40, %v4051_v38  ;;  %v4054_v55 = vld [vmem:[#allocation14 + $0x118] sm:$0xff] }
 0x591   : > { %7660 = vmatprep.subr.bf16.mxu1 %v8170_v0  ;;  %v7700_v50 = vpack.c.bf16 %v4150_v41, %v4149_v12  ;;  %v4151_v8 = vld [vmem:[#allocation14 + $0x190] sm:$0xff]  ;;  %v4152_v39 = vld [vmem:[#allocation14 + $0x198] sm:$0xff]  ;;  %v7679_v42 = vpack.c.bf16 %v4054_v55, %v4053_v52  ;;  %v4055_v7 = vld [vmem:[#allocation14 + $0x120] sm:$0xff] }
 0x592   : > { %v7703_v44 = vpack.c.bf16 %v4152_v39, %v4151_v8  ;;  %v4056_v61 = vld [vmem:[#allocation14 + $0x128] sm:$0xff]  ;;  %v4153_v51 = vld [vmem:[#allocation14 + $0x1a0] sm:$0xff]  ;;  %v4057_v21 = vld [vmem:[#allocation14 + $0x130] sm:$0xff] }
 0x593   : > { %7638 = vmatpush3.bf16.msra.mxu0 %v7637_v14  ;;  %v4154_v53 = vld [vmem:[#allocation14 + $0x1a8] sm:$0xff]  ;;  %v7682_v26 = vpack.c.bf16 %v4056_v61, %v4055_v7  ;;  %v4058_v57 = vld [vmem:[#allocation14 + $0x138] sm:$0xff]  ;;  %v4155_v58 = vld [vmem:[#allocation14 + $0x1b0] sm:$0xff] }
 0x594   : > { %7662 = vmatpush3.bf16.msra.mxu1 %v7661_v15  ;;  %7639 = vmatprep.subr.bf16.mxu0 %v8170_v0  ;;  %v7706_v56 = vpack.c.bf16 %v4154_v53, %v4153_v51  ;;  %v4156_v54 = vld [vmem:[#allocation14 + $0x1b8] sm:$0xff]  ;;  %v7685_v60 = vpack.c.bf16 %v4058_v57, %v4057_v21  ;;  %v4059_v3 = vld [vmem:[#allocation14 + $0x140] sm:$0xff]  ;;  %v4060_v4 = vld [vmem:[#allocation14 + $0x148] sm:$0xff] }
 0x595   : > { %7663 = vmatprep.subr.bf16.mxu1 %v8170_v0  ;;  %v7709_v62 = vpack.c.bf16 %v4156_v54, %v4155_v58  ;;  %v4157_v6 = vld [vmem:[#allocation14 + $0x1c0] sm:$0xff]  ;;  %v4158_v10 = vld [vmem:[#allocation14 + $0x1c8] sm:$0xff]  ;;  %v7688_v46 = vpack.c.bf16 %v4060_v4, %v4059_v3  ;;  %v4061_v13 = vld [vmem:[#allocation14 + $0x150] sm:$0xff] }
 0x596   : > { %v7712_v11 = vpack.c.bf16 %v4158_v10, %v4157_v6  ;;  %v4062_v24 = vld [vmem:[#allocation14 + $0x158] sm:$0xff]  ;;  %v4159_v63 = vld [vmem:[#allocation14 + $0x1d0] sm:$0xff]  ;;  %v4063_v5 = vld [vmem:[#allocation14 + $0x160] sm:$0xff] }
 0x597   : > { %7641 = vmatpush3.bf16.msra.mxu0 %v7640_v20  ;;  %v4160_v45 = vld [vmem:[#allocation14 + $0x1d8] sm:$0xff]  ;;  %v7691_v14 = vpack.c.bf16 %v4062_v24, %v4061_v13  ;;  %v4064_v16 = vld [vmem:[#allocation14 + $0x168] sm:$0xff]  ;;  %v4161_v18 = vld [vmem:[#allocation14 + $0x1e0] sm:$0xff] }
 0x598   : > { %7665 = vmatpush3.bf16.msra.mxu1 %v7664_v9  ;;  %7642 = vmatprep.subr.bf16.mxu0 %v8170_v0  ;;  %v7715_v15 = vpack.c.bf16 %v4160_v45, %v4159_v63  ;;  %v4162_v19 = vld [vmem:[#allocation14 + $0x1e8] sm:$0xff]  ;;  %v7694_v20 = vpack.c.bf16 %v4064_v16, %v4063_v5  ;;  %v4065_v22 = vld [vmem:[#allocation14 + $0x170] sm:$0xff]  ;;  %v4066_v1 = vld [vmem:[#allocation14 + $0x178] sm:$0xff] }
 0x599   : > { %7666 = vmatprep.subr.bf16.mxu1 %v8170_v0  ;;  %v7718_v9 = vpack.c.bf16 %v4162_v19, %v4161_v18  ;;  %v3875_v23 = vld [vmem:[%s8852_s14 + $0x8] sm:$0x1]  ;;  %v4163_v25 = vld [vmem:[#allocation14 + $0x1f0] sm:$0xff]  ;;  %v4236_v2 = vld [vmem:[#allocation14 + $0x200] sm:$0xff] }
 0x59a   : > { %v4070_v17 = vrot.slane %v3875_v23, 2  ;;  %v4327_v32 = vld [vmem:[#allocation14 + $0x288] sm:$0xff]  ;;  %v8886_v34 = vld [vmem:[%s8852_s14 + $0x10] sm:$0xff]  ;;  %v4244_v53 = vld [vmem:[#allocation14 + $0x240] sm:$0xff] }
 0x59b   : > { %7644 = vmatpush3.bf16.msra.mxu0 %v7643_v27  ;;  %v4164_v27 = vld [vmem:[#allocation14 + $0x1f8] sm:$0xff]  ;;  %v4328_v38 = vld [vmem:[#allocation14 + $0x290] sm:$0xff]  ;;  %v4331_v52 = vld [vmem:[#allocation14 + $0x2a8] sm:$0xff] }
 0x59c   : > { %7668 = vmatpush3.bf16.msra.mxu1 %v7667_v29  ;;  %7645 = vmatprep.subr.bf16.mxu0 %v8170_v0  ;;  %v7697_v29 = vpack.c.bf16 %v4066_v1, %v4065_v22  ;;  %v7721_v31 = vpack.c.bf16 %v4164_v27, %v4163_v25  ;;  %v4071_v28 = vsel %vm448_vm3, %v4069_v30, %v4070_v17  ;;  %v4329_v40 = vld [vmem:[#allocation14 + $0x298] sm:$0xff]  ;;  %v4242_v39 = vld [vmem:[#allocation14 + $0x230] sm:$0xff]  ;;  %v4335_v21 = vld [vmem:[#allocation14 + $0x2c8] sm:$0xff]  ;;  %v4343_v22 = vrot.slane %v8886_v34, 2 }
 0x59d   : > { %7669 = vmatprep.subr.bf16.mxu1 %v8170_v0  ;;  %v7751_v41 = vpack.c.bf16 %v4329_v40, %v4328_v38  ;;  %v4333_v7 = vld [vmem:[#allocation14 + $0x2b8] sm:$0xff]  ;;  %v4246_v54 = vld [vmem:[#allocation14 + $0x250] sm:$0xff]  ;;  %v4248_v10 = vld [vmem:[#allocation14 + $0x260] sm:$0xff]  ;;  %v4253_v27 = vrot.slane %v8886_v34, 1 }
 0x59e   : > { %v4337_v3 = vld [vmem:[#allocation14 + $0x2d8] sm:$0xff]  ;;  %v4339_v13 = vld [vmem:[#allocation14 + $0x2e8] sm:$0xff]  ;;  %v4250_v45 = vld [vmem:[#allocation14 + $0x270] sm:$0xff] }
 0x59f   : > { %7647 = vmatpush3.bf16.msra.mxu0 %v7646_v43  ;;  %v4237_v43 = vld [vmem:[#allocation14 + $0x208] sm:$0xff]  ;;  %v4341_v5 = vld [vmem:[#allocation14 + $0x2f8] sm:$0xff]  ;;  %v4510_v23 = vld [vmem:[#allocation14 + $0x380] sm:$0xff] }
 0x5a0   : > { %7671 = vmatpush3.bf16.msra.mxu1 %v7670_v49  ;;  %7648 = vmatprep.subr.bf16.mxu0 %v8170_v0  ;;  %v4326_v49 = vld [vmem:[#allocation14 + $0x280] sm:$0xff]  ;;  %v7724_v33 = vpack.c.bf16 %v4237_v43, %v4236_v2  ;;  %v4874_v16 = vld [vmem:[%s8852_s14 + $0x18] sm:$0x1]  ;;  %v4511_v25 = vld [vmem:[#allocation14 + $0x388] sm:$0xff] }
 0x5a1   : > { %7672 = vmatprep.subr.bf16.mxu1 %v8170_v0  ;;  %v4344_v1 = vrot.slane %v4874_v16, 2  ;;  %v7796_v17 = vpack.c.bf16 %v4511_v25, %v4510_v23  ;;  %v4426_v2 = vld [vmem:[#allocation14 + $0x318] sm:$0xff]  ;;  %v4512_v43 = vld [vmem:[#allocation14 + $0x390] sm:$0xff]  ;;  %v4608_v23 = vld [vmem:[#allocation14 + $0x440] sm:$0xff] }
 0x5a2   : > { %v4429_v40 = vld [vmem:[#allocation14 + $0x330] sm:$0xff]  ;;  %v4609_v25 = vld [vmem:[#allocation14 + $0x448] sm:$0xff] }
 0x5a3   : > { %7650 = vmatpush3.bf16.msra.mxu0 %v7649_v35  ;;  %v7748_v35 = vpack.c.bf16 %v4327_v32, %v4326_v49  ;;  %v4345_v30 = vsel %vm448_vm3, %v4343_v22, %v4344_v1  ;;  %v4513_v49 = vld [vmem:[#allocation14 + $0x398] sm:$0xff] }
 0x5a4   : > { %7674 = vmatpush3.bf16.msra.mxu1 %v7673_v37  ;;  %7675 = vmatprep.subr.bf16.mxu0 %v8170_v0  ;;  %v4239_v37 = vld [vmem:[#allocation14 + $0x218] sm:$0xff] }
 0x5a5   : > { %7699 = vmatprep.subr.bf16.mxu1 %v8170_v0  ;;  %v4607_v22 = vld [vmem:[#allocation14 + $0x438] sm:$0xff] }
 0x5a6   : > { %6541 = vmatmul.mubr.f32.vlgmr.msra.gmra.mrb[0].mxu0 %v3909_v47  ;;  %v4240_v47 = vld [vmem:[#allocation14 + $0x220] sm:$0xff] }
 0x5a7   : > { %6576 = vmatmul.mubr.f32.vlgmr.msra.gmra.mrb[0].mxu1 %v8855_v36  ;;  %7677 = vmatpush3.bf16.msra.mxu0 %v7676_v48  ;;  %v4238_v36 = vld [vmem:[#allocation14 + $0x210] sm:$0xff]  ;;  %v4241_v48 = vld [vmem:[#allocation14 + $0x228] sm:$0xff] }
 0x5a8   : > { %7701 = vmatpush3.bf16.msra.mxu1 %v7700_v50  ;;  %7678 = vmatprep.subr.bf16.mxu0 %v8170_v0  ;;  %v7727_v12 = vpack.c.bf16 %v4239_v37, %v4238_v36  ;;  %v4330_v50 = vld [vmem:[#allocation14 + $0x2a0] sm:$0xff]  ;;  %v7730_v55 = vpack.c.bf16 %v4241_v48, %v4240_v47  ;;  %v4515_v36 = vld [vmem:[#allocation14 + $0x3a8] sm:$0xff]  ;;  %v4517_v47 = vld [vmem:[#allocation14 + $0x3b8] sm:$0xff] }
 0x5a9   : > { %7702 = vmatprep.subr.bf16.mxu1 %v8170_v0  ;;  %6610 = vmatprep.mubr.msk.f32.mxu0 %vm8171_vm15, %v8172_v59  ;;  %v7754_v8 = vpack.c.bf16 %v4331_v52, %v4330_v50  ;;  %v4431_v52 = vld [vmem:[#allocation14 + $0x340] sm:$0xff] }
 0x5aa   : > { %6645 = vmatprep.mubr.msk.f32.mxu1 %vm8171_vm15, %v8172_v59 }
 0x5ab   : > { %7680 = vmatpush3.bf16.msra.mxu0 %v7679_v42  ;;  %v4243_v42 = vld [vmem:[#allocation14 + $0x238] sm:$0xff] }
 0x5ac   : > { %7704 = vmatpush3.bf16.msra.mxu1 %v7703_v44  ;;  %7681 = vmatprep.subr.bf16.mxu0 %v8170_v0  ;;  %v4332_v44 = vld [vmem:[#allocation14 + $0x2b0] sm:$0xff]  ;;  %v7733_v61 = vpack.c.bf16 %v4243_v42, %v4242_v39  ;;  %v4519_v39 = vld [vmem:[#allocation14 + $0x3c8] sm:$0xff] }
 0x5ad   : > { %7705 = vmatprep.subr.bf16.mxu1 %v8170_v0  ;;  %v7757_v51 = vpack.c.bf16 %v4333_v7, %v4332_v44  ;;  %v4433_v7 = vld [vmem:[#allocation14 + $0x350] sm:$0xff] }
 0x5af   : > { %7683 = vmatpush3.bf16.msra.mxu0 %v7682_v26  ;;  %v4245_v26 = vld [vmem:[#allocation14 + $0x248] sm:$0xff] }
 0x5b0   : > { %7707 = vmatpush3.bf16.msra.mxu1 %v7706_v56  ;;  %7684 = vmatprep.subr.bf16.mxu0 %v8170_v0  ;;  %v4334_v56 = vld [vmem:[#allocation14 + $0x2c0] sm:$0xff]  ;;  %v7736_v57 = vpack.c.bf16 %v4245_v26, %v4244_v53  ;;  %v4521_v53 = vld [vmem:[#allocation14 + $0x3d8] sm:$0xff] }
 0x5b1   : > { %7708 = vmatprep.subr.bf16.mxu1 %v8170_v0  ;;  %v7760_v58 = vpack.c.bf16 %v4335_v21, %v4334_v56  ;;  %v4435_v21 = vld [vmem:[#allocation14 + $0x360] sm:$0xff] }
 0x5b3   : > { %7686 = vmatpush3.bf16.msra.mxu0 %v7685_v60  ;;  %v4247_v60 = vld [vmem:[#allocation14 + $0x258] sm:$0xff] }
 0x5b4   : > { %7710 = vmatpush3.bf16.msra.mxu1 %v7709_v62  ;;  %7687 = vmatprep.subr.bf16.mxu0 %v8170_v0  ;;  %v4336_v62 = vld [vmem:[#allocation14 + $0x2d0] sm:$0xff]  ;;  %v7739_v4 = vpack.c.bf16 %v4247_v60, %v4246_v54  ;;  %v4523_v54 = vld [vmem:[#allocation14 + $0x3e8] sm:$0xff] }
 0x5b5   : > { %7711 = vmatprep.subr.bf16.mxu1 %v8170_v0  ;;  %v7763_v6 = vpack.c.bf16 %v4337_v3, %v4336_v62  ;;  %v4437_v3 = vld [vmem:[#allocation14 + $0x370] sm:$0xff] }
 0x5b7   : > { %7689 = vmatpush3.bf16.msra.mxu0 %v7688_v46  ;;  %v4249_v46 = vld [vmem:[#allocation14 + $0x268] sm:$0xff] }
 0x5b8   : > { %7713 = vmatpush3.bf16.msra.mxu1 %v7712_v11  ;;  %7690 = vmatprep.subr.bf16.mxu0 %v8170_v0  ;;  %v4338_v11 = vld [vmem:[#allocation14 + $0x2e0] sm:$0xff]  ;;  %v7742_v24 = vpack.c.bf16 %v4249_v46, %v4248_v10  ;;  %v4525_v10 = vld [vmem:[#allocation14 + $0x3f8] sm:$0xff] }
 0x5b9   : > { %7714 = vmatprep.subr.bf16.mxu1 %v8170_v0  ;;  %v7766_v63 = vpack.c.bf16 %v4339_v13, %v4338_v11  ;;  %v4876_v13 = vld [vmem:[%s8852_s14 + $0x20] sm:$0xff] }
 0x5bb   : > { %7692 = vmatpush3.bf16.msra.mxu0 %v7691_v14  ;;  %v4251_v14 = vld [vmem:[#allocation14 + $0x278] sm:$0xff] }
 0x5bc   : > { %7716 = vmatpush3.bf16.msra.mxu1 %v7715_v15  ;;  %7693 = vmatprep.subr.bf16.mxu0 %v8170_v0  ;;  %v4340_v15 = vld [vmem:[#allocation14 + $0x2f0] sm:$0xff]  ;;  %v7745_v18 = vpack.c.bf16 %v4251_v14, %v4250_v45  ;;  %v4527_v45 = vrot.slane %v4876_v13, 1 }
 0x5bd   : > { %7717 = vmatprep.subr.bf16.mxu1 %v8170_v0  ;;  %v7769_v19 = vpack.c.bf16 %v4341_v5, %v4340_v15  ;;  %v4602_v15 = vld [vmem:[#allocation14 + $0x410] sm:$0xff]  ;;  %v4603_v5 = vld [vmem:[#allocation14 + $0x418] sm:$0xff] }
 0x5be   : > { %v7823_v16 = vpack.c.bf16 %v4603_v5, %v4602_v15 }
 0x5bf   : > { %7695 = vmatpush3.bf16.msra.mxu0 %v7694_v20  ;;  %v4423_v20 = vld [vmem:[#allocation14 + $0x300] sm:$0xff] }
 0x5c0   : > { %7719 = vmatpush3.bf16.msra.mxu1 %v7718_v9  ;;  %7696 = vmatprep.subr.bf16.mxu0 %v8170_v0  ;;  %v4424_v9 = vld [vmem:[#allocation14 + $0x308] sm:$0xff] }
 0x5c1   : > { %7720 = vmatprep.subr.bf16.mxu1 %v8170_v0 }
 0x5c3   : > { %7698 = vmatpush3.bf16.msra.mxu0 %v7697_v29  ;;  %v7772_v29 = vpack.c.bf16 %v4424_v9, %v4423_v20  ;;  %v4606_v9 = vld [vmem:[#allocation14 + $0x430] sm:$0xff] }
 0x5c4   : > { %7722 = vmatpush3.bf16.msra.mxu1 %v7721_v31  ;;  %7723 = vmatprep.subr.bf16.mxu0 %v8170_v0  ;;  %v4425_v31 = vld [vmem:[#allocation14 + $0x310] sm:$0xff]  ;;  %v7829_v1 = vpack.c.bf16 %v4607_v22, %v4606_v9 }
 0x5c5   : > { %7747 = vmatprep.subr.bf16.mxu1 %v8170_v0  ;;  %v7775_v32 = vpack.c.bf16 %v4426_v2, %v4425_v31  ;;  %v4613_v31 = vld [vmem:[#allocation14 + $0x468] sm:$0xff] }
 0x5c6   : > { %6611 = vmatmul.mubr.f32.vlgmr.msra.gmra.mrb[2].mxu0 %v4071_v28  ;;  %v7799_v28 = vpack.c.bf16 %v4513_v49, %v4512_v43  ;;  %v4614_v43 = vld [vmem:[#allocation14 + $0x470] sm:$0xff]  ;;  %v4615_v49 = vld [vmem:[#allocation14 + $0x478] sm:$0xff] }
 0x5c7   : > { %7725 = vmatpush3.bf16.msra.mxu0 %v7724_v33  ;;  %6646 = vmatmul.mubr.f32.vlgmr.msra.gmra.mrb[2].mxu1 %v8886_v34  ;;  %v4427_v33 = vld [vmem:[#allocation14 + $0x320] sm:$0xff]  ;;  %v4428_v34 = vld [vmem:[#allocation14 + $0x328] sm:$0xff] }
 0x5c8   : > { %7749 = vmatpush3.bf16.msra.mxu1 %v7748_v35  ;;  %7726 = vmatprep.subr.bf16.mxu0 %v8170_v0  ;;  %v4514_v35 = vld [vmem:[#allocation14 + $0x3a0] sm:$0xff]  ;;  %v7778_v37 = vpack.c.bf16 %v4428_v34, %v4427_v33  ;;  %v4617_v33 = vrot.slane %v4876_v13, 2 }
 0x5c9   : > { %7750 = vmatprep.subr.bf16.mxu1 %v8170_v0  ;;  %6680 = vmatprep.mubr.msk.f32.mxu0 %vm8171_vm15, %v8172_v59  ;;  %v7802_v38 = vpack.c.bf16 %v4515_v36, %v4514_v35 }
 0x5ca   : > { %6715 = vmatprep.mubr.msk.f32.mxu1 %vm8171_vm15, %v8172_v59 }
 0x5cb   : > { %7728 = vmatpush3.bf16.msra.mxu0 %v7727_v12  ;;  %v4430_v12 = vld [vmem:[#allocation14 + $0x338] sm:$0xff] }
 0x5cc   : > { %7752 = vmatpush3.bf16.msra.mxu1 %v7751_v41  ;;  %7729 = vmatprep.subr.bf16.mxu0 %v8170_v0  ;;  %v4516_v41 = vld [vmem:[#allocation14 + $0x3b0] sm:$0xff]  ;;  %v7781_v48 = vpack.c.bf16 %v4430_v12, %v4429_v40 }
 0x5cd   : > { %7753 = vmatprep.subr.bf16.mxu1 %v8170_v0  ;;  %v7805_v50 = vpack.c.bf16 %v4517_v47, %v4516_v41 }
 0x5cf   : > { %7731 = vmatpush3.bf16.msra.mxu0 %v7730_v55  ;;  %v4432_v55 = vld [vmem:[#allocation14 + $0x348] sm:$0xff] }
 0x5d0   : > { %7755 = vmatpush3.bf16.msra.mxu1 %v7754_v8  ;;  %7732 = vmatprep.subr.bf16.mxu0 %v8170_v0  ;;  %v4518_v8 = vld [vmem:[#allocation14 + $0x3c0] sm:$0xff]  ;;  %v7784_v42 = vpack.c.bf16 %v4432_v55, %v4431_v52 }
 0x5d1   : > { %7756 = vmatprep.subr.bf16.mxu1 %v8170_v0  ;;  %v7808_v44 = vpack.c.bf16 %v4519_v39, %v4518_v8 }
 0x5d3   : > { %7734 = vmatpush3.bf16.msra.mxu0 %v7733_v61  ;;  %v4434_v61 = vld [vmem:[#allocation14 + $0x358] sm:$0xff] }
 0x5d4   : > { %7758 = vmatpush3.bf16.msra.mxu1 %v7757_v51  ;;  %7735 = vmatprep.subr.bf16.mxu0 %v8170_v0  ;;  %v4520_v51 = vld [vmem:[#allocation14 + $0x3d0] sm:$0xff]  ;;  %v7787_v26 = vpack.c.bf16 %v4434_v61, %v4433_v7 }
 0x5d5   : > { %7759 = vmatprep.subr.bf16.mxu1 %v8170_v0  ;;  %v7811_v56 = vpack.c.bf16 %v4521_v53, %v4520_v51 }
 0x5d7   : > { %7737 = vmatpush3.bf16.msra.mxu0 %v7736_v57  ;;  %v4436_v57 = vld [vmem:[#allocation14 + $0x368] sm:$0xff] }
 0x5d8   : > { %7761 = vmatpush3.bf16.msra.mxu1 %v7760_v58  ;;  %7738 = vmatprep.subr.bf16.mxu0 %v8170_v0  ;;  %v4522_v58 = vld [vmem:[#allocation14 + $0x3e0] sm:$0xff]  ;;  %v7790_v60 = vpack.c.bf16 %v4436_v57, %v4435_v21 }
 0x5d9   : > { %7762 = vmatprep.subr.bf16.mxu1 %v8170_v0  ;;  %v7814_v62 = vpack.c.bf16 %v4523_v54, %v4522_v58  ;;  %v4694_v58 = vld [vmem:[%s4693_s16] sm:$0x7f] }
 0x5db   : > { %7740 = vmatpush3.bf16.msra.mxu0 %v7739_v4  ;;  %v4438_v4 = vld [vmem:[#allocation14 + $0x378] sm:$0xff] }
 0x5dc   : > { %7764 = vmatpush3.bf16.msra.mxu1 %v7763_v6  ;;  %7741 = vmatprep.subr.bf16.mxu0 %v8170_v0  ;;  %v4524_v6 = vld [vmem:[#allocation14 + $0x3f0] sm:$0xff]  ;;  %v7793_v46 = vpack.c.bf16 %v4438_v4, %v4437_v3 }
 0x5dd   : > { %7765 = vmatprep.subr.bf16.mxu1 %v8170_v0  ;;  %v7817_v11 = vpack.c.bf16 %v4525_v10, %v4524_v6 }
 0x5df   : > { %7743 = vmatpush3.bf16.msra.mxu0 %v7742_v24  ;;  %v4600_v24 = vld [vmem:[#allocation14 + $0x400] sm:$0xff] }
 0x5e0   : > { %7767 = vmatpush3.bf16.msra.mxu1 %v7766_v63  ;;  %7744 = vmatprep.subr.bf16.mxu0 %v8170_v0  ;;  %v4601_v63 = vld [vmem:[#allocation14 + $0x408] sm:$0xff] }
 0x5e1   : > { %7768 = vmatprep.subr.bf16.mxu1 %v8170_v0  ;;  %v7820_v14 = vpack.c.bf16 %v4601_v63, %v4600_v24 }
 0x5e3   : > { %7746 = vmatpush3.bf16.msra.mxu0 %v7745_v18  ;;  %v4604_v18 = vld [vmem:[#allocation14 + $0x420] sm:$0xff] }
 0x5e4   : > { %7770 = vmatpush3.bf16.msra.mxu1 %v7769_v19  ;;  %7771 = vmatprep.subr.bf16.mxu0 %v8170_v0  ;;  %v4605_v19 = vld [vmem:[#allocation14 + $0x428] sm:$0xff] }
 0x5e5   : > { %7795 = vmatprep.subr.bf16.mxu1 %v8170_v0  ;;  %v7826_v20 = vpack.c.bf16 %v4605_v19, %v4604_v18 }
 0x5e6   : > { %6681 = vmatmul.mubr.f32.vlgmr.msra.gmra.mrb[4].mxu0 %v4253_v27  ;;  %v7832_v27 = vpack.c.bf16 %v4609_v25, %v4608_v23 }
 0x5e7   : > { %7773 = vmatpush3.bf16.msra.mxu0 %v7772_v29  ;;  %6716 = vmatmul.mubr.f32.vlgmr.msra.gmra.mrb[4].mxu1 %v4345_v30  ;;  %v4610_v29 = vld [vmem:[#allocation14 + $0x450] sm:$0xff]  ;;  %v4611_v30 = vld [vmem:[#allocation14 + $0x458] sm:$0xff] }
 0x5e8   : > { %7797 = vmatpush3.bf16.msra.mxu1 %v7796_v17  ;;  %7774 = vmatprep.subr.bf16.mxu0 %v8170_v0  ;;  %v4612_v17 = vld [vmem:[#allocation14 + $0x460] sm:$0xff] }
 0x5e9   : > { %7798 = vmatprep.subr.bf16.mxu1 %v8170_v0  ;;  %6750 = vmatprep.mubr.msk.f32.mxu0 %vm8171_vm15, %v8172_v59  ;;  %v7838_v2 = vpack.c.bf16 %v4613_v31, %v4612_v17 }
 0x5ea   : > { %6785 = vmatprep.mubr.msk.f32.mxu1 %vm8171_vm15, %v8172_v59 }
 0x5eb   : > { %7776 = vmatpush3.bf16.msra.mxu0 %v7775_v32  ;;  %v4877_v32 = vld [vmem:[%s8852_s14 + $0x28] sm:$0x1] }
 0x5ec   : > { %7800 = vmatpush3.bf16.msra.mxu1 %v7799_v28  ;;  %7777 = vmatprep.subr.bf16.mxu0 %v8170_v0  ;;  %v7841_v28 = vpack.c.bf16 %v4615_v49, %v4614_v43  ;;  %v4618_v34 = vrot.slane %v4877_v32, 2 }
 0x5ed   : > { %7801 = vmatprep.subr.bf16.mxu1 %v8170_v0 }
 0x5ee   : > { %v4619_v35 = vsel %vm448_vm3, %v4617_v33, %v4618_v34 }
 0x5ef   : > { %7779 = vmatpush3.bf16.msra.mxu0 %v7778_v37 }
 0x5f0   : > { %7803 = vmatpush3.bf16.msra.mxu1 %v7802_v38  ;;  %7780 = vmatprep.subr.bf16.mxu0 %v8170_v0 }
 0x5f1   : > { %7804 = vmatprep.subr.bf16.mxu1 %v8170_v0 }
 0x5f3   : > { %7782 = vmatpush3.bf16.msra.mxu0 %v7781_v48 }
 0x5f4   : > { %7806 = vmatpush3.bf16.msra.mxu1 %v7805_v50  ;;  %7783 = vmatprep.subr.bf16.mxu0 %v8170_v0 }
 0x5f5   : > { %7807 = vmatprep.subr.bf16.mxu1 %v8170_v0 }
 0x5f7   : > { %7785 = vmatpush3.bf16.msra.mxu0 %v7784_v42 }
 0x5f8   : > { %7809 = vmatpush3.bf16.msra.mxu1 %v7808_v44  ;;  %7786 = vmatprep.subr.bf16.mxu0 %v8170_v0 }
 0x5f9   : > { %7810 = vmatprep.subr.bf16.mxu1 %v8170_v0 }
 0x5fb   : > { %7788 = vmatpush3.bf16.msra.mxu0 %v7787_v26 }
 0x5fc   : > { %7812 = vmatpush3.bf16.msra.mxu1 %v7811_v56  ;;  %7789 = vmatprep.subr.bf16.mxu0 %v8170_v0 }
 0x5fd   : > { %7813 = vmatprep.subr.bf16.mxu1 %v8170_v0 }
 0x5ff   : > { %7791 = vmatpush3.bf16.msra.mxu0 %v7790_v60 }
 0x600   : > { %7815 = vmatpush3.bf16.msra.mxu1 %v7814_v62  ;;  %7792 = vmatprep.subr.bf16.mxu0 %v8170_v0 }
 0x601   : > { %7816 = vmatprep.subr.bf16.mxu1 %v8170_v0 }
 0x603   : > { %7794 = vmatpush3.bf16.msra.mxu0 %v7793_v46 }
 0x604   : > { %7818 = vmatpush3.bf16.msra.mxu1 %v7817_v11  ;;  %7819 = vmatprep.subr.bf16.mxu0 %v8170_v0 }
 0x606   : > { %6751 = vmatmul.mubr.f32.vlgmr.msra.gmra.mrb[6].mxu0 %v4876_v13 }
 0x607   : > { %7821 = vmatpush3.bf16.msra.mxu0 %v7820_v14  ;;  %6786 = vmatmul.mubr.f32.vlgmr.msra.gmra.mrb[6].mxu1 %v4527_v45 }
 0x608   : > { %7822 = vmatprep.subr.bf16.mxu0 %v8170_v0  ;;  %6820 = vmatprep.mubr.msk.f32.mxu0 %vm8171_vm15, %v8172_v59  ;;  %v7835_v59 = vpack.c.bf16 %v4611_v30, %v4610_v29 }
 0x60b   : > { %7824 = vmatpush3.bf16.msra.mxu0 %v7823_v16 }
 0x60c   : > { %7825 = vmatprep.subr.bf16.mxu0 %v8170_v0 }
 0x60f   : > { %7827 = vmatpush3.bf16.msra.mxu0 %v7826_v20 }
 0x610   : > { %7828 = vmatprep.subr.bf16.mxu0 %v8170_v0 }
 0x613   : > { %7830 = vmatpush3.bf16.msra.mxu0 %v7829_v1 }
 0x614   : > { %7831 = vmatprep.subr.bf16.mxu0 %v8170_v0 }
 0x617   : > { %7833 = vmatpush3.bf16.msra.mxu0 %v7832_v27 }
 0x618   : > { %7834 = vmatprep.subr.bf16.mxu0 %v8170_v0 }
 0x61b   : > { %7836 = vmatpush3.bf16.msra.mxu0 %v7835_v59 }
 0x61c   : > { %7837 = vmatprep.subr.bf16.mxu0 %v8170_v0 }
 0x61f   : > { %7839 = vmatpush3.bf16.msra.mxu0 %v7838_v2 }
 0x620   : > { %7840 = vmatprep.subr.bf16.mxu0 %v8170_v0 }
 0x623   : > { %7842 = vmatpush3.bf16.msra.mxu0 %v7841_v28 }
 0x626   : > { %6821 = vmatmul.mubr.f32.vlgmr.msra.gmra.mrb[8].mxu0 %v4619_v35 }
 0x679   : > { %v3977_v36 = vpop.f32.mrb[0].mxu0 }
 0x67a   : > { %v6542_v37 = vpop.f32.mrb[1].mxu0  ;;  %v4047_v38 = vpop.f32.mrb[0].mxu1 }
 0x67b   : > { %v4048_v40 = vadd.f32 %v4047_v38, %v3977_v36  ;;  %v6577_v12 = vpop.f32.mrb[1].mxu1 }
 0x699   : > { %v4139_v41 = vpop.f32.mrb[2].mxu0 }
 0x69a   : > { %v4143_v47 = vadd.f32 %v4139_v41, %v4048_v40  ;;  %v6612_v48 = vpop.f32.mrb[3].mxu0  ;;  %v4231_v50 = vpop.f32.mrb[2].mxu1 }
 0x69b   : > { %v6647_v52 = vpop.f32.mrb[3].mxu1 }
 0x69c   : > { %v4235_v55 = vadd.f32 %v4231_v50, %v4143_v47 }
 0x6b9   : > { %v4321_v8 = vpop.f32.mrb[4].mxu0 }
 0x6ba   : > { %v4325_v39 = vadd.f32 %v4321_v8, %v4235_v55  ;;  %v6682_v42 = vpop.f32.mrb[5].mxu0  ;;  %v4413_v0 = vpop.f32.mrb[4].mxu1 }
 0x6bb   : > { %v6717_v44 = vpop.f32.mrb[5].mxu1 }
 0x6bc   : > { %v4417_v7 = vadd.f32 %v4413_v0, %v4325_v39 }
 0x6d9   : > { %v4505_v61 = vpop.f32.mrb[6].mxu0 }
 0x6da   : > { %v4509_v51 = vadd.f32 %v4505_v61, %v4417_v7  ;;  %v6752_v53 = vpop.f32.mrb[7].mxu0  ;;  %v4595_v26 = vpop.f32.mrb[6].mxu1 }
 0x6db   : > { %v6787_v56 = vpop.f32.mrb[7].mxu1 }
 0x6dc   : > { %v4599_v21 = vadd.f32 %v4595_v26, %v4509_v51 }
 0x6f8   :  { %3870 = sbr.rel (!%p3868_p4) target bundleno = 1412 (0x584), region = 181 }
 0x6f9   : > { %v4687_v57 = vpop.f32.mrb[8].mxu0 }
 0x6fa   : > { %v4691_v54 = vadd.f32 %v4687_v57, %v4599_v21  ;;  %v6822_v60 = vpop.f32.mrb[9].mxu0 }
 0x6fc   : > { %v4695_v62 = vadd.f32 %v4694_v58, %v4691_v54 }
 0x6fe   : > { %4697 = vst [vmem:[%s4696_s4] sm:$0x7f] %v4695_v62 }
 0x6ff   :  { %4702 = vsyncpa [#allocation7], 1 }
 0x700   :  { %4703 = vsyncpa [#allocation9], 1 }
 0x701   :  { %4704 = vsyncpa [#allocation12], 1 }
 0x702   :  { %4705 = vsyncpa [#allocation15], 1 }

</bundles_post_ra>
